<compile_context>
chip_gen: v6e
topology: v6e:2x2x1
jax: 0.10.0
libtpu: 0.0.40
codegen_flags: <defaults>
</compile_context>

<pallas_src>
import jax
import jax.numpy as jnp
from jax.experimental import pallas as pl
from jax.experimental.pallas import tpu as pltpu

BN_EPS = 1e-5
LANE = 128
STEM_IN_CPAD = 32                       # 4 * 32 = 128 after space-to-depth
VMEM_LIMIT_BYTES = 48 * 1024 * 1024     # fits v5e/v6e/v7x scoped budgets

_TAPS_3x3 = tuple((dh, dw) for dh in range(3) for dw in range(3))
_TAPS_2x2 = tuple((a, b) for a in range(2) for b in range(2))
_TAPS_1x1 = ((0, 0),)


def _rup(c, m=LANE):
    return ((c + m - 1) // m) * m


def _cparams():
    return pltpu.CompilerParams(
        dimension_semantics=("parallel",),
        vmem_limit_bytes=VMEM_LIMIT_BYTES,
    )


# ----------------------------- Pallas kernels ------------------------------

def _make_conv_stats_kernel(n_src, taps, ho, wo):
    """y = sum_s sum_t x_s[tap_t] @ w_s[t]; emits per-image (sum, sumsq)."""

    def kernel(*refs):
        x_refs = refs[:n_src]
        w_refs = refs[n_src:2 * n_src]
        y_ref, sum_ref, sq_ref = refs[2 * n_src:2 * n_src + 3]
        acc_ref = refs[2 * n_src + 3]

        first = True
        for s in range(n_src):
            xb = x_refs[s][0]                          # (Hp, Wp, Ci) bf16
            for t, (dh, dw) in enumerate(taps):
                patch = xb[dh:dh + ho, dw:dw + wo, :].reshape(ho * wo, -1)
                part = jnp.dot(patch, w_refs[s][t],
                               preferred_element_type=jnp.float32)
                if first:
                    acc_ref[...] = part
                    first = False
                else:
                    acc_ref[...] += part

        acc = acc_ref[...]                             # (Ho*Wo, Cout) f32
        y_ref[0] = acc.astype(y_ref.dtype)
        sum_ref[0] = jnp.sum(acc, axis=0, keepdims=True)
        sq_ref[0] = jnp.sum(acc * acc, axis=0, keepdims=True)

    return kernel


def _bn_relu_kernel(y_ref, s_ref, b_ref, o_ref):
    y = y_ref[0].astype(jnp.float32)
    o_ref[0] = jnp.maximum(y * s_ref[...] + b_ref[...], 0.0).astype(o_ref.dtype)


def _bn_relu_res_kernel(y_ref, s_ref, b_ref, r_ref, o_ref):
    y = y_ref[0].astype(jnp.float32)
    z = jnp.maximum(y * s_ref[...] + b_ref[...], 0.0)
    o_ref[0] = (z + r_ref[0].astype(jnp.float32)).astype(o_ref.dtype)


def _make_maxpool_kernel(c, ho, wo):
    # Input is the -inf padded, space-to-depth (phase-in-channel) activation.
    def kernel(x_ref, o_ref):
        xb = x_ref[0]                                  # (Ho+1, Wo+1, 4*C)
        m = None
        for dh in range(3):
            for dw in range(3):
                a, p = divmod(dh, 2)
                b, q = divmod(dw, 2)
                g = 2 * p + q
                t = xb[a:a + ho, b:b + wo, g * c:(g + 1) * c]
                m = t if m is None else jnp.maximum(m, t)
        o_ref[0] = m
    return kernel


def _head_kernel(x_ref, w_ref, b_ref, o_ref):
    # x: (N, H*W, C) -> global average pool + linear classifier.
    pooled = jnp.mean(x_ref[...].astype(jnp.float32), axis=1)
    o_ref[...] = (jnp.dot(pooled, w_ref[...],
                          preferred_element_type=jnp.float32) + b_ref[...])


# ------------------------------- conv glue ----------------------------------

def _conv_pass1(xs, ws, taps, ho, wo, cout):
    n = xs[0].shape[0]
    n_src = len(xs)
    m = ho * wo
    in_specs = []
    for x in xs:
        _, hp, wp, ci = x.shape
        in_specs.append(pl.BlockSpec((1, hp, wp, ci), lambda i: (i, 0, 0, 0)))
    for w in ws:
        t, k, co = w.shape
        in_specs.append(pl.BlockSpec((t, k, co), lambda i: (0, 0, 0)))
    out_specs = (
        pl.BlockSpec((1, m, cout), lambda i: (i, 0, 0)),
        pl.BlockSpec((1, 1, cout), lambda i: (i, 0, 0)),
        pl.BlockSpec((1, 1, cout), lambda i: (i, 0, 0)),
    )
    out_shape = (
        jax.ShapeDtypeStruct((n, m, cout), jnp.bfloat16),
        jax.ShapeDtypeStruct((n, 1, cout), jnp.float32),
        jax.ShapeDtypeStruct((n, 1, cout), jnp.float32),
    )
    return pl.pallas_call(
        _make_conv_stats_kernel(n_src, taps, ho, wo),
        grid=(n,),
        in_specs=in_specs,
        out_specs=out_specs,
        out_shape=out_shape,
        scratch_shapes=[pltpu.VMEM((m, cout), jnp.float32)],
        compiler_params=_cparams(),
    )(*xs, *ws)


def _bn_relu_pass2(y, scale, bias, residual=None):
    n, m, c = y.shape
    row_spec = pl.BlockSpec((1, m, c), lambda i: (i, 0, 0))
    vec_spec = pl.BlockSpec((1, c), lambda i: (0, 0))
    if residual is None:
        kernel, inputs = _bn_relu_kernel, (y, scale, bias)
        in_specs = [row_spec, vec_spec, vec_spec]
    else:
        kernel, inputs = _bn_relu_res_kernel, (y, scale, bias, residual)
        in_specs = [row_spec, vec_spec, vec_spec, row_spec]
    return pl.pallas_call(
        kernel,
        grid=(n,),
        in_specs=in_specs,
        out_specs=row_spec,
        out_shape=jax.ShapeDtypeStruct((n, m, c), jnp.bfloat16),
        compiler_params=_cparams(),
    )(*inputs)


def _conv_bn_relu(xs, ws, taps, out_hw, cout, residual=None):
    ho, wo = out_hw
    n = xs[0].shape[0]
    y, ssum, ssq = _conv_pass1(xs, ws, taps, ho, wo, cout)
    cnt = float(n * ho * wo)
    mean = jnp.sum(ssum, axis=0)[0] / cnt                 # (cout,)
    ex2 = jnp.sum(ssq, axis=0)[0] / cnt
    var = jnp.maximum(ex2 - mean * mean, 0.0)              # biased variance
    inv = jax.lax.rsqrt(var + BN_EPS)
    scale = inv.reshape(1, cout)
    bias = (-mean * inv).reshape(1, cout)
    if residual is not None:
        residual = residual.reshape(n, ho * wo, cout)
    out = _bn_relu_pass2(y, scale, bias, residual)
    return out.reshape(n, ho, wo, cout)


def _space_to_depth2(x):
    n, h2, w2, c = x.shape
    x = x.reshape(n, h2 // 2, 2, w2 // 2, 2, c)
    x = x.transpose(0, 1, 3, 2, 4, 5)
    return x.reshape(n, h2 // 2, w2 // 2, 4 * c)


def conv3x3_s1_bn_relu(x, w, cout, residual=None):
    _, h, wd, _ = x.shape
    xp = jnp.pad(x, ((0, 0), (1, 1), (1, 1), (0, 0)))
    return _conv_bn_relu([xp], [w], _TAPS_3x3, (h, wd), cout, residual)


def conv3x3_s2_bn_relu(x, w, cout):
    _, h, wd, _ = x.shape
    ho = (h - 1) // 2 + 1
    wo = (wd - 1) // 2 + 1
    xp = jnp.pad(x, ((0, 0), (1, 2 * ho + 1 - h), (1, 2 * wo + 1 - wd), (0, 0)))
    return _conv_bn_relu([_space_to_depth2(xp)], [w], _TAPS_2x2, (ho, wo), cout)


def conv1x1_bn_relu_multi(xs, ws, cout, residual=None):
    _, h, wd, _ = xs[0].shape
    return _conv_bn_relu(list(xs), list(ws), _TAPS_1x1, (h, wd), cout, residual)


def maxpool_3x3_s2_ceil(x):
    # nn.MaxPool2d(kernel_size=3, stride=2, ceil_mode=True), no padding.
    n, h, wd, c = x.shape
    ho = -((h - 3) // -2) + 1
    wo = -((wd - 3) // -2) + 1
    xp = jnp.pad(x, ((0, 0), (0, 2 * ho + 2 - h), (0, 2 * wo + 2 - wd), (0, 0)),
                 constant_values=-jnp.inf)
    xs = _space_to_depth2(xp)
    return pl.pallas_call(
        _make_maxpool_kernel(c, ho, wo),
        grid=(n,),
        in_specs=[pl.BlockSpec((1, ho + 1, wo + 1, 4 * c),
                               lambda i: (i, 0, 0, 0))],
        out_specs=pl.BlockSpec((1, ho, wo, c), lambda i: (i, 0, 0, 0)),
        out_shape=jax.ShapeDtypeStruct((n, ho, wo, c), x.dtype),
        compiler_params=_cparams(),
    )(xs)


def classifier_head(x, fc_w, fc_b, num_classes):
    n, h, wd, c = x.shape
    xf = x.reshape(n, h * wd, c)
    out = pl.pallas_call(
        _head_kernel,
        out_shape=jax.ShapeDtypeStruct((n, fc_w.shape[1]), jnp.float32),
        in_specs=[pl.BlockSpec(memory_space=pltpu.MemorySpace.VMEM)] * 3,
        out_specs=pl.BlockSpec(memory_space=pltpu.MemorySpace.VMEM),
    )(xf, fc_w, fc_b)
    return out[:, :num_classes]


# ------------------------------- network ------------------------------------

def osa_module(x, blk):
    identity_feat = x
    feats = [x]
    for w in blk["layers"]:
        x = conv3x3_s1_bn_relu(x, w, blk["stage_cpad"])
        feats.append(x)
    res = identity_feat if blk["identity"] else None
    # No channel concatenation: per-source refs, accumulated in-kernel.
    return conv1x1_bn_relu_multi(feats, blk["concat"], blk["concat_cpad"],
                                 residual=res)


def vovnet_forward(params, x):
    x = x.astype(jnp.bfloat16)
    cin = x.shape[-1]
    x = jnp.pad(x, ((0, 0), (0, 0), (0, 0), (0, STEM_IN_CPAD - cin)))
    for layer in params["stem"]:
        if layer["stride"] == 2:
            x = conv3x3_s2_bn_relu(x, layer["w"], layer["cout"])
        else:
            x = conv3x3_s1_bn_relu(x, layer["w"], layer["cout"])
    for stage in params["stages"]:
        if stage["pool"]:
            x = maxpool_3x3_s2_ceil(x)
        for blk in stage["blocks"]:
            x = osa_module(x, blk)
    return classifier_head(x, params["fc_w"], params["fc_b"],
                           params["num_classes"])


# ------------------------------ parameters -----------------------------------

def _s2d_weight(w):
    # (3,3,Cin,Cout) stride-2 conv -> (4 taps, 4*Cin, Cout) matching the
    # space-to-depth input layout (channel order = (row phase, col phase, c)).
    kh, kw, cin, cout = w.shape
    wp = jnp.zeros((4, 4, cin, cout), w.dtype).at[:3, :3].set(w)
    wp = wp.reshape(2, 2, 2, 2, cin, cout)      # (a, p, b, q, cin, cout)
    wp = wp.transpose(0, 2, 1, 3, 4, 5)          # (a, b, p, q, cin, cout)
    return wp.reshape(4, 4 * cin, cout)


def make_params(seed, config_stage_ch, config_concat_ch, block_per_stage,
                layer_per_block, num_classes):
    key = jax.random.PRNGKey(seed)

    def nk():
        nonlocal key
        key, sub = jax.random.split(key)
        return sub

    def conv_w(kh, kw, cin_real, cout_real, cin_pad, cout_pad, fan_in=None):
        fan_in = kh * kw * cin_real if fan_in is None else fan_in
        w = jax.random.normal(nk(), (kh, kw, cin_real, cout_real), jnp.float32)
        w = w * (2.0 / fan_in) ** 0.5                       # kaiming_normal_
        return jnp.zeros((kh, kw, cin_pad, cout_pad),
                         jnp.float32).at[:, :, :cin_real, :cout_real].set(w)

    c64, c128 = _rup(64), _rup(128)
    stem = [
        {"w": _s2d_weight(conv_w(3, 3, 3, 64, STEM_IN_CPAD, c64))
              .astype(jnp.bfloat16), "stride": 2, "cout": c64},
        {"w": conv_w(3, 3, 64, 64, c64, c64).reshape(9, c64, c64)
              .astype(jnp.bfloat16), "stride": 1, "cout": c64},
        {"w": _s2d_weight(conv_w(3, 3, 64, 128, c64, c128))
              .astype(jnp.bfloat16), "stride": 2, "cout": c128},
    ]

    stages = []
    in_real, in_pad = 128, c128
    for i in range(4):
        stage_ch, concat_ch = config_stage_ch[i], config_concat_ch[i]
        s_pad, c_pad = _rup(stage_ch), _rup(concat_ch)
        blocks = []
        for b in range(block_per_stage[i]):
            blk_in_real = in_real if b == 0 else concat_ch
            blk_in_pad = in_pad if b == 0 else c_pad
            layers = []
            ci_real, ci_pad = blk_in_real, blk_in_pad
            for _ in range(layer_per_block):
                w = conv_w(3, 3, ci_real, stage_ch, ci_pad, s_pad)
                layers.append(w.reshape(9, ci_pad, s_pad).astype(jnp.bfloat16))
                ci_real, ci_pad = stage_ch, s_pad
            cat_fan_in = blk_in_real + layer_per_block * stage_ch
            concat_ws = []
            for cr, cp in ([(blk_in_real, blk_in_pad)]
                           + [(stage_ch, s_pad)] * layer_per_block):
                w = conv_w(1, 1, cr, concat_ch, cp, c_pad, fan_in=cat_fan_in)
                concat_ws.append(w.reshape(1, cp, c_pad).astype(jnp.bfloat16))
            blocks.append({"layers": layers, "concat": concat_ws,
                           "identity": b > 0, "stage_cpad": s_pad,
                           "concat_cpad": c_pad})
        stages.append({"pool": (i + 2) != 2, "blocks": blocks})
        in_real, in_pad = concat_ch, c_pad

    cfin_real, cfin_pad = config_concat_ch[-1], _rup(config_concat_ch[-1])
    ncls_pad = _rup(num_classes)
    bound = 1.0 / (cfin_real ** 0.5)
    wfc = jax.random.uniform(nk(), (cfin_real, num_classes), jnp.float32,
                             -bound, bound)
    fc_w = jnp.zeros((cfin_pad, ncls_pad),
                     jnp.float32).at[:cfin_real, :num_classes].set(wfc)
    fc_b = jnp.zeros((1, ncls_pad), jnp.float32)

    return {"stem": stem, "stages": stages, "fc_w": fc_w, "fc_b": fc_b,
            "num_classes": num_classes}


# --------------------------------- main --------------------------------------

if __name__ == "__main__":
    # Small synthetic VoVNet configuration.
    config_stage_ch = [8, 8, 8, 8]
    config_concat_ch = [16, 16, 16, 16]
    block_per_stage = [1, 1, 2, 1]      # stage4 exercises the identity path
    layer_per_block = 2
    num_classes = 10

    params = make_params(0, config_stage_ch, config_concat_ch,
                         block_per_stage, layer_per_block, num_classes)

    x = jax.random.normal(jax.random.PRNGKey(0), (2, 64, 64, 3), jnp.float32)

    out = vovnet_forward(params, x)
    out = jax.block_until_ready(out)

    assert out.shape == (2, num_classes), out.shape
    assert bool(jnp.all(jnp.isfinite(out)))
    print("KERNEL_OK")
</pallas_src>

<mosaic_0001>
module attributes {stable_mosaic.version = 11 : i64} {
  func.func @kernel(%arg0: i32, %arg1: memref<1x33x33x128xbf16, #tpu.memory_space<vmem>>, %arg2: memref<4x128x128xbf16, #tpu.memory_space<vmem>>, %arg3: memref<1x1024x128xbf16, #tpu.memory_space<vmem>>, %arg4: memref<1x1x128xf32, #tpu.memory_space<vmem>>, %arg5: memref<1x1x128xf32, #tpu.memory_space<vmem>>, %arg6: memref<1024x128xf32, #tpu.memory_space<vmem>>) attributes {dimension_semantics = [#tpu.dimension_semantics<parallel>], iteration_bounds = array<i64: 2>, scalar_prefetch = 0 : i64, scratch_operands = 1 : i64, tpu.core_type = #tpu.core_type<tc>, window_params = [{transform_indices = @transform_0, window_bounds = array<i64: 1, 33, 33, 128>}, {pipeline_mode = #tpu.pipeline_mode<synchronous>, transform_indices = @transform_1, window_bounds = array<i64: 4, 128, 128>}, {transform_indices = @transform_2, window_bounds = array<i64: 1, 1024, 128>}, {transform_indices = @transform_3, window_bounds = array<i64: 1, 1, 128>}, {transform_indices = @transform_4, window_bounds = array<i64: 1, 1, 128>}]} {
    %c0 = arith.constant 0 : index
    %c0_0 = arith.constant 0 : index
    %c0_1 = arith.constant 0 : index
    %c0_2 = arith.constant 0 : index
    %0 = vector.load %arg1[%c0, %c0_0, %c0_1, %c0_2] : memref<1x33x33x128xbf16, #tpu.memory_space<vmem>>, vector<1x33x33x128xbf16>
    %1 = vector.shape_cast %0 : vector<1x33x33x128xbf16> to vector<33x33x128xbf16>
    %2 = vector.extract_strided_slice %1 {offsets = [0, 0, 0], sizes = [32, 32, 128], strides = [1, 1, 1]} : vector<33x33x128xbf16> to vector<32x32x128xbf16>
    %3 = vector.shape_cast %2 : vector<32x32x128xbf16> to vector<1024x128xbf16>
    %c0_3 = arith.constant 0 : index
    %c0_4 = arith.constant 0 : index
    %c0_5 = arith.constant 0 : index
    %4 = vector.load %arg2[%c0_3, %c0_4, %c0_5] : memref<4x128x128xbf16, #tpu.memory_space<vmem>>, vector<1x128x128xbf16>
    %5 = vector.shape_cast %4 : vector<1x128x128xbf16> to vector<128x128xbf16>
    %cst = arith.constant dense<0.000000e+00> : vector<1024x128xf32>
    %6 = tpu.matmul %3, %5, %cst {dimension_numbers = #tpu.dot_dimension_numbers<[1], [0], [0], [1], [0, 0, 1, 1], [], []>} : vector<1024x128xbf16>, vector<128x128xbf16>, vector<1024x128xf32> -> vector<1024x128xf32>
    %c0_6 = arith.constant 0 : index
    %c0_7 = arith.constant 0 : index
    %7 = vector.load %arg6[%c0_6, %c0_7] : memref<1024x128xf32, #tpu.memory_space<vmem>>, vector<1024x128xf32>
    tpu.vector_store %arg6[%c0_6, %c0_7], %6 {strides = array<i32>} : memref<1024x128xf32, #tpu.memory_space<vmem>>, vector<1024x128xf32>,
    %8 = vector.extract_strided_slice %1 {offsets = [0, 1, 0], sizes = [32, 32, 128], strides = [1, 1, 1]} : vector<33x33x128xbf16> to vector<32x32x128xbf16>
    %9 = vector.shape_cast %8 : vector<32x32x128xbf16> to vector<1024x128xbf16>
    %c1 = arith.constant 1 : index
    %c0_8 = arith.constant 0 : index
    %c0_9 = arith.constant 0 : index
    %10 = vector.load %arg2[%c1, %c0_8, %c0_9] : memref<4x128x128xbf16, #tpu.memory_space<vmem>>, vector<1x128x128xbf16>
    %11 = vector.shape_cast %10 : vector<1x128x128xbf16> to vector<128x128xbf16>
    %cst_10 = arith.constant dense<0.000000e+00> : vector<1024x128xf32>
    %12 = tpu.matmul %9, %11, %cst_10 {dimension_numbers = #tpu.dot_dimension_numbers<[1], [0], [0], [1], [0, 0, 1, 1], [], []>} : vector<1024x128xbf16>, vector<128x128xbf16>, vector<1024x128xf32> -> vector<1024x128xf32>
    %c0_11 = arith.constant 0 : index
    %c0_12 = arith.constant 0 : index
    %13 = vector.load %arg6[%c0_11, %c0_12] : memref<1024x128xf32, #tpu.memory_space<vmem>>, vector<1024x128xf32>
    %14 = arith.addf %13, %12 : vector<1024x128xf32>
    %c0_13 = arith.constant 0 : index
    %c0_14 = arith.constant 0 : index
    %15 = vector.load %arg6[%c0_13, %c0_14] : memref<1024x128xf32, #tpu.memory_space<vmem>>, vector<1024x128xf32>
    tpu.vector_store %arg6[%c0_13, %c0_14], %14 {strides = array<i32>} : memref<1024x128xf32, #tpu.memory_space<vmem>>, vector<1024x128xf32>,
    %16 = vector.extract_strided_slice %1 {offsets = [1, 0, 0], sizes = [32, 32, 128], strides = [1, 1, 1]} : vector<33x33x128xbf16> to vector<32x32x128xbf16>
    %17 = vector.shape_cast %16 : vector<32x32x128xbf16> to vector<1024x128xbf16>
    %c2 = arith.constant 2 : index
    %c0_15 = arith.constant 0 : index
    %c0_16 = arith.constant 0 : index
    %18 = vector.load %arg2[%c2, %c0_15, %c0_16] : memref<4x128x128xbf16, #tpu.memory_space<vmem>>, vector<1x128x128xbf16>
    %19 = vector.shape_cast %18 : vector<1x128x128xbf16> to vector<128x128xbf16>
    %cst_17 = arith.constant dense<0.000000e+00> : vector<1024x128xf32>
    %20 = tpu.matmul %17, %19, %cst_17 {dimension_numbers = #tpu.dot_dimension_numbers<[1], [0], [0], [1], [0, 0, 1, 1], [], []>} : vector<1024x128xbf16>, vector<128x128xbf16>, vector<1024x128xf32> -> vector<1024x128xf32>
    %c0_18 = arith.constant 0 : index
    %c0_19 = arith.constant 0 : index
    %21 = vector.load %arg6[%c0_18, %c0_19] : memref<1024x128xf32, #tpu.memory_space<vmem>>, vector<1024x128xf32>
    %22 = arith.addf %21, %20 : vector<1024x128xf32>
    %c0_20 = arith.constant 0 : index
    %c0_21 = arith.constant 0 : index
    %23 = vector.load %arg6[%c0_20, %c0_21] : memref<1024x128xf32, #tpu.memory_space<vmem>>, vector<1024x128xf32>
    tpu.vector_store %arg6[%c0_20, %c0_21], %22 {strides = array<i32>} : memref<1024x128xf32, #tpu.memory_space<vmem>>, vector<1024x128xf32>,
    %24 = vector.extract_strided_slice %1 {offsets = [1, 1, 0], sizes = [32, 32, 128], strides = [1, 1, 1]} : vector<33x33x128xbf16> to vector<32x32x128xbf16>
    %25 = vector.shape_cast %24 : vector<32x32x128xbf16> to vector<1024x128xbf16>
    %c3 = arith.constant 3 : index
    %c0_22 = arith.constant 0 : index
    %c0_23 = arith.constant 0 : index
    %26 = vector.load %arg2[%c3, %c0_22, %c0_23] : memref<4x128x128xbf16, #tpu.memory_space<vmem>>, vector<1x128x128xbf16>
    %27 = vector.shape_cast %26 : vector<1x128x128xbf16> to vector<128x128xbf16>
    %cst_24 = arith.constant dense<0.000000e+00> : vector<1024x128xf32>
    %28 = tpu.matmul %25, %27, %cst_24 {dimension_numbers = #tpu.dot_dimension_numbers<[1], [0], [0], [1], [0, 0, 1, 1], [], []>} : vector<1024x128xbf16>, vector<128x128xbf16>, vector<1024x128xf32> -> vector<1024x128xf32>
    %c0_25 = arith.constant 0 : index
    %c0_26 = arith.constant 0 : index
    %29 = vector.load %arg6[%c0_25, %c0_26] : memref<1024x128xf32, #tpu.memory_space<vmem>>, vector<1024x128xf32>
    %30 = arith.addf %29, %28 : vector<1024x128xf32>
    %c0_27 = arith.constant 0 : index
    %c0_28 = arith.constant 0 : index
    %31 = vector.load %arg6[%c0_27, %c0_28] : memref<1024x128xf32, #tpu.memory_space<vmem>>, vector<1024x128xf32>
    tpu.vector_store %arg6[%c0_27, %c0_28], %30 {strides = array<i32>} : memref<1024x128xf32, #tpu.memory_space<vmem>>, vector<1024x128xf32>,
    %c0_29 = arith.constant 0 : index
    %c0_30 = arith.constant 0 : index
    %32 = vector.load %arg6[%c0_29, %c0_30] : memref<1024x128xf32, #tpu.memory_space<vmem>>, vector<1024x128xf32>
    %33 = arith.truncf %32 : vector<1024x128xf32> to vector<1024x128xbf16>
    %c0_31 = arith.constant 0 : index
    %c0_32 = arith.constant 0 : index
    %c0_33 = arith.constant 0 : index
    %34 = vector.load %arg3[%c0_31, %c0_32, %c0_33] : memref<1x1024x128xbf16, #tpu.memory_space<vmem>>, vector<1x1024x128xbf16>
    %35 = vector.shape_cast %34 : vector<1x1024x128xbf16> to vector<1024x128xbf16>
    %36 = vector.shape_cast %33 : vector<1024x128xbf16> to vector<1x1024x128xbf16>
    tpu.vector_store %arg3[%c0_31, %c0_32, %c0_33], %36 {strides = array<i32>} : memref<1x1024x128xbf16, #tpu.memory_space<vmem>>, vector<1x1024x128xbf16>,
    %cst_34 = arith.constant dense<0.000000e+00> : vector<128xf32>
    %37 = vector.multi_reduction <add>, %32, %cst_34 [0] : vector<1024x128xf32> to vector<128xf32>
    %38 = vector.shape_cast %37 : vector<128xf32> to vector<1x128xf32>
    %c0_35 = arith.constant 0 : index
    %c0_36 = arith.constant 0 : index
    %c0_37 = arith.constant 0 : index
    %39 = vector.load %arg4[%c0_35, %c0_36, %c0_37] : memref<1x1x128xf32, #tpu.memory_space<vmem>>, vector<1x1x128xf32>
    %40 = vector.shape_cast %39 : vector<1x1x128xf32> to vector<1x128xf32>
    %41 = vector.shape_cast %38 : vector<1x128xf32> to vector<1x1x128xf32>
    tpu.vector_store %arg4[%c0_35, %c0_36, %c0_37], %41 {strides = array<i32>} : memref<1x1x128xf32, #tpu.memory_space<vmem>>, vector<1x1x128xf32>,
    %42 = arith.mulf %32, %32 : vector<1024x128xf32>
    %cst_38 = arith.constant dense<0.000000e+00> : vector<128xf32>
    %43 = vector.multi_reduction <add>, %42, %cst_38 [0] : vector<1024x128xf32> to vector<128xf32>
    %44 = vector.shape_cast %43 : vector<128xf32> to vector<1x128xf32>
    %c0_39 = arith.constant 0 : index
    %c0_40 = arith.constant 0 : index
    %c0_41 = arith.constant 0 : index
    %45 = vector.load %arg5[%c0_39, %c0_40, %c0_41] : memref<1x1x128xf32, #tpu.memory_space<vmem>>, vector<1x1x128xf32>
    %46 = vector.shape_cast %45 : vector<1x1x128xf32> to vector<1x128xf32>
    %47 = vector.shape_cast %44 : vector<1x128xf32> to vector<1x1x128xf32>
    tpu.vector_store %arg5[%c0_39, %c0_40, %c0_41], %47 {strides = array<i32>} : memref<1x1x128xf32, #tpu.memory_space<vmem>>, vector<1x1x128xf32>,
    return
  }
  func.func @transform_0(%arg0: i32) -> (i32, i32, i32, i32) {
    %c0_i32 = arith.constant 0 : i32
    %c0_i32_0 = arith.constant 0 : i32
    %c0_i32_1 = arith.constant 0 : i32
    %c0_i32_2 = arith.constant 0 : i32
    return %arg0, %c0_i32, %c0_i32_0, %c0_i32_1 : i32, i32, i32, i32
  }
  func.func @transform_1(%arg0: i32) -> (i32, i32, i32) {
    %c0_i32 = arith.constant 0 : i32
    %c0_i32_0 = arith.constant 0 : i32
    %c0_i32_1 = arith.constant 0 : i32
    %c0_i32_2 = arith.constant 0 : i32
    return %c0_i32, %c0_i32_0, %c0_i32_1 : i32, i32, i32
  }
  func.func @transform_2(%arg0: i32) -> (i32, i32, i32) {
    %c0_i32 = arith.constant 0 : i32
    %c0_i32_0 = arith.constant 0 : i32
    %c0_i32_1 = arith.constant 0 : i32
    return %arg0, %c0_i32, %c0_i32_0 : i32, i32, i32
  }
  func.func @transform_3(%arg0: i32) -> (i32, i32, i32) {
    %c0_i32 = arith.constant 0 : i32
    %c0_i32_0 = arith.constant 0 : i32
    %c0_i32_1 = arith.constant 0 : i32
    return %arg0, %c0_i32, %c0_i32_0 : i32, i32, i32
  }
  func.func @transform_4(%arg0: i32) -> (i32, i32, i32) {
    %c0_i32 = arith.constant 0 : i32
    %c0_i32_0 = arith.constant 0 : i32
    %c0_i32_1 = arith.constant 0 : i32
    return %arg0, %c0_i32, %c0_i32_0 : i32, i32, i32
  }
}

</mosaic_0001>

<bundles_post_ra>
// kernel: tpu_custom_call.1
= control target key start
LH: loop header
LB: loop body
LE: loop exit
PB: predicated region body
PF: predicated region fallthrough
CT: control target
= control target key end

     0   :  { %10 = vsyncpa [#allocation4], 0  ;;  %s11284_s0 = inlined_call_operand.vmem [shape: bf16[2,33,33,128], index: 0, kind: input, shape index: {}]   ;;  %s11285_s1 = inlined_call_operand.vmem [shape: bf16[4,128,128], index: 1, kind: input, shape index: {}]   ;;  %s11286_s2 = inlined_call_operand.hbm [shape: bf16[2,1024,128], index: 2, kind: output, shape index: {0}]   ;;  %s11287_s3 = inlined_call_operand.hbm [shape: f32[2,1,128], index: 3, kind: output, shape index: {1}]   ;;  %s11288_s4 = inlined_call_operand.hbm [shape: f32[2,1,128], index: 4, kind: output, shape index: {2}]  }
   0x1   :  { %12 = vsyncpa [#allocation4 + $0x1], 0 }
   0x2   :  { %13 = vsyncpa [#allocation6], 0 }
   0x3   :  { %15 = vsyncpa [#allocation6 + $0x1], 0  ;;  %s9566_s15 = smov 0   ;;  %s9568_s16 = smov 0  }
   0x4   :  { %s9570_s17 = smov 0   ;;  %s9572_s18 = smov 0  }
   0x5 LB: > { %s9587_s19 = sadd.s32 4294967295, %s9534_s18   ;;  %s7539_s20 = sadd.s32 4294967294, %s9534_s18   ;;  %s9534_s18 = sphi %s9572_s18, %s11794_s18   ;;  %s9530_s17 = sphi %s9570_s17, %s11793_s17   ;;  %s9526_s16 = sphi %s9568_s16, %s11792_s16   ;;  %s9522_s15 = sphi %s9566_s15, %s11791_s15  }
   0x6   : > { %s9591_s21 = sadd.s32 1, %s9534_s18   ;;  %s75_s22 = sadd.s32 1, %s9530_s17 }
   0x7   : > { %s72_s23 = ssub.s32 %s9534_s18, %s9591_s21  ;;  %p85_p0 = scmp.ne.s32.totalorder %s9530_s17, %s9526_s16 }
   0x8   : > { %p73_p1 = scmp.eq.s32.totalorder %s72_s23, 0  ;;  %p86_p2 = scmp.eq.s32.totalorder %s9587_s19, 1 }
   0x9   : > { %p91_p3 = scmp.ne.s32.totalorder %s9526_s16, %s9522_s15  ;;  %p92_p4 = scmp.eq.s32.totalorder %s7539_s20, 1 }
   0xa   : > { %s9604_s24 = scalar_select %p73_p1, %s9530_s17, %s75_s22  }
   0xb   : > { %p9606_p5 = por %p86_p2, %p85_p0  ;;  %p9610_p6 = por %p92_p4, %p91_p3 }
   0xc   : > { %p7542_p7 = scmp.ge.s32.totalorder %s9534_s18, 1  ;;  %p173_p8 = scmp.lt.s32.totalorder %s9534_s18, 3 }
   0xe   : > { %p174_p9 = pnand %p7542_p7, %p173_p8 }
  0x10   : > { %177 = sbr.rel (%p174_p9) target bundleno = 843 (0x34b), region = 28 }
  0x15   : > { %v9320_v0 = vld [vmem:[%s11285_s1 + $0x38] sm:$0xff]   ;;  %p207_p10 = scmp.lt.s32.totalorder %s9587_s19, 1  ;;  %v9322_v2 = vld [vmem:[%s11285_s1 + $0x30] sm:$0xff]   ;;  %v9324_v4 = vld [vmem:[%s11285_s1 + $0x28] sm:$0xff]   ;;  %vm1499_vm0 = vsmask.f32 3328 }
  0x16   : > { %v9321_v1 = vld [vmem:[%s11285_s1 + $0x78] sm:$0xff]   ;;  %8692 = vmatprep.subr.bf16.mxu0 %v9320_v0  ;;  %v9323_v3 = vld [vmem:[%s11285_s1 + $0x70] sm:$0xff]   ;;  %v9325_v5 = vld [vmem:[%s11285_s1 + $0x68] sm:$0xff]   ;;  %vm1500_vm1 = vsmask.f32 7440  ;;  %s10886_s8 = sand.u32 1, %s9526_s16  }
  0x17   : > { %8836 = vmatprep.subr.bf16.mxu1 %v9321_v1  ;;  %8693 = vmatpush3.bf16.msra.mxu0 %v9320_v0  ;;  %s208_s13 = scalar_select %p207_p10, %s9587_s19, 1  ;;  %v9326_v6 = vld [vmem:[%s11285_s1 + $0x20] sm:$0xff]   ;;  %v9328_v8 = vld [vmem:[%s11285_s1 + $0x18] sm:$0xff]   ;;  %v9330_v10 = vld [vmem:[%s11285_s1 + $0x10] sm:$0xff]  }
  0x18   : > { %8837 = vmatpush3.bf16.msra.mxu1 %v9321_v1  ;;  %8694 = vmatprep.subr.bf16.mxu0 %v9322_v2  ;;  %v9327_v7 = vld [vmem:[%s11285_s1 + $0x60] sm:$0xff]   ;;  %v9329_v9 = vld [vmem:[%s11285_s1 + $0x58] sm:$0xff]   ;;  %v9331_v14 = vld [vmem:[%s11285_s1 + $0x50] sm:$0xff]   ;;  %s7543_s10 = sshll.u32 %s10886_s8, 9  ;;  %s7377_s23 = scalar_lea.sflag [#allocation4], %s10886_s8 }
  0x19   : > { %8838 = vmatprep.subr.bf16.mxu1 %v9323_v3  ;;  %s9268_s28 = smul.u32 660, %s208_s13  ;;  %v9332_v27 = vld [vmem:[%s11285_s1 + $0x8] sm:$0xff]   ;;  %vm9680_vm2 = vmor %vm1499_vm0, %vm1500_vm1  ;;  %v9334_v39 = vld [vmem:[%s11285_s1] sm:$0xff]   ;;  %s10900_s11 = scalar_lea.vmem [#allocation3], %s7543_s10 }
  0x1a   : > { %v9333_v31 = vld [vmem:[%s11285_s1 + $0x48] sm:$0xff]   ;;  %v9335_v50 = vld [vmem:[%s11285_s1 + $0x40] sm:$0xff]   ;;  %v9338_v1 = vld [vmem:[%s11285_s1 + $0xb8] sm:$0xff]   ;;  %s7398_s12 = sshll.u32 %s10900_s11, 4  ;;  %s11172_s12 = int_to_ptr.vmem [resolvable:$true] %s7398_s12 }
  0x1b   : > { %8695 = vmatpush3.bf16.msra.mxu0 %v9322_v2  ;;  %s9651_s9 = scalar_lea.vmem %s11284_s0, %s9268_s28  ;;  %s9418_s27 = scalar_lea.vmem %s11172_s12, 8192 }
  0x1c   : > { %8839 = vmatpush3.bf16.msra.mxu1 %v9323_v3  ;;  %8696 = vmatprep.subr.bf16.mxu0 %v9324_v4  ;;  %v213_v11 = vld [vmem:[%s9651_s9] sm:$0xf]  ;;  %v214_v12 = vld [vmem:[%s9651_s9 + $0x4] sm:$0xf]  ;;  %v9659_v13 = vld [vmem:[%s9651_s9 + $0x8] sm:$0xf]  ;;  %p9419_p11 = scmp.ne.s32.totalorder %s11172_s12, %s9418_s27 }
  0x1d   : > { %8840 = vmatprep.subr.bf16.mxu1 %v9325_v5  ;;  %v7545_v15 = vcombine.low %v213_v11, %v214_v12  ;;  %v1503_v16 = vshrl.u32 %v213_v11, 16  ;;  %v1506_v17 = vshll.u32 %v213_v11, 16  ;;  %v1512_v18 = vshll.u32 %v214_v12, 16  ;;  %v9665_v19 = vld [vmem:[%s9651_s9 + $0xc] sm:$0xf]  ;;  %s9536_s28 = smov [#allocation3]  }
  0x1e   : > { %v1516_v20 = vshrl.u32 %v214_v12, 16  ;;  %v1522_v21 = vshll.u32 %v9659_v13, 16  ;;  %v1526_v25 = vshrl.u32 %v9659_v13, 16  ;;  %v217_v26 = vld [vmem:[%s9651_s9 + $0x10] sm:$0x1]  ;;  %v1532_v30 = vshll.u32 %v9665_v19, 16  ;;  %p9420_p12 = pnand %p9419_p11, %p9606_p5 }
  0x1f   : > { %8697 = vmatpush3.bf16.msra.mxu0 %v9324_v4  ;;  %8708 = vmatprep.mubr.bf16.mxu0 %v7545_v15  ;;  %v1505_v22 = vrot.slane %v1503_v16, 4  ;;  %v1508_v23 = vrot.slane %v1506_v17, 5  ;;  %v1514_v24 = vrot.slane %v1512_v18, 5  ;;  %v1536_v34 = vshrl.u32 %v9665_v19, 16  ;;  %v218_v44 = vld [vmem:[%s9651_s9 + $0x14] sm:$0xf] }
  0x20   : > { %8841 = vmatpush3.bf16.msra.mxu1 %v9325_v5  ;;  %8698 = vmatprep.subr.bf16.mxu0 %v9326_v6  ;;  %v1518_v28 = vrot.slane %v1516_v20, 4  ;;  %v1524_v29 = vrot.slane %v1522_v21, 5  ;;  %v1528_v33 = vrot.slane %v1526_v25, 4  ;;  %v1542_v35 = vshll.u32 %v217_v26, 16  ;;  %v219_v47 = vld [vmem:[%s9651_s9 + $0x18] sm:$0xf]  ;;  %p9421_p13 = pneg %p9420_p12 }
  0x21   : > { %8842 = vmatprep.subr.bf16.mxu1 %v9327_v7  ;;  %v1509_v32 = vor.u32 %v1508_v23, %v1505_v22  ;;  %v1534_v38 = vrot.slane %v1532_v30, 5  ;;  %v7546_v42 = vcombine.low %v9659_v13, %v9665_v19  ;;  %v1538_v43 = vrot.slane %v1536_v34, 4  ;;  %v220_v55 = vld [vmem:[%s9651_s9 + $0x1c] sm:$0xf]  ;;  %v221_v60 = vld [vmem:[%s9651_s9 + $0x20] sm:$0xf] }
  0x22   : > { %v1519_v37 = vor.u32 %v1518_v28, %v1514_v24  ;;  %v1529_v41 = vor.u32 %v1528_v33, %v1524_v29  ;;  %v1544_v46 = vrot.slane %v1542_v35, 5  ;;  %v1547_v48 = vshrl.u32 %v218_v44, 16  ;;  %v223_v12 = vld [vmem:[%s9651_s9 + $0x28] sm:$0xf]  ;;  %v224_v23 = vld [vmem:[%s9651_s9 + $0x2c] sm:$0xf] }
  0x23   : > { %8699 = vmatpush3.bf16.msra.mxu0 %v9326_v6  ;;  %v1510_v40 = vrot.slane %v1509_v32, 4  ;;  %v1550_v49 = vshll.u32 %v218_v44, 16  ;;  %v1539_v53 = vor.u32 %v1538_v43, %v1534_v38  ;;  %v9696_v54 = vcombine.low %v218_v44, %v219_v47  ;;  %v222_v6 = vld [vmem:[%s9651_s9 + $0x24] sm:$0x1]  ;;  %v225_v28 = vld [vmem:[%s9651_s9 + $0x30] sm:$0xf] }
  0x24   : > { %8843 = vmatpush3.bf16.msra.mxu1 %v9327_v7  ;;  %8700 = vmatprep.subr.bf16.mxu0 %v9328_v8  ;;  %v1520_v45 = vrot.slane %v1519_v37, 4  ;;  %v1530_v52 = vrot.slane %v1529_v41, 4  ;;  %v1549_v57 = vrot.slane %v1547_v48, 4  ;;  %v1556_v59 = vshll.u32 %v219_v47, 16  ;;  %v9348_v33 = vld [vmem:[%s11285_s1 + $0xb0] sm:$0xff]   ;;  %v9358_v48 = vld [vmem:[%s11285_s1 + $0xa8] sm:$0xff]  }
  0x25   : > { %8844 = vmatprep.subr.bf16.mxu1 %v9329_v9  ;;  %v1515_v51 = vsel %vm9680_vm2, %v1510_v40, %v1514_v24  ;;  %v1552_v58 = vrot.slane %v1550_v49, 5  ;;  %v1540_v63 = vrot.slane %v1539_v53, 4  ;;  %v1560_v0 = vshrl.u32 %v219_v47, 16  ;;  %v9349_v34 = vld [vmem:[%s11285_s1 + $0xf0] sm:$0xff]   ;;  %v227_v47 = vld [vmem:[%s9651_s9 + $0x38] sm:$0x1] }
  0x26   : > { %v1525_v56 = vsel %vm9680_vm2, %v1520_v45, %v1524_v29  ;;  %v1535_v62 = vsel %vm9680_vm2, %v1530_v52, %v1534_v38  ;;  %v1558_v2 = vrot.slane %v1556_v59, 5  ;;  %v1566_v4 = vshll.u32 %v220_v55, 16  ;;  %v226_v45 = vld [vmem:[%s9651_s9 + $0x34] sm:$0xf]  ;;  %v228_v53 = vld [vmem:[%s9651_s9 + $0x3c] sm:$0xf] }
  0x27   : > { %8701 = vmatpush3.bf16.msra.mxu0 %v9328_v8  ;;  %v7633_v61 = vcombine.low %v1515_v51, %v1525_v56  ;;  %v1553_v3 = vor.u32 %v1552_v58, %v1549_v57  ;;  %v9707_v5 = vcombine.low %v220_v55, %v221_v60  ;;  %v1545_v7 = vsel %vm9680_vm2, %v1540_v63, %v1544_v46  ;;  %v9339_v8 = vld [vmem:[%s11285_s1 + $0xf8] sm:$0xff]   ;;  %v9359_v56 = vld [vmem:[%s11285_s1 + $0xe8] sm:$0xff]   ;;  %s9422_s29 = sshll.u32 %s9536_s28, 4  ;;  %s9423_s29 = int_to_ptr.vmem [resolvable:$false] %s9422_s29 }
  0x28   : > { %8845 = vmatpush3.bf16.msra.mxu1 %v9329_v9  ;;  %8702 = vmatprep.subr.bf16.mxu0 %v9330_v10  ;;  %v1562_v9 = vrot.slane %v1560_v0, 4  ;;  %v1580_v11 = vshrl.u32 %v221_v60, 16  ;;  %v1568_v16 = vrot.slane %v1566_v4, 5  ;;  %v1570_v17 = vshrl.u32 %v220_v55, 16  ;;  %v229_v55 = vld [vmem:[%s9651_s9 + $0x40] sm:$0xf]  ;;  %p9425_p0 = scmp.lt.s32.totalorder %s11172_s12, %s9423_s29 }
  0x29   : > { %8846 = vmatprep.subr.bf16.mxu1 %v9331_v14  ;;  %8852 = vmatprep.mubr.bf16.mxu1 %v7633_v61  ;;  %v1554_v15 = vrot.slane %v1553_v3, 4  ;;  %v1586_v22 = vshll.u32 %v222_v6, 16  ;;  %v9719_v26 = vcombine.low %v223_v12, %v224_v23  ;;  %v1594_v32 = vshll.u32 %v223_v12, 16  ;;  %s9424_s30 = scalar_lea.vmem %s9423_s29, 16384 }
  0x2a   : > { %v1563_v18 = vor.u32 %v1562_v9, %v1558_v2  ;;  %v1582_v21 = vrot.slane %v1580_v11, 4  ;;  %v1572_v25 = vrot.slane %v1570_v17, 4  ;;  %v1600_v38 = vshll.u32 %v224_v23, 16  ;;  %v9368_v11 = vld [vmem:[%s11285_s1 + $0xa0] sm:$0xff]   ;;  %v231_v17 = vld [vmem:[%s9651_s9 + $0x48] sm:$0xf]  ;;  %p9426_p1 = scmp.lt.s32.totalorder %s9424_s30, %s9418_s27 }
  0x2b   : > { %8703 = vmatpush3.bf16.msra.mxu0 %v9330_v10  ;;  %v1576_v10 = vshll.u32 %v221_v60, 16  ;;  %v1559_v24 = vsel %vm9680_vm2, %v1554_v15, %v1558_v2  ;;  %v1596_v43 = vrot.slane %v1594_v32, 5  ;;  %v1610_v44 = vshll.u32 %v225_v28, 16 }
  0x2c   : > { %8847 = vmatpush3.bf16.msra.mxu1 %v9331_v14  ;;  %8704 = vmatprep.subr.bf16.mxu0 %v9332_v27  ;;  %v7634_v14 = vcombine.low %v1535_v62, %v1545_v7  ;;  %v1564_v29 = vrot.slane %v1563_v18, 4  ;;  %v1573_v35 = vor.u32 %v1572_v25, %v1568_v16  ;;  %v9743_v52 = vcombine.low %v225_v28, %v226_v45  ;;  %v9369_v18 = vld [vmem:[%s11285_s1 + $0xe0] sm:$0xff]   ;;  %p9427_p2 = por %p9426_p1, %p9425_p0 }
  0x2d   : > { %8848 = vmatprep.subr.bf16.mxu1 %v9333_v31  ;;  %v1578_v20 = vrot.slane %v1576_v10, 5  ;;  %v1612_v51 = vrot.slane %v1610_v44, 5  ;;  %v1620_v59 = vshll.u32 %v226_v45, 16  ;;  %v1624_v60 = vshrl.u32 %v226_v45, 16  ;;  %v230_v10 = vld [vmem:[%s9651_s9 + $0x44] sm:$0xf] }
  0x2e   : > { %v1569_v40 = vsel %vm9680_vm2, %v1564_v29, %v1568_v16  ;;  %v1574_v19 = vrot.slane %v1573_v35, 4  ;;  %v1614_v63 = vshrl.u32 %v225_v28, 16  ;;  %v1630_v0 = vshll.u32 %v227_v47, 16  ;;  %v232_v29 = vld [vmem:[%s9651_s9 + $0x4c] sm:$0x1]  ;;  %v9379_v35 = vld [vmem:[%s11285_s1 + $0xd8] sm:$0xff]   ;;  %p9428_p3 = pnand %p9427_p2, %p9421_p13 }
  0x2f   : > { %8705 = vmatpush3.bf16.msra.mxu0 %v9332_v27  ;;  %v1591_v27 = vshrl.u32 %v223_v12, 16  ;;  %v1583_v30 = vor.u32 %v1582_v21, %v1578_v20  ;;  %v9735_v13 = vcombine.low %v1559_v24, %v1569_v40  ;;  %v1622_v2 = vrot.slane %v1620_v59, 5 }
  0x30   : > { %8849 = vmatpush3.bf16.msra.mxu1 %v9333_v31  ;;  %8706 = vmatprep.subr.bf16.mxu0 %v9334_v39  ;;  %v1588_v31 = vrot.slane %v1586_v22, 5  ;;  %v1579_v57 = vsel %vm9680_vm2, %v1574_v19, %v1578_v20  ;;  %v1626_v3 = vrot.slane %v1624_v60, 4  ;;  %v9755_v4 = vcombine.low %v228_v53, %v229_v55  ;;  %v235_v60 = vld [vmem:[%s9651_s9 + $0x58] sm:$0xf] }
  0x31   : > { %8850 = vmatprep.subr.bf16.mxu1 %v9335_v50  ;;  %v1593_v37 = vrot.slane %v1591_v27, 4  ;;  %v1584_v41 = vrot.slane %v1583_v30, 4  ;;  %v1616_v7 = vrot.slane %v1614_v63, 4  ;;  %v1635_v9 = vshrl.u32 %v228_v53, 16 }
  0x32   : > { %v1638_v15 = vshll.u32 %v228_v53, 16  ;;  %v1644_v16 = vshll.u32 %v229_v55, 16  ;;  %v1654_v28 = vshll.u32 %v230_v10, 16  ;;  %v9776_v32 = vcombine.low %v230_v10, %v231_v17 }
  0x33   : > { %8707 = vmatpush3.bf16.msra.mxu0 %v9334_v39  ;;  %v1604_v39 = vshrl.u32 %v224_v23, 16  ;;  %v1589_v49 = vsel %vm9680_vm2, %v1584_v41, %v1588_v31  ;;  %v1617_v21 = vor.u32 %v1616_v7, %v1612_v51  ;;  %v1637_v22 = vrot.slane %v1635_v9, 4  ;;  %v233_v41 = vld [vmem:[%s9651_s9 + $0x50] sm:$0xf]  ;;  %v237_v9 = vld [vmem:[%s9651_s9 + $0x60] sm:$0x1] }
  0x34   : > { %8851 = vmatpush3.bf16.msra.mxu1 %v9335_v50  ;;  %8980 = vmatprep.subr.bf16.mxu0 %v9338_v1  ;;  %v1597_v50 = vor.u32 %v1596_v43, %v1593_v37  ;;  %v9753_v61 = vcombine.low %v1579_v57, %v1589_v49  ;;  %v1648_v23 = vshrl.u32 %v229_v55, 16  ;;  %v1640_v25 = vrot.slane %v1638_v15, 5  ;;  %v234_v49 = vld [vmem:[%s9651_s9 + $0x54] sm:$0xf]  ;;  %v238_v15 = vld [vmem:[%s9651_s9 + $0x64] sm:$0xf] }
  0x35   : > { %9124 = vmatprep.subr.bf16.mxu1 %v9339_v8  ;;  %v1606_v46 = vrot.slane %v1604_v39, 4  ;;  %v1646_v27 = vrot.slane %v1644_v16, 5  ;;  %v1618_v30 = vrot.slane %v1617_v21, 4  ;;  %v1656_v39 = vrot.slane %v1654_v28, 5 }
  0x36   : > { %8709 = vmatmul.mubr.bf16.vlgmr.msra.gmra.mxu0 %v7546_v42  ;;  %v1602_v42 = vrot.slane %v1600_v38, 5  ;;  %v1598_v62 = vrot.slane %v1597_v50, 4  ;;  %v1650_v31 = vrot.slane %v1648_v23, 4  ;;  %v1641_v38 = vor.u32 %v1640_v25, %v1637_v22  ;;  %v239_v22 = vld [vmem:[%s9651_s9 + $0x68] sm:$0xf] }
  0x37   : > { %8853 = vmatmul.mubr.bf16.vlgmr.msra.gmra.mxu1 %v7634_v14  ;;  %8981 = vmatpush3.bf16.msra.mxu0 %v9338_v1  ;;  %v1627_v14 = vor.u32 %v1626_v3, %v1622_v2  ;;  %v1668_v40 = vshrl.u32 %v231_v17, 16  ;;  %v1623_v43 = vsel %vm9680_vm2, %v1618_v30, %v1622_v2  ;;  %v1658_v19 = vshrl.u32 %v230_v10, 16  ;;  %v236_v2 = vld [vmem:[%s9651_s9 + $0x5c] sm:$0xf] }
  0x38   : > { %9125 = vmatpush3.bf16.msra.mxu1 %v9339_v8  ;;  %8712 = vmatprep.mubr.bf16.mxu0 %v9696_v54  ;;  %v1607_v58 = vor.u32 %v1606_v46, %v1602_v42  ;;  %v1603_v6 = vsel %vm9680_vm2, %v1598_v62, %v1602_v42  ;;  %v1632_v8 = vrot.slane %v1630_v0, 5  ;;  %v1651_v44 = vor.u32 %v1650_v31, %v1646_v27 }
  0x39   : > { %8982 = vmatprep.subr.bf16.mxu0 %v9348_v33  ;;  %9126 = vmatprep.subr.bf16.mxu1 %v9349_v34  ;;  %v1628_v24 = vrot.slane %v1627_v14, 4  ;;  %v1642_v46 = vrot.slane %v1641_v38, 4  ;;  %v1670_v47 = vrot.slane %v1668_v40, 4  ;;  %v9792_v53 = vcombine.low %v233_v41, %v234_v49 }
  0x3a   : > { %8856 = vmatprep.mubr.bf16.mxu1 %v9735_v13  ;;  %v1608_v1 = vrot.slane %v1607_v58, 4  ;;  %v1652_v50 = vrot.slane %v1651_v44, 4  ;;  %v1679_v55 = vshrl.u32 %v233_v41, 16  ;;  %v1682_v59 = vshll.u32 %v233_v41, 16 }
  0x3b   : > { %8983 = vmatpush3.bf16.msra.mxu0 %v9348_v33  ;;  %v1664_v33 = vshll.u32 %v231_v17, 16  ;;  %v1633_v37 = vsel %vm9680_vm2, %v1628_v24, %v1632_v8  ;;  %v1692_v8 = vshrl.u32 %v234_v49, 16  ;;  %v9806_v14 = vcombine.low %v235_v60, %v236_v2 }
  0x3c   : > { %9127 = vmatpush3.bf16.msra.mxu1 %v9349_v34  ;;  %8984 = vmatprep.subr.bf16.mxu0 %v9358_v48  ;;  %v1613_v12 = vsel %vm9680_vm2, %v1608_v1, %v1612_v51  ;;  %v9378_v34 = vld [vmem:[%s11285_s1 + $0x98] sm:$0xff]   ;;  %v9789_v42 = vcombine.low %v1623_v43, %v1633_v37  ;;  %v1660_v51 = vrot.slane %v1658_v19, 4  ;;  %v1657_v62 = vsel %vm9680_vm2, %v1652_v50, %v1656_v39 }
  0x3d   : > { %9128 = vmatprep.subr.bf16.mxu1 %v9359_v56  ;;  %v9772_v20 = vcombine.low %v1603_v6, %v1613_v12  ;;  %v1666_v45 = vrot.slane %v1664_v33, 5  ;;  %v1681_v0 = vrot.slane %v1679_v55, 4  ;;  %v1688_v1 = vshll.u32 %v234_v49, 16 }
  0x3e   : > { %8713 = vmatmul.mubr.bf16.gmra.mxu0 %v9707_v5  ;;  %v1661_v63 = vor.u32 %v1660_v51, %v1656_v39  ;;  %v1684_v7 = vrot.slane %v1682_v59, 5  ;;  %v1698_v12 = vshll.u32 %v235_v60, 16  ;;  %v1694_v17 = vrot.slane %v1692_v8, 4  ;;  %v241_v51 = vld [vmem:[%s9651_s9 + $0x70] sm:$0xf] }
  0x3f   : > { %8857 = vmatmul.mubr.bf16.gmra.mxu1 %v9753_v61  ;;  %8716 = vmatprep.mubr.bf16.mxu0 %v9719_v26  ;;  %v1671_v57 = vor.u32 %v1670_v47, %v1666_v45  ;;  %v1708_v21 = vshll.u32 %v236_v2, 16  ;;  %v1712_v25 = vshrl.u32 %v236_v2, 16  ;;  %v9817_v37 = vcombine.low %v238_v15, %v239_v22  ;;  %v243_v8 = vld [vmem:[%s9651_s9 + $0x78] sm:$0xf] }
  0x40   : > { %8985 = vmatpush3.bf16.msra.mxu0 %v9358_v48  ;;  %9129 = vmatpush3.bf16.msra.mxu1 %v9359_v56  ;;  %v1674_v48 = vshll.u32 %v232_v29, 16  ;;  %v1647_v56 = vsel %vm9680_vm2, %v1642_v46, %v1646_v27  ;;  %v1662_v10 = vrot.slane %v1661_v63, 4  ;;  %v1700_v24 = vrot.slane %v1698_v12, 5  ;;  %v240_v46 = vld [vmem:[%s9651_s9 + $0x6c] sm:$0xf] }
  0x41   : > { %8860 = vmatprep.mubr.bf16.mxu1 %v9772_v20  ;;  %8986 = vmatprep.subr.bf16.mxu0 %v9368_v11  ;;  %v9803_v3 = vcombine.low %v1647_v56, %v1657_v62  ;;  %v1672_v6 = vrot.slane %v1671_v57, 4  ;;  %v1702_v27 = vshrl.u32 %v235_v60, 16  ;;  %v1710_v31 = vrot.slane %v1708_v21, 5  ;;  %v244_v21 = vld [vmem:[%s9651_s9 + $0x7c] sm:$0xf] }
  0x42   : > { %9130 = vmatprep.subr.bf16.mxu1 %v9369_v18  ;;  %v1676_v58 = vrot.slane %v1674_v48, 5  ;;  %v1667_v23 = vsel %vm9680_vm2, %v1662_v10, %v1666_v45  ;;  %v1714_v33 = vrot.slane %v1712_v25, 4  ;;  %v1723_v40 = vshrl.u32 %v238_v15, 16 }
  0x43   : > { %v1726_v41 = vshll.u32 %v238_v15, 16  ;;  %v1732_v19 = vshll.u32 %v239_v22, 16  ;;  %v1736_v50 = vshrl.u32 %v239_v22, 16  ;;  %v1742_v62 = vshll.u32 %v240_v46, 16 }
  0x44   : > { %8987 = vmatpush3.bf16.msra.mxu0 %v9368_v11  ;;  %9131 = vmatpush3.bf16.msra.mxu1 %v9369_v18  ;;  %v1690_v11 = vrot.slane %v1688_v1, 5  ;;  %v1677_v16 = vsel %vm9680_vm2, %v1672_v6, %v1676_v58  ;;  %v1685_v18 = vor.u32 %v1684_v7, %v1681_v0  ;;  %v1715_v44 = vor.u32 %v1714_v33, %v1710_v31  ;;  %v242_v0 = vld [vmem:[%s9651_s9 + $0x74] sm:$0x1]  ;;  %v245_v33 = vld [vmem:[%s9651_s9 + $0x80] sm:$0xf] }
  0x45   : > { %8988 = vmatprep.subr.bf16.mxu0 %v9378_v34  ;;  %9132 = vmatprep.subr.bf16.mxu1 %v9379_v35  ;;  %v9815_v28 = vcombine.low %v1667_v23, %v1677_v16  ;;  %v1725_v48 = vrot.slane %v1723_v40, 4  ;;  %v1728_v49 = vrot.slane %v1726_v41, 5  ;;  %v1734_v58 = vrot.slane %v1732_v19, 5  ;;  %v246_v40 = vld [vmem:[%s9651_s9 + $0x84] sm:$0xf] }
  0x46   : > { %8717 = vmatmul.mubr.bf16.gmra.mxu0 %v9743_v52  ;;  %v1686_v29 = vrot.slane %v1685_v18, 4  ;;  %v1695_v30 = vor.u32 %v1694_v17, %v1690_v11  ;;  %v1716_v57 = vrot.slane %v1715_v44, 4  ;;  %v1738_v59 = vrot.slane %v1736_v50, 4  ;;  %v247_v19 = vld [vmem:[%s9651_s9 + $0x88] sm:$0x1] }
  0x47   : > { %8861 = vmatmul.mubr.bf16.gmra.mxu1 %v9789_v42  ;;  %8720 = vmatprep.mubr.bf16.mxu0 %v9755_v4  ;;  %v1729_v60 = vor.u32 %v1728_v49, %v1725_v48  ;;  %v9830_v63 = vcombine.low %v240_v46, %v241_v51  ;;  %v1752_v6 = vshll.u32 %v241_v51, 16  ;;  %v1756_v7 = vshrl.u32 %v241_v51, 16  ;;  %v248_v50 = vld [vmem:[%s9651_s9 + $0x8c] sm:$0xf] }
  0x48   : > { %8989 = vmatpush3.bf16.msra.mxu0 %v9378_v34  ;;  %9133 = vmatpush3.bf16.msra.mxu1 %v9379_v35  ;;  %v1704_v34 = vrot.slane %v1702_v27, 4  ;;  %v1718_v35 = vshll.u32 %v237_v9, 16  ;;  %v1691_v38 = vsel %vm9680_vm2, %v1686_v29, %v1690_v11  ;;  %v1696_v39 = vrot.slane %v1695_v30, 4 }
  0x49   : > { %8864 = vmatprep.mubr.bf16.mxu1 %v9803_v3  ;;  %v1730_v10 = vrot.slane %v1729_v60, 4  ;;  %v1739_v11 = vor.u32 %v1738_v59, %v1734_v58  ;;  %v1744_v12 = vrot.slane %v1742_v62, 5  ;;  %v1754_v15 = vrot.slane %v1752_v6, 5 }
  0x4a   : > { %v1705_v43 = vor.u32 %v1704_v34, %v1700_v24  ;;  %v1720_v45 = vrot.slane %v1718_v35, 5  ;;  %v1701_v47 = vsel %vm9680_vm2, %v1696_v39, %v1700_v24  ;;  %v1758_v16 = vrot.slane %v1756_v7, 4 }
  0x4b   : > { %v9828_v55 = vcombine.low %v1691_v38, %v1701_v47  ;;  %v1746_v17 = vshrl.u32 %v240_v46, 16  ;;  %v1762_v18 = vshll.u32 %v242_v0, 16  ;;  %v1735_v22 = vsel %vm9680_vm2, %v1730_v10, %v1734_v58 }
  0x4c   : > { %v1706_v56 = vrot.slane %v1705_v43, 4  ;;  %v1721_v2 = vsel %vm9680_vm2, %v1716_v57, %v1720_v45  ;;  %v1740_v23 = vrot.slane %v1739_v11, 4  ;;  %v9845_v24 = vcombine.low %v243_v8, %v244_v21 }
  0x4d   : > { %v1767_v25 = vshrl.u32 %v243_v8, 16  ;;  %v1748_v27 = vrot.slane %v1746_v17, 4  ;;  %v1759_v29 = vor.u32 %v1758_v16, %v1754_v15  ;;  %v1764_v30 = vrot.slane %v1762_v18, 5  ;;  %v249_v16 = vld [vmem:[%s9651_s9 + $0x90] sm:$0xf] }
  0x4e   : > { %8721 = vmatmul.mubr.bf16.gmra.mxu0 %v9776_v32  ;;  %v1711_v1 = vsel %vm9680_vm2, %v1706_v56, %v1710_v31  ;;  %v1770_v31 = vshll.u32 %v243_v8, 16  ;;  %v1745_v34 = vsel %vm9680_vm2, %v1740_v23, %v1744_v12  ;;  %v1776_v38 = vshll.u32 %v244_v21, 16 }
  0x4f   : > { %8865 = vmatmul.mubr.bf16.gmra.mxu1 %v9815_v28  ;;  %8724 = vmatprep.mubr.bf16.mxu0 %v9792_v53  ;;  %v9839_v9 = vcombine.low %v1711_v1, %v1721_v2  ;;  %v1769_v35 = vrot.slane %v1767_v25, 4  ;;  %v1780_v39 = vshrl.u32 %v244_v21, 16  ;;  %v9853_v41 = vcombine.low %v1735_v22, %v1745_v34  ;;  %v250_v22 = vld [vmem:[%s9651_s9 + $0x94] sm:$0xf] }
  0x50   : > { %8868 = vmatprep.mubr.bf16.mxu1 %v9828_v55  ;;  %v1749_v43 = vor.u32 %v1748_v27, %v1744_v12  ;;  %v1760_v44 = vrot.slane %v1759_v29, 4  ;;  %v1772_v45 = vrot.slane %v1770_v31, 5  ;;  %v1778_v46 = vrot.slane %v1776_v38, 5  ;;  %v9388_v31 = vld [vmem:[%s11285_s1 + $0x90] sm:$0xff]  }
  0x51   : > { %v1782_v47 = vrot.slane %v1780_v39, 4  ;;  %v1786_v48 = vshll.u32 %v245_v33, 16  ;;  %v9856_v49 = vcombine.low %v245_v33, %v246_v40  ;;  %v1796_v58 = vshll.u32 %v246_v40, 16  ;;  %v9389_v39 = vld [vmem:[%s11285_s1 + $0xd0] sm:$0xff]   ;;  %8990 = vmatprep.subr.bf16.mxu0 %v9388_v31 }
  0x52   : > { %v1750_v51 = vrot.slane %v1749_v43, 4  ;;  %v1765_v56 = vsel %vm9680_vm2, %v1760_v44, %v1764_v30  ;;  %v1773_v57 = vor.u32 %v1772_v45, %v1769_v35  ;;  %v1800_v62 = vshrl.u32 %v246_v40, 16  ;;  %v251_v30 = vld [vmem:[%s9651_s9 + $0x98] sm:$0xf]  ;;  %8991 = vmatpush3.bf16.msra.mxu0 %v9388_v31  ;;  %9134 = vmatprep.subr.bf16.mxu1 %v9389_v39 }
  0x53   : > { %v1783_v59 = vor.u32 %v1782_v47, %v1778_v46  ;;  %v1788_v60 = vrot.slane %v1786_v48, 5  ;;  %v1790_v0 = vshrl.u32 %v245_v33, 16  ;;  %v1798_v6 = vrot.slane %v1796_v58, 5  ;;  %9135 = vmatpush3.bf16.msra.mxu1 %v9389_v39 }
  0x54   : > { %v1755_v1 = vsel %vm9680_vm2, %v1750_v51, %v1754_v15  ;;  %v1774_v2 = vrot.slane %v1773_v57, 4  ;;  %v1806_v7 = vshll.u32 %v247_v19, 16  ;;  %v1802_v11 = vrot.slane %v1800_v62, 4 }
  0x55   : > { %v9865_v8 = vcombine.low %v1755_v1, %v1765_v56  ;;  %v1784_v10 = vrot.slane %v1783_v59, 4  ;;  %v1792_v12 = vrot.slane %v1790_v0, 4  ;;  %v9871_v21 = vcombine.low %v248_v50, %v249_v16  ;;  %v253_v59 = vld [vmem:[%s9651_s9 + $0xa0] sm:$0xf] }
  0x56   : > { %8725 = vmatmul.mubr.bf16.gmra.mxu0 %v9806_v14  ;;  %v1779_v17 = vsel %vm9680_vm2, %v1774_v2, %v1778_v46  ;;  %v1808_v18 = vrot.slane %v1806_v7, 5  ;;  %v1811_v15 = vshrl.u32 %v248_v50, 16  ;;  %v1803_v27 = vor.u32 %v1802_v11, %v1798_v6  ;;  %v254_v2 = vld [vmem:[%s9651_s9 + $0xa4] sm:$0xf] }
  0x57   : > { %8869 = vmatmul.mubr.bf16.gmra.mxu1 %v9839_v9  ;;  %8728 = vmatprep.mubr.bf16.mxu0 %v9817_v37  ;;  %v1789_v23 = vsel %vm9680_vm2, %v1784_v10, %v1788_v60  ;;  %v1793_v25 = vor.u32 %v1792_v12, %v1788_v60  ;;  %v1814_v29 = vshll.u32 %v248_v50, 16  ;;  %v1820_v35 = vshll.u32 %v249_v16, 16  ;;  %v252_v50 = vld [vmem:[%s9651_s9 + $0x9c] sm:$0x1] }
  0x58   : > { %8872 = vmatprep.mubr.bf16.mxu1 %v9853_v41  ;;  %v9881_v33 = vcombine.low %v1779_v17, %v1789_v23  ;;  %v1813_v34 = vrot.slane %v1811_v15, 4  ;;  %v1824_v38 = vshrl.u32 %v249_v16, 16  ;;  %v1804_v43 = vrot.slane %v1803_v27, 4 }
  0x59   : > { %v1794_v40 = vrot.slane %v1793_v25, 4  ;;  %v1816_v44 = vrot.slane %v1814_v29, 5  ;;  %v1830_v45 = vshll.u32 %v250_v22, 16  ;;  %v1822_v19 = vrot.slane %v1820_v35, 5  ;;  %v256_v35 = vld [vmem:[%s9651_s9 + $0xac] sm:$0xf] }
  0x5a   : > { %v1826_v46 = vrot.slane %v1824_v38, 4  ;;  %v9887_v47 = vcombine.low %v250_v22, %v251_v30  ;;  %v1840_v48 = vshll.u32 %v251_v30, 16  ;;  %v1809_v56 = vsel %vm9680_vm2, %v1804_v43, %v1808_v18 }
  0x5b   : > { %v1799_v51 = vsel %vm9680_vm2, %v1794_v40, %v1798_v6  ;;  %v1817_v57 = vor.u32 %v1816_v44, %v1813_v34  ;;  %v1832_v58 = vrot.slane %v1830_v45, 5  ;;  %v1844_v1 = vshrl.u32 %v251_v30, 16  ;;  %v257_v44 = vld [vmem:[%s9651_s9 + $0xb0] sm:$0x1] }
  0x5c   : > { %v9895_v60 = vcombine.low %v1799_v51, %v1809_v56  ;;  %v1827_v62 = vor.u32 %v1826_v46, %v1822_v19  ;;  %v1842_v0 = vrot.slane %v1840_v48, 5  ;;  %v1834_v10 = vshrl.u32 %v250_v22, 16  ;;  %v255_v22 = vld [vmem:[%s9651_s9 + $0xa8] sm:$0xf] }
  0x5d   : > { %v1818_v7 = vrot.slane %v1817_v57, 4  ;;  %v1850_v6 = vshll.u32 %v252_v50, 16  ;;  %v9899_v11 = vcombine.low %v253_v59, %v254_v2  ;;  %v1846_v16 = vrot.slane %v1844_v1, 4  ;;  %v258_v50 = vld [vmem:[%s9651_s9 + $0xb4] sm:$0xf] }
  0x5e   : > { %8729 = vmatmul.mubr.bf16.gmra.mxu0 %v9830_v63  ;;  %v1828_v12 = vrot.slane %v1827_v62, 4  ;;  %v1855_v17 = vshrl.u32 %v253_v59, 16  ;;  %v1858_v18 = vshll.u32 %v253_v59, 16  ;;  %v1836_v23 = vrot.slane %v1834_v10, 4 }
  0x5f   : > { %8732 = vmatprep.mubr.bf16.mxu0 %v9845_v24  ;;  %8873 = vmatmul.mubr.bf16.gmra.mxu1 %v9865_v8  ;;  %v1823_v15 = vsel %vm9680_vm2, %v1818_v7, %v1822_v19  ;;  %v1852_v25 = vrot.slane %v1850_v6, 5  ;;  %v1864_v27 = vshll.u32 %v254_v2, 16  ;;  %v1847_v30 = vor.u32 %v1846_v16, %v1842_v0  ;;  %v259_v16 = vld [vmem:[%s9651_s9 + $0xb8] sm:$0xf] }
  0x60   : > { %8876 = vmatprep.mubr.bf16.mxu1 %v9881_v33  ;;  %v1833_v29 = vsel %vm9680_vm2, %v1828_v12, %v1832_v58  ;;  %v1857_v31 = vrot.slane %v1855_v17, 4  ;;  %v1860_v34 = vrot.slane %v1858_v18, 5  ;;  %v1837_v39 = vor.u32 %v1836_v23, %v1832_v58 }
  0x61   : > { %v9909_v38 = vcombine.low %v1823_v15, %v1833_v29  ;;  %v1866_v40 = vrot.slane %v1864_v27, 5  ;;  %v1868_v43 = vshrl.u32 %v254_v2, 16  ;;  %v1848_v45 = vrot.slane %v1847_v30, 4 }
  0x62   : > { %v1861_v19 = vor.u32 %v1860_v34, %v1857_v31  ;;  %v1874_v46 = vshll.u32 %v255_v22, 16  ;;  %v9912_v48 = vcombine.low %v255_v22, %v256_v35  ;;  %v1838_v51 = vrot.slane %v1837_v39, 4 }
  0x63   : > { %v1870_v56 = vrot.slane %v1868_v43, 4  ;;  %v1884_v57 = vshll.u32 %v256_v35, 16  ;;  %v1888_v59 = vshrl.u32 %v256_v35, 16  ;;  %v1853_v62 = vsel %vm9680_vm2, %v1848_v45, %v1852_v25  ;;  %v260_v35 = vld [vmem:[%s9651_s9 + $0xbc] sm:$0xf] }
  0x64   : > { %11385 = vst [vmem:[#allocation10_spill] sm:$0xff] %v9912_v48  ;;  %v1862_v58 = vrot.slane %v1861_v19, 4  ;;  %v1876_v1 = vrot.slane %v1874_v46, 5  ;;  %v1878_v2 = vshrl.u32 %v255_v22, 16  ;;  %v1843_v7 = vsel %vm9680_vm2, %v1838_v51, %v1842_v0 }
  0x65   : > { %v1871_v10 = vor.u32 %v1870_v56, %v1866_v40  ;;  %v1886_v6 = vrot.slane %v1884_v57, 5  ;;  %v1890_v12 = vrot.slane %v1888_v59, 4  ;;  %v9922_v17 = vcombine.low %v1843_v7, %v1853_v62 }
  0x66   : > { %8733 = vmatmul.mubr.bf16.gmra.mxu0 %v9856_v49  ;;  %v1867_v18 = vsel %vm9680_vm2, %v1862_v58, %v1866_v40  ;;  %v1880_v15 = vrot.slane %v1878_v2, 4  ;;  %v1894_v23 = vshll.u32 %v257_v44, 16  ;;  %v9927_v22 = vcombine.low %v258_v50, %v259_v16  ;;  %v261_v44 = vld [vmem:[%s9651_s9 + $0xc0] sm:$0xf]  ;;  %v262_v58 = vld [vmem:[%s9651_s9 + $0xc4] sm:$0x1] }
  0x67   : > { %8736 = vmatprep.mubr.bf16.mxu0 %v9871_v21  ;;  %8877 = vmatmul.mubr.bf16.gmra.mxu1 %v9895_v60  ;;  %11386 = vst [vmem:[#allocation11_spill] sm:$0xff] %v9922_v17  ;;  %v1872_v25 = vrot.slane %v1871_v10, 4  ;;  %v1891_v27 = vor.u32 %v1890_v12, %v1886_v6  ;;  %v1899_v0 = vshrl.u32 %v258_v50, 16  ;;  %v1902_v31 = vshll.u32 %v258_v50, 16  ;;  %v263_v12 = vld [vmem:[%s9651_s9 + $0xc8] sm:$0xf] }
  0x68   : > { %8880 = vmatprep.mubr.bf16.mxu1 %v9909_v38  ;;  %11387 = vst [vmem:[#allocation12_spill] sm:$0xff] %v9927_v22  ;;  %v1881_v29 = vor.u32 %v1880_v15, %v1876_v1  ;;  %v1896_v30 = vrot.slane %v1894_v23, 5  ;;  %v1908_v34 = vshll.u32 %v259_v16, 16  ;;  %v1912_v45 = vshrl.u32 %v259_v16, 16 }
  0x69   : > { %v1877_v39 = vsel %vm9680_vm2, %v1872_v25, %v1876_v1  ;;  %v1892_v40 = vrot.slane %v1891_v27, 4  ;;  %v1901_v43 = vrot.slane %v1899_v0, 4  ;;  %v1904_v51 = vrot.slane %v1902_v31, 5 }
  0x6a   : > { %v9934_v19 = vcombine.low %v1867_v18, %v1877_v39  ;;  %v1882_v46 = vrot.slane %v1881_v29, 4  ;;  %v1910_v56 = vrot.slane %v1908_v34, 5  ;;  %v1914_v50 = vrot.slane %v1912_v45, 4 }
  0x6b   : > { %v1897_v57 = vsel %vm9680_vm2, %v1892_v40, %v1896_v30  ;;  %v1918_v59 = vshll.u32 %v260_v35, 16  ;;  %v9938_v62 = vcombine.low %v260_v35, %v261_v44  ;;  %v1905_v2 = vor.u32 %v1904_v51, %v1901_v43 }
  0x6c   : > { %11388 = vst [vmem:[#allocation13_spill] sm:$0xff] %v9934_v19  ;;  %v1887_v1 = vsel %vm9680_vm2, %v1882_v46, %v1886_v6  ;;  %v1928_v7 = vshll.u32 %v261_v44, 16  ;;  %v1932_v10 = vshrl.u32 %v261_v44, 16  ;;  %v1915_v18 = vor.u32 %v1914_v50, %v1910_v56  ;;  %v264_v6 = vld [vmem:[%s9651_s9 + $0xcc] sm:$0xf] }
  0x6d   : > { %11389 = vst [vmem:[#allocation14_spill] sm:$0xff] %v9938_v62  ;;  %v9946_v16 = vcombine.low %v1887_v1, %v1897_v57  ;;  %v1920_v15 = vrot.slane %v1918_v59, 5  ;;  %v1922_v23 = vshrl.u32 %v260_v35, 16  ;;  %v1906_v25 = vrot.slane %v1905_v2, 4  ;;  %v265_v44 = vld [vmem:[%s9651_s9 + $0xd0] sm:$0xf] }
  0x6e   : > { %8737 = vmatmul.mubr.bf16.gmra.mxu0 %v9887_v47  ;;  %v1930_v27 = vrot.slane %v1928_v7, 5  ;;  %v1934_v0 = vrot.slane %v1932_v10, 4  ;;  %v1938_v29 = vshll.u32 %v262_v58, 16  ;;  %v1916_v30 = vrot.slane %v1915_v18, 4  ;;  %v266_v59 = vld [vmem:[%s9651_s9 + $0xd4] sm:$0xf] }
  0x6f   : > { %8740 = vmatprep.mubr.bf16.mxu0 %v9899_v11  ;;  %8881 = vmatmul.mubr.bf16.gmra.mxu1 %v9922_v17  ;;  %11390 = vst [vmem:[#allocation15_spill] sm:$0xff] %v9946_v16  ;;  %v1924_v31 = vrot.slane %v1922_v23, 4  ;;  %v9950_v34 = vcombine.low %v263_v12, %v264_v6  ;;  %v1943_v39 = vshrl.u32 %v263_v12, 16  ;;  %v1911_v35 = vsel %vm9680_vm2, %v1906_v25, %v1910_v56  ;;  %v267_v10 = vld [vmem:[%s9651_s9 + $0xd8] sm:$0x1] }
  0x70   : > { %8884 = vmatprep.mubr.bf16.mxu1 %v9934_v19  ;;  %v1935_v40 = vor.u32 %v1934_v0, %v1930_v27  ;;  %v1940_v43 = vrot.slane %v1938_v29, 5  ;;  %v1946_v45 = vshll.u32 %v263_v12, 16  ;;  %v1921_v46 = vsel %vm9680_vm2, %v1916_v30, %v1920_v15 }
  0x71   : > { %11391 = vst [vmem:[#allocation16_spill] sm:$0xff] %v9950_v34  ;;  %v1925_v51 = vor.u32 %v1924_v31, %v1920_v15  ;;  %v1945_v57 = vrot.slane %v1943_v39, 4  ;;  %v1952_v50 = vshll.u32 %v264_v6, 16  ;;  %v9959_v58 = vcombine.low %v1911_v35, %v1921_v46  ;;  %v268_v35 = vld [vmem:[%s9651_s9 + $0xdc] sm:$0xf] }
  0x72   : > { %v1936_v1 = vrot.slane %v1935_v40, 4  ;;  %v1948_v2 = vrot.slane %v1946_v45, 5  ;;  %v1956_v7 = vshrl.u32 %v264_v6, 16  ;;  %v1962_v23 = vshll.u32 %v265_v44, 16 }
  0x73   : > { %11392 = vst [vmem:[#allocation17_spill] sm:$0xff] %v9959_v58  ;;  %v1926_v18 = vrot.slane %v1925_v51, 4  ;;  %v1954_v56 = vrot.slane %v1952_v50, 5  ;;  %v9962_v25 = vcombine.low %v265_v44, %v266_v59  ;;  %v1972_v29 = vshll.u32 %v266_v59, 16 }
  0x74   : > { %v1941_v12 = vsel %vm9680_vm2, %v1936_v1, %v1940_v43  ;;  %v1958_v15 = vrot.slane %v1956_v7, 4  ;;  %v1949_v0 = vor.u32 %v1948_v2, %v1945_v57  ;;  %v1964_v30 = vrot.slane %v1962_v23, 5  ;;  %v269_v43 = vld [vmem:[%s9651_s9 + $0xe0] sm:$0xf] }
  0x75   : > { %11393 = vst [vmem:[#allocation18_spill] sm:$0xff] %v9962_v25  ;;  %v1931_v6 = vsel %vm9680_vm2, %v1926_v18, %v1930_v27  ;;  %v1976_v31 = vshrl.u32 %v266_v59, 16  ;;  %v1966_v39 = vshrl.u32 %v265_v44, 16  ;;  %v1974_v51 = vrot.slane %v1972_v29, 5  ;;  %v9398_v18 = vld [vmem:[%s11285_s1 + $0x88] sm:$0xff]  }
  0x76   : > { %8741 = vmatmul.mubr.bf16.gmra.mxu0 %v9912_v48  ;;  %v9971_v40 = vcombine.low %v1931_v6, %v1941_v12  ;;  %v1950_v45 = vrot.slane %v1949_v0, 4  ;;  %v1959_v46 = vor.u32 %v1958_v15, %v1954_v56  ;;  %v1982_v1 = vshll.u32 %v267_v10, 16  ;;  %v270_v10 = vld [vmem:[%s9651_s9 + $0xe4] sm:$0xf]  ;;  %8992 = vmatprep.subr.bf16.mxu0 %v9398_v18 }
  0x77   : > { %8744 = vmatprep.mubr.bf16.mxu0 %v9927_v22  ;;  %8885 = vmatmul.mubr.bf16.gmra.mxu1 %v9946_v16  ;;  %v1978_v57 = vrot.slane %v1976_v31, 4  ;;  %v1968_v50 = vrot.slane %v1966_v39, 4  ;;  %v9975_v2 = vcombine.low %v268_v35, %v269_v43  ;;  %v1987_v59 = vshrl.u32 %v268_v35, 16 }
  0x78   : > { %8888 = vmatprep.mubr.bf16.mxu1 %v9959_v58  ;;  %11394 = vst [vmem:[#allocation19_spill] sm:$0xff] %v9971_v40  ;;  %v1955_v27 = vsel %vm9680_vm2, %v1950_v45, %v1954_v56  ;;  %v1960_v44 = vrot.slane %v1959_v46, 4  ;;  %v1990_v7 = vshll.u32 %v268_v35, 16  ;;  %v1984_v15 = vrot.slane %v1982_v1, 5  ;;  %v271_v56 = vld [vmem:[%s9651_s9 + $0xe8] sm:$0xf]  ;;  %8993 = vmatpush3.bf16.msra.mxu0 %v9398_v18 }
  0x79   : > { %11395 = vst [vmem:[#allocation20_spill] sm:$0xff] %v9975_v2  ;;  %v1969_v23 = vor.u32 %v1968_v50, %v1964_v30  ;;  %v1979_v12 = vor.u32 %v1978_v57, %v1974_v51  ;;  %v1996_v0 = vshll.u32 %v269_v43, 16  ;;  %v1989_v6 = vrot.slane %v1987_v59, 4  ;;  %v9399_v35 = vld [vmem:[%s11285_s1 + $0xc8] sm:$0xff]  }
  0x7a   : > { %v1965_v29 = vsel %vm9680_vm2, %v1960_v44, %v1964_v30  ;;  %v1992_v31 = vrot.slane %v1990_v7, 5  ;;  %v2000_v39 = vshrl.u32 %v269_v43, 16  ;;  %v2006_v30 = vshll.u32 %v270_v10, 16  ;;  %v272_v59 = vld [vmem:[%s9651_s9 + $0xec] sm:$0x1]  ;;  %9136 = vmatprep.subr.bf16.mxu1 %v9399_v35 }
  0x7b   : > { %v9990_v45 = vcombine.low %v1955_v27, %v1965_v29  ;;  %v1970_v46 = vrot.slane %v1969_v23, 4  ;;  %v1980_v57 = vrot.slane %v1979_v12, 4  ;;  %v1998_v50 = vrot.slane %v1996_v0, 5  ;;  %v273_v23 = vld [vmem:[%s9651_s9 + $0xf0] sm:$0xf]  ;;  %9137 = vmatpush3.bf16.msra.mxu1 %v9399_v35 }
  0x7c   : > { %v2002_v1 = vrot.slane %v2000_v39, 4  ;;  %v9992_v44 = vcombine.low %v270_v10, %v271_v56  ;;  %v2016_v7 = vshll.u32 %v271_v56, 16  ;;  %v2020_v18 = vshrl.u32 %v271_v56, 16 }
  0x7d   : > { %11396 = vst [vmem:[#allocation21_spill] sm:$0xff] %v9990_v45  ;;  %v1975_v43 = vsel %vm9680_vm2, %v1970_v46, %v1974_v51  ;;  %v1985_v27 = vsel %vm9680_vm2, %v1980_v57, %v1984_v15  ;;  %v2026_v51 = vshll.u32 %v272_v59, 16  ;;  %v274_v46 = vld [vmem:[%s9651_s9 + $0xf4] sm:$0xf] }
  0x7e   : > { %8745 = vmatmul.mubr.bf16.gmra.mxu0 %v9938_v62  ;;  %11397 = vst [vmem:[#allocation22_spill] sm:$0xff] %v9992_v44  ;;  %v10002_v12 = vcombine.low %v1975_v43, %v1985_v27  ;;  %v2003_v29 = vor.u32 %v2002_v1, %v1998_v50  ;;  %v2022_v39 = vrot.slane %v2020_v18, 4  ;;  %v10009_v57 = vcombine.low %v273_v23, %v274_v46 }
  0x7f   : > { %8748 = vmatprep.mubr.bf16.mxu0 %v9950_v34  ;;  %8889 = vmatmul.mubr.bf16.gmra.mxu1 %v9971_v40  ;;  %v1993_v40 = vor.u32 %v1992_v31, %v1989_v6  ;;  %v2008_v6 = vrot.slane %v2006_v30, 5  ;;  %v2018_v31 = vrot.slane %v2016_v7, 5  ;;  %v2031_v43 = vshrl.u32 %v273_v23, 16  ;;  %v276_v7 = vld [vmem:[%s9651_s9 + $0xfc] sm:$0xf] }
  0x80   : > { %8892 = vmatprep.mubr.bf16.mxu1 %v9990_v45  ;;  %11398 = vst [vmem:[#allocation23_spill] sm:$0xff] %v10002_v12  ;;  %v2010_v45 = vshrl.u32 %v270_v10, 16  ;;  %v2004_v56 = vrot.slane %v2003_v29, 4  ;;  %11399 = vst [vmem:[#allocation24_spill] sm:$0xff] %v10009_v57  ;;  %v2028_v35 = vrot.slane %v2026_v51, 5  ;;  %v2034_v27 = vshll.u32 %v273_v23, 16 }
  0x81   : > { %v1994_v0 = vrot.slane %v1993_v40, 4  ;;  %v275_v40 = vld [vmem:[%s9651_s9 + $0xf8] sm:$0xf]  ;;  %v2023_v30 = vor.u32 %v2022_v39, %v2018_v31  ;;  %v2033_v59 = vrot.slane %v2031_v43, 4  ;;  %v2040_v18 = vshll.u32 %v274_v46, 16 }
  0x82   : > { %v2012_v1 = vrot.slane %v2010_v45, 4  ;;  %v2009_v10 = vsel %vm9680_vm2, %v2004_v56, %v2008_v6  ;;  %v2036_v29 = vrot.slane %v2034_v27, 5  ;;  %v2050_v45 = vshll.u32 %v275_v40, 16 }
  0x83   : > { %v1999_v15 = vsel %vm9680_vm2, %v1994_v0, %v1998_v50  ;;  %v2024_v0 = vrot.slane %v2023_v30, 4  ;;  %v2042_v58 = vrot.slane %v2040_v18, 5  ;;  %v10018_v39 = vcombine.low %v275_v40, %v276_v7 }
  0x84   : > { %v2013_v50 = vor.u32 %v2012_v1, %v2008_v6  ;;  %v2052_v56 = vrot.slane %v2050_v45, 5  ;;  %v2064_v43 = vshrl.u32 %v276_v7, 16  ;;  %v278_v1 = vld [vmem:[%s9651_s9 + $0x104] sm:$0xf] }
  0x85   : > { %11401 = vst [vmem:[#allocation26_spill] sm:$0xff] %v10018_v39  ;;  %v2029_v51 = vsel %vm9680_vm2, %v2024_v0, %v2028_v35 }
  0x86   : > { %8749 = vmatmul.mubr.bf16.gmra.mxu0 %v9962_v25  ;;  %v10016_v25 = vcombine.low %v1999_v15, %v2009_v10  ;;  %v2014_v23 = vrot.slane %v2013_v50, 4  ;;  %v2060_v15 = vshll.u32 %v276_v7, 16 }
  0x87   : > { %8752 = vmatprep.mubr.bf16.mxu0 %v9975_v2  ;;  %8893 = vmatmul.mubr.bf16.gmra.mxu1 %v10002_v12  ;;  %v2044_v2 = vshrl.u32 %v274_v46, 16  ;;  %v277_v12 = vld [vmem:[%s9651_s9 + $0x100] sm:$0x1]  ;;  %v2037_v46 = vor.u32 %v2036_v29, %v2033_v59  ;;  %v2066_v59 = vrot.slane %v2064_v43, 4  ;;  %v279_v29 = vld [vmem:[%s9651_s9 + $0x108] sm:$0xf] }
  0x88   : > { %11400 = vst [vmem:[#allocation25_spill] sm:$0xff] %v10016_v25  ;;  %8896 = vmatprep.mubr.bf16.mxu1 %v10016_v25  ;;  %v2019_v30 = vsel %vm9680_vm2, %v2014_v23, %v2018_v31  ;;  %v2062_v10 = vrot.slane %v2060_v15, 5  ;;  %v2070_v18 = vshll.u32 %v277_v12, 16  ;;  %v10033_v45 = vcombine.low %v278_v1, %v279_v29  ;;  %v280_v25 = vld [vmem:[%s9651_s9 + $0x10c] sm:$0xf] }
  0x89   : > { %v2046_v16 = vrot.slane %v2044_v2, 4  ;;  %v2054_v2 = vshrl.u32 %v275_v40, 16  ;;  %v2038_v27 = vrot.slane %v2037_v46, 4  ;;  %v10028_v50 = vcombine.low %v2019_v30, %v2029_v51  ;;  %v281_v46 = vld [vmem:[%s9651_s9 + $0x110] sm:$0xf] }
  0x8a   : > { %v2072_v7 = vrot.slane %v2070_v18, 5  ;;  %11403 = vst [vmem:[#allocation28_spill] sm:$0xff] %v10033_v45  ;;  %v2075_v40 = vshrl.u32 %v278_v1, 16  ;;  %v2067_v23 = vor.u32 %v2066_v59, %v2062_v10  ;;  %v2078_v51 = vshll.u32 %v278_v1, 16 }
  0x8b   : > { %v2047_v6 = vor.u32 %v2046_v16, %v2042_v58  ;;  %11402 = vst [vmem:[#allocation27_spill] sm:$0xff] %v10028_v50  ;;  %v2056_v0 = vrot.slane %v2054_v2, 4  ;;  %v2043_v16 = vsel %vm9680_vm2, %v2038_v27, %v2042_v58  ;;  %v2084_v43 = vshll.u32 %v279_v29, 16 }
  0x8c   : > { %v2088_v58 = vshrl.u32 %v279_v29, 16  ;;  %v2068_v30 = vrot.slane %v2067_v23, 4  ;;  %v2080_v27 = vrot.slane %v2078_v51, 5  ;;  %v2094_v18 = vshll.u32 %v280_v25, 16 }
  0x8d   : > { %v2048_v35 = vrot.slane %v2047_v6, 4  ;;  %v2057_v31 = vor.u32 %v2056_v0, %v2052_v56  ;;  %v2077_v6 = vrot.slane %v2075_v40, 4  ;;  %v10044_v1 = vcombine.low %v280_v25, %v281_v46  ;;  %v282_v0 = vld [vmem:[%s9651_s9 + $0x114] sm:$0x1] }
  0x8e   : > { %8753 = vmatmul.mubr.bf16.gmra.mxu0 %v9992_v44  ;;  %v2104_v59 = vshll.u32 %v281_v46, 16  ;;  %v2073_v29 = vsel %vm9680_vm2, %v2068_v30, %v2072_v7 }
  0x8f   : > { %8756 = vmatprep.mubr.bf16.mxu0 %v10009_v57  ;;  %8897 = vmatmul.mubr.bf16.gmra.mxu1 %v10028_v50  ;;  %v2053_v12 = vsel %vm9680_vm2, %v2048_v35, %v2052_v56  ;;  %v2058_v2 = vrot.slane %v2057_v31, 4  ;;  %v2086_v56 = vrot.slane %v2084_v43, 5  ;;  %v2090_v35 = vrot.slane %v2088_v58, 4  ;;  %11405 = vst [vmem:[#allocation30_spill] sm:$0xff] %v10044_v1  ;;  %v283_v31 = vld [vmem:[%s9651_s9 + $0x118] sm:$0xf] }
  0x90   : > { %v10040_v15 = vcombine.low %v2043_v16, %v2053_v12  ;;  %v2081_v40 = vor.u32 %v2080_v27, %v2077_v6  ;;  %v2096_v12 = vrot.slane %v2094_v18, 5  ;;  %v2106_v43 = vrot.slane %v2104_v59, 5 }
  0x91   : > { %v2063_v16 = vsel %vm9680_vm2, %v2058_v2, %v2062_v10  ;;  %v2091_v51 = vor.u32 %v2090_v35, %v2086_v56  ;;  %v2108_v58 = vshrl.u32 %v281_v46, 16  ;;  %v2114_v57 = vshll.u32 %v282_v0, 16  ;;  %v285_v46 = vld [vmem:[%s9651_s9 + $0x120] sm:$0xf] }
  0x92   : > { %11404 = vst [vmem:[#allocation29_spill] sm:$0xff] %v10040_v15  ;;  %8900 = vmatprep.mubr.bf16.mxu1 %v10040_v15  ;;  %v10053_v23 = vcombine.low %v2063_v16, %v2073_v29  ;;  %v284_v15 = vld [vmem:[%s9651_s9 + $0x11c] sm:$0xf]  ;;  %v2082_v50 = vrot.slane %v2081_v40, 4  ;;  %v2119_v30 = vshrl.u32 %v283_v31, 16 }
  0x93   : > { %v10056_v10 = vcombine.low %v283_v31, %v284_v15  ;;  %v2092_v2 = vrot.slane %v2091_v51, 4  ;;  %v2110_v7 = vrot.slane %v2108_v58, 4  ;;  %v2116_v18 = vrot.slane %v2114_v57, 5  ;;  %v286_v29 = vld [vmem:[%s9651_s9 + $0x124] sm:$0xf] }
  0x94   : > { %11406 = vst [vmem:[#allocation31_spill] sm:$0xff] %v10053_v23  ;;  %v2087_v6 = vsel %vm9680_vm2, %v2082_v50, %v2086_v56  ;;  %v2128_v35 = vshll.u32 %v284_v15, 16  ;;  %v2121_v0 = vrot.slane %v2119_v30, 4  ;;  %v2132_v58 = vshrl.u32 %v284_v15, 16 }
  0x95   : > { %11407 = vst [vmem:[#allocation32_spill] sm:$0xff] %v10056_v10  ;;  %v2111_v59 = vor.u32 %v2110_v7, %v2106_v43  ;;  %v2138_v50 = vshll.u32 %v285_v46, 16  ;;  %v10068_v56 = vcombine.low %v285_v46, %v286_v29  ;;  %v2148_v7 = vshll.u32 %v286_v29, 16 }
  0x96   : > { %8757 = vmatmul.mubr.bf16.gmra.mxu0 %v10018_v39  ;;  %v2098_v39 = vshrl.u32 %v280_v25, 16  ;;  %v2097_v25 = vsel %vm9680_vm2, %v2092_v2, %v2096_v12  ;;  %v2130_v51 = vrot.slane %v2128_v35, 5  ;;  %v2152_v30 = vshrl.u32 %v286_v29, 16 }
  0x97   : > { %8760 = vmatprep.mubr.bf16.mxu0 %v10033_v45  ;;  %v2122_v45 = vshll.u32 %v283_v31, 16  ;;  %8901 = vmatmul.mubr.bf16.gmra.mxu1 %v10053_v23  ;;  %v10065_v40 = vcombine.low %v2087_v6, %v2097_v25  ;;  %11409 = vst [vmem:[#allocation34_spill] sm:$0xff] %v10068_v56  ;;  %v2142_v35 = vshrl.u32 %v285_v46, 16  ;;  %v288_v25 = vld [vmem:[%s9651_s9 + $0x12c] sm:$0xf] }
  0x98   : > { %v2100_v27 = vrot.slane %v2098_v39, 4  ;;  %v2112_v39 = vrot.slane %v2111_v59, 4 }
  0x99   : > { %v2124_v16 = vrot.slane %v2122_v45, 5  ;;  %11408 = vst [vmem:[#allocation33_spill] sm:$0xff] %v10065_v40  ;;  %8904 = vmatprep.mubr.bf16.mxu1 %v10065_v40  ;;  %v2134_v45 = vrot.slane %v2132_v58, 4  ;;  %v289_v40 = vld [vmem:[%s9651_s9 + $0x130] sm:$0xf]  ;;  %v2144_v58 = vrot.slane %v2142_v35, 4 }
  0x9a   : > { %v2101_v31 = vor.u32 %v2100_v27, %v2096_v12  ;;  %v287_v12 = vld [vmem:[%s9651_s9 + $0x128] sm:$0x1]  ;;  %v2117_v15 = vsel %vm9680_vm2, %v2112_v39, %v2116_v18  ;;  %v2140_v27 = vrot.slane %v2138_v50, 5  ;;  %v10083_v46 = vcombine.low %v288_v25, %v289_v40 }
  0x9b   : > { %v2125_v57 = vor.u32 %v2124_v16, %v2121_v0  ;;  %v2135_v0 = vor.u32 %v2134_v45, %v2130_v51  ;;  %v2150_v16 = vrot.slane %v2148_v7, 5  ;;  %v2158_v18 = vshll.u32 %v287_v12, 16  ;;  %v291_v12 = vld [vmem:[%s9651_s9 + $0x138] sm:$0xf] }
  0x9c   : > { %v2102_v2 = vrot.slane %v2101_v31, 4  ;;  %v2154_v31 = vrot.slane %v2152_v30, 4  ;;  %11411 = vst [vmem:[#allocation36_spill] sm:$0xff] %v10083_v46  ;;  %v2163_v50 = vshrl.u32 %v288_v25, 16  ;;  %v2166_v45 = vshll.u32 %v288_v25, 16  ;;  %v9408_v25 = vld [vmem:[%s11285_s1 + $0x80] sm:$0xff]  }
  0x9d   : > { %v2126_v6 = vrot.slane %v2125_v57, 4  ;;  %v2136_v39 = vrot.slane %v2135_v0, 4  ;;  %v2172_v7 = vshll.u32 %v289_v40, 16  ;;  %v290_v30 = vld [vmem:[%s9651_s9 + $0x134] sm:$0xf]  ;;  %8994 = vmatprep.subr.bf16.mxu0 %v9408_v25 }
  0x9e   : > { %8761 = vmatmul.mubr.bf16.gmra.mxu0 %v10044_v1  ;;  %v2107_v59 = vsel %vm9680_vm2, %v2102_v2, %v2106_v43  ;;  %v2155_v57 = vor.u32 %v2154_v31, %v2150_v16  ;;  %v2145_v43 = vor.u32 %v2144_v58, %v2140_v27  ;;  %v2160_v2 = vrot.slane %v2158_v18, 5  ;;  %v294_v1 = vld [vmem:[%s9651_s9 + $0x144] sm:$0xf] }
  0x9f   : > { %8764 = vmatprep.mubr.bf16.mxu0 %v10056_v10  ;;  %v10079_v23 = vcombine.low %v2107_v59, %v2117_v15  ;;  %v2131_v29 = vsel %vm9680_vm2, %v2126_v6, %v2130_v51  ;;  %v2141_v15 = vsel %vm9680_vm2, %v2136_v39, %v2140_v27  ;;  %v2165_v51 = vrot.slane %v2163_v50, 4  ;;  %v9409_v27 = vld [vmem:[%s11285_s1 + $0xc0] sm:$0xff]   ;;  %8995 = vmatpush3.bf16.msra.mxu0 %v9408_v25 }
  0xa0   : > { %v2156_v59 = vrot.slane %v2155_v57, 4  ;;  %v2176_v6 = vshrl.u32 %v289_v40, 16  ;;  %v10090_v35 = vcombine.low %v2131_v29, %v2141_v15  ;;  %v2146_v0 = vrot.slane %v2145_v43, 4  ;;  %v292_v57 = vld [vmem:[%s9651_s9 + $0x13c] sm:$0x1]  ;;  %9138 = vmatprep.subr.bf16.mxu1 %v9409_v27 }
  0xa1   : > { %11410 = vst [vmem:[#allocation35_spill] sm:$0xff] %v10079_v23  ;;  %8905 = vmatmul.mubr.bf16.gmra.mxu1 %v10079_v23  ;;  %v2168_v31 = vrot.slane %v2166_v45, 5  ;;  %v2174_v58 = vrot.slane %v2172_v7, 5  ;;  %v2182_v18 = vshll.u32 %v290_v30, 16  ;;  %v10102_v39 = vcombine.low %v290_v30, %v291_v12  ;;  %v293_v15 = vld [vmem:[%s9651_s9 + $0x140] sm:$0xf] }
  0xa2   : > { %11412 = vst [vmem:[#allocation37_spill] sm:$0xff] %v10090_v35  ;;  %v2161_v40 = vsel %vm9680_vm2, %v2156_v59, %v2160_v2  ;;  %v2178_v29 = vrot.slane %v2176_v6, 4  ;;  %8908 = vmatprep.mubr.bf16.mxu1 %v10090_v35  ;;  %v2151_v50 = vsel %vm9680_vm2, %v2146_v0, %v2150_v16  ;;  %v2192_v45 = vshll.u32 %v291_v12, 16  ;;  %9139 = vmatpush3.bf16.msra.mxu1 %v9409_v27 }
  0xa3   : > { %11413 = vst [vmem:[#allocation38_spill] sm:$0xff] %v10102_v39  ;;  %v2169_v43 = vor.u32 %v2168_v31, %v2165_v51  ;;  %v2196_v7 = vshrl.u32 %v291_v12, 16  ;;  %v10109_v23 = vcombine.low %v2151_v50, %v2161_v40  ;;  %v2184_v59 = vrot.slane %v2182_v18, 5 }
  0xa4   : > { %v2179_v2 = vor.u32 %v2178_v29, %v2174_v58  ;;  %v2186_v6 = vshrl.u32 %v290_v30, 16  ;;  %v2202_v10 = vshll.u32 %v292_v57, 16  ;;  %v10112_v12 = vcombine.low %v293_v15, %v294_v1  ;;  %v295_v29 = vld [vmem:[%s9651_s9 + $0x148] sm:$0xf] }
  0xa5   : > { %11414 = vst [vmem:[#allocation39_spill] sm:$0xff] %v10109_v23  ;;  %v2198_v35 = vrot.slane %v2196_v7, 4  ;;  %v2207_v0 = vshrl.u32 %v293_v15, 16  ;;  %v2210_v40 = vshll.u32 %v293_v15, 16  ;;  %v2216_v27 = vshll.u32 %v294_v1, 16 }
  0xa6   : > { %8765 = vmatmul.mubr.bf16.gmra.mxu0 %v10068_v56  ;;  %v2194_v56 = vrot.slane %v2192_v45, 5  ;;  %v2180_v16 = vrot.slane %v2179_v2, 4  ;;  %v2188_v51 = vrot.slane %v2186_v6, 4  ;;  %11415 = vst [vmem:[#allocation40_spill] sm:$0xff] %v10112_v12  ;;  %v2204_v25 = vrot.slane %v2202_v10, 5 }
  0xa7   : > { %8768 = vmatprep.mubr.bf16.mxu0 %v10083_v46  ;;  %v2170_v46 = vrot.slane %v2169_v43, 4  ;;  %v2209_v50 = vrot.slane %v2207_v0, 4  ;;  %v296_v43 = vld [vmem:[%s9651_s9 + $0x14c] sm:$0xf]  ;;  %v2212_v2 = vrot.slane %v2210_v40, 5  ;;  %v2220_v6 = vshrl.u32 %v294_v1, 16 }
  0xa8   : > { %v2199_v31 = vor.u32 %v2198_v35, %v2194_v56  ;;  %v2185_v18 = vsel %vm9680_vm2, %v2180_v16, %v2184_v59  ;;  %v2189_v57 = vor.u32 %v2188_v51, %v2184_v59  ;;  %v2218_v10 = vrot.slane %v2216_v27, 5  ;;  %v297_v0 = vld [vmem:[%s9651_s9 + $0x150] sm:$0x1] }
  0xa9   : > { %8909 = vmatmul.mubr.bf16.gmra.mxu1 %v10109_v23  ;;  %v2175_v30 = vsel %vm9680_vm2, %v2170_v46, %v2174_v58  ;;  %v2226_v35 = vshll.u32 %v295_v29, 16  ;;  %v10125_v58 = vcombine.low %v295_v29, %v296_v43  ;;  %v2222_v59 = vrot.slane %v2220_v6, 4 }
  0xaa   : > { %v10121_v45 = vcombine.low %v2175_v30, %v2185_v18  ;;  %v2200_v7 = vrot.slane %v2199_v31, 4  ;;  %v2190_v46 = vrot.slane %v2189_v57, 4  ;;  %v2213_v16 = vor.u32 %v2212_v2, %v2209_v50  ;;  %v298_v18 = vld [vmem:[%s9651_s9 + $0x154] sm:$0xf] }
  0xab   : > { %11417 = vst [vmem:[#allocation42_spill] sm:$0xff] %v10125_v58  ;;  %v2236_v51 = vshll.u32 %v296_v43, 16  ;;  %v2228_v30 = vrot.slane %v2226_v35, 5  ;;  %v2240_v31 = vshrl.u32 %v296_v43, 16  ;;  %v2230_v40 = vshrl.u32 %v295_v29, 16 }
  0xac   : > { %11416 = vst [vmem:[#allocation41_spill] sm:$0xff] %v10121_v45  ;;  %8912 = vmatprep.mubr.bf16.mxu1 %v10121_v45  ;;  %v2205_v15 = vsel %vm9680_vm2, %v2200_v7, %v2204_v25  ;;  %v2195_v1 = vsel %vm9680_vm2, %v2190_v46, %v2194_v56  ;;  %v2214_v27 = vrot.slane %v2213_v16, 4  ;;  %v2223_v23 = vor.u32 %v2222_v59, %v2218_v10  ;;  %v300_v59 = vld [vmem:[%s9651_s9 + $0x15c] sm:$0xf] }
  0xad   : > { %v10134_v57 = vcombine.low %v2195_v1, %v2205_v15  ;;  %v2238_v45 = vrot.slane %v2236_v51, 5  ;;  %v2232_v25 = vrot.slane %v2230_v40, 4  ;;  %v2246_v7 = vshll.u32 %v297_v0, 16 }
  0xae   : > { %8769 = vmatmul.mubr.bf16.gmra.mxu0 %v10102_v39  ;;  %v2242_v39 = vrot.slane %v2240_v31, 4  ;;  %v2219_v56 = vsel %vm9680_vm2, %v2214_v27, %v2218_v10  ;;  %v2224_v29 = vrot.slane %v2223_v23, 4  ;;  %v2251_v43 = vshrl.u32 %v298_v18, 16  ;;  %v301_v31 = vld [vmem:[%s9651_s9 + $0x160] sm:$0xf] }
  0xaf   : > { %8772 = vmatprep.mubr.bf16.mxu0 %v10112_v12  ;;  %11418 = vst [vmem:[#allocation43_spill] sm:$0xff] %v10134_v57  ;;  %v299_v12 = vld [vmem:[%s9651_s9 + $0x158] sm:$0xf]  ;;  %v2254_v2 = vshll.u32 %v298_v18, 16  ;;  %v2233_v6 = vor.u32 %v2232_v25, %v2228_v30  ;;  %v2248_v35 = vrot.slane %v2246_v7, 5  ;;  %v2270_v25 = vshll.u32 %v300_v59, 16 }
  0xb0   : > { %v10137_v50 = vcombine.low %v298_v18, %v299_v12  ;;  %v2243_v46 = vor.u32 %v2242_v39, %v2238_v45  ;;  %v2260_v15 = vshll.u32 %v299_v12, 16  ;;  %v2229_v16 = vsel %vm9680_vm2, %v2224_v29, %v2228_v30  ;;  %v302_v30 = vld [vmem:[%s9651_s9 + $0x164] sm:$0x1] }
  0xb1   : > { %8913 = vmatmul.mubr.bf16.gmra.mxu1 %v10134_v57  ;;  %v2253_v51 = vrot.slane %v2251_v43, 4  ;;  %v2256_v0 = vrot.slane %v2254_v2, 5  ;;  %v2264_v1 = vshrl.u32 %v299_v12, 16  ;;  %v10147_v10 = vcombine.low %v2219_v56, %v2229_v16  ;;  %v303_v2 = vld [vmem:[%s9651_s9 + $0x168] sm:$0xf] }
  0xb2   : > { %11419 = vst [vmem:[#allocation44_spill] sm:$0xff] %v10137_v50  ;;  %v2234_v23 = vrot.slane %v2233_v6, 4  ;;  %v2244_v40 = vrot.slane %v2243_v46, 4  ;;  %v2262_v39 = vrot.slane %v2260_v15, 5  ;;  %v10150_v7 = vcombine.low %v300_v59, %v301_v31 }
  0xb3   : > { %11420 = vst [vmem:[#allocation45_spill] sm:$0xff] %v10147_v10  ;;  %v2266_v18 = vrot.slane %v2264_v1, 4  ;;  %v2257_v27 = vor.u32 %v2256_v0, %v2253_v51  ;;  %8916 = vmatprep.mubr.bf16.mxu1 %v10147_v10  ;;  %v2280_v29 = vshll.u32 %v301_v31, 16  ;;  %v2284_v43 = vshrl.u32 %v301_v31, 16  ;;  %v304_v10 = vld [vmem:[%s9651_s9 + $0x16c] sm:$0xf] }
  0xb4   : > { %11421 = vst [vmem:[#allocation46_spill] sm:$0xff] %v10150_v7  ;;  %v2239_v12 = vsel %vm9680_vm2, %v2234_v23, %v2238_v45  ;;  %v2249_v56 = vsel %vm9680_vm2, %v2244_v40, %v2248_v35  ;;  %v2272_v16 = vrot.slane %v2270_v25, 5  ;;  %v2274_v1 = vshrl.u32 %v300_v59, 16  ;;  %v305_v25 = vld [vmem:[%s9651_s9 + $0x170] sm:$0xf] }
  0xb5   : > { %v10159_v6 = vcombine.low %v2239_v12, %v2249_v56  ;;  %v2258_v46 = vrot.slane %v2257_v27, 4  ;;  %v2267_v15 = vor.u32 %v2266_v18, %v2262_v39  ;;  %v2282_v51 = vrot.slane %v2280_v29, 5 }
  0xb6   : > { %8773 = vmatmul.mubr.bf16.gmra.mxu0 %v10125_v58  ;;  %v2286_v0 = vrot.slane %v2284_v43, 4  ;;  %v2290_v57 = vshll.u32 %v302_v30, 16  ;;  %v10165_v31 = vcombine.low %v303_v2, %v304_v10  ;;  %v2295_v23 = vshrl.u32 %v303_v2, 16  ;;  %v306_v43 = vld [vmem:[%s9651_s9 + $0x174] sm:$0xf] }
  0xb7   : > { %8776 = vmatprep.mubr.bf16.mxu0 %v10137_v50  ;;  %11422 = vst [vmem:[#allocation47_spill] sm:$0xff] %v10159_v6  ;;  %v2263_v45 = vsel %vm9680_vm2, %v2258_v46, %v2262_v39  ;;  %v2268_v35 = vrot.slane %v2267_v15, 4  ;;  %v2276_v40 = vrot.slane %v2274_v1, 4  ;;  %v2298_v12 = vshll.u32 %v303_v2, 16 }
  0xb8   : > { %11423 = vst [vmem:[#allocation48_spill] sm:$0xff] %v10165_v31  ;;  %v2287_v27 = vor.u32 %v2286_v0, %v2282_v51  ;;  %v2292_v18 = vrot.slane %v2290_v57, 5  ;;  %v2297_v30 = vrot.slane %v2295_v23, 4  ;;  %v2304_v56 = vshll.u32 %v304_v10, 16 }
  0xb9   : > { %8917 = vmatmul.mubr.bf16.gmra.mxu1 %v10159_v6  ;;  %v2273_v59 = vsel %vm9680_vm2, %v2268_v35, %v2272_v16  ;;  %v2308_v29 = vshrl.u32 %v304_v10, 16  ;;  %v2277_v46 = vor.u32 %v2276_v40, %v2272_v16  ;;  %v2300_v57 = vrot.slane %v2298_v12, 5  ;;  %v307_v35 = vld [vmem:[%s9651_s9 + $0x178] sm:$0x1] }
  0xba   : > { %v10172_v39 = vcombine.low %v2263_v45, %v2273_v59  ;;  %v2288_v15 = vrot.slane %v2287_v27, 4  ;;  %v2306_v2 = vrot.slane %v2304_v56, 5  ;;  %v2314_v1 = vshll.u32 %v305_v25, 16  ;;  %v308_v56 = vld [vmem:[%s9651_s9 + $0x17c] sm:$0xf] }
  0xbb   : > { %v2310_v0 = vrot.slane %v2308_v29, 4  ;;  %v10175_v6 = vcombine.low %v305_v25, %v306_v43  ;;  %v2278_v23 = vrot.slane %v2277_v46, 4  ;;  %v2301_v45 = vor.u32 %v2300_v57, %v2297_v30  ;;  %v309_v30 = vld [vmem:[%s9651_s9 + $0x180] sm:$0xf] }
  0xbc   : > { %11424 = vst [vmem:[#allocation49_spill] sm:$0xff] %v10172_v39  ;;  %8920 = vmatprep.mubr.bf16.mxu1 %v10172_v39  ;;  %v2293_v10 = vsel %vm9680_vm2, %v2288_v15, %v2292_v18  ;;  %v2324_v16 = vshll.u32 %v306_v43, 16  ;;  %v2316_v27 = vrot.slane %v2314_v1, 5  ;;  %v2328_v59 = vshrl.u32 %v306_v43, 16  ;;  %v310_v1 = vld [vmem:[%s9651_s9 + $0x184] sm:$0xf] }
  0xbd   : > { %11425 = vst [vmem:[#allocation50_spill] sm:$0xff] %v10175_v6  ;;  %v2311_v40 = vor.u32 %v2310_v0, %v2306_v2  ;;  %v2318_v12 = vshrl.u32 %v305_v25, 16  ;;  %v2283_v29 = vsel %vm9680_vm2, %v2278_v23, %v2282_v51  ;;  %v2334_v50 = vshll.u32 %v307_v35, 16 }
  0xbe   : > { %8777 = vmatmul.mubr.bf16.gmra.mxu0 %v10150_v7  ;;  %v2326_v7 = vrot.slane %v2324_v16, 5  ;;  %v10184_v39 = vcombine.low %v2283_v29, %v2293_v10  ;;  %v2330_v18 = vrot.slane %v2328_v59, 4  ;;  %v10189_v0 = vcombine.low %v308_v56, %v309_v30 }
  0xbf   : > { %8780 = vmatprep.mubr.bf16.mxu0 %v10165_v31  ;;  %v2302_v31 = vrot.slane %v2301_v45, 4  ;;  %v2312_v46 = vrot.slane %v2311_v40, 4  ;;  %v2320_v15 = vrot.slane %v2318_v12, 4  ;;  %v2336_v43 = vrot.slane %v2334_v50, 5  ;;  %v311_v45 = vld [vmem:[%s9651_s9 + $0x188] sm:$0xf] }
  0xc0   : > { %11426 = vst [vmem:[#allocation51_spill] sm:$0xff] %v10184_v39  ;;  %11427 = vst [vmem:[#allocation52_spill] sm:$0xff] %v10189_v0  ;;  %v2339_v25 = vshrl.u32 %v308_v56, 16  ;;  %v2331_v23 = vor.u32 %v2330_v18, %v2326_v7  ;;  %v2342_v10 = vshll.u32 %v308_v56, 16  ;;  %v2358_v29 = vshll.u32 %v310_v1, 16 }
  0xc1   : > { %v2307_v57 = vsel %vm9680_vm2, %v2302_v31, %v2306_v2  ;;  %8921 = vmatmul.mubr.bf16.gmra.mxu1 %v10184_v39  ;;  %v2317_v51 = vsel %vm9680_vm2, %v2312_v46, %v2316_v27  ;;  %v2321_v35 = vor.u32 %v2320_v15, %v2316_v27  ;;  %v2348_v31 = vshll.u32 %v309_v30, 16  ;;  %v312_v15 = vld [vmem:[%s9651_s9 + $0x18c] sm:$0x1] }
  0xc2   : > { %v10197_v16 = vcombine.low %v2307_v57, %v2317_v51  ;;  %v2341_v50 = vrot.slane %v2339_v25, 4  ;;  %v2352_v2 = vshrl.u32 %v309_v30, 16  ;;  %v2332_v59 = vrot.slane %v2331_v23, 4 }
  0xc3   : > { %v2322_v40 = vrot.slane %v2321_v35, 4  ;;  %v2344_v12 = vrot.slane %v2342_v10, 5  ;;  %v2350_v27 = vrot.slane %v2348_v31, 5  ;;  %v10201_v56 = vcombine.low %v310_v1, %v311_v45  ;;  %v313_v35 = vld [vmem:[%s9651_s9 + $0x190] sm:$0xf] }
  0xc4   : > { %11428 = vst [vmem:[#allocation53_spill] sm:$0xff] %v10197_v16  ;;  %8924 = vmatprep.mubr.bf16.mxu1 %v10197_v16  ;;  %v2354_v46 = vrot.slane %v2352_v2, 4  ;;  %v2368_v18 = vshll.u32 %v311_v45, 16  ;;  %v2337_v25 = vsel %vm9680_vm2, %v2332_v59, %v2336_v43  ;;  %v2360_v51 = vrot.slane %v2358_v29, 5  ;;  %v314_v31 = vld [vmem:[%s9651_s9 + $0x194] sm:$0xf] }
  0xc5   : > { %11429 = vst [vmem:[#allocation54_spill] sm:$0xff] %v10201_v56  ;;  %v2327_v57 = vsel %vm9680_vm2, %v2322_v40, %v2326_v7  ;;  %v2345_v30 = vor.u32 %v2344_v12, %v2341_v50  ;;  %v2372_v16 = vshrl.u32 %v311_v45, 16  ;;  %v10212_v58 = vcombine.low %v313_v35, %v314_v31  ;;  %v315_v29 = vld [vmem:[%s9651_s9 + $0x198] sm:$0xf] }
  0xc6   : > { %8781 = vmatmul.mubr.bf16.gmra.mxu0 %v10175_v6  ;;  %v10209_v23 = vcombine.low %v2327_v57, %v2337_v25  ;;  %v2355_v10 = vor.u32 %v2354_v46, %v2350_v27  ;;  %v2370_v39 = vrot.slane %v2368_v18, 5  ;;  %v2378_v6 = vshll.u32 %v312_v15, 16  ;;  %v316_v15 = vld [vmem:[%s9651_s9 + $0x19c] sm:$0xf] }
  0xc7   : > { %8784 = vmatprep.mubr.bf16.mxu0 %v10189_v0  ;;  %v2346_v2 = vrot.slane %v2345_v30, 4  ;;  %v2362_v0 = vshrl.u32 %v310_v1, 16  ;;  %11431 = vst [vmem:[#allocation56_spill] sm:$0xff] %v10212_v58  ;;  %v2374_v7 = vrot.slane %v2372_v16, 4  ;;  %v2383_v40 = vshrl.u32 %v313_v35, 16 }
  0xc8   : > { %11430 = vst [vmem:[#allocation55_spill] sm:$0xff] %v10209_v23  ;;  %v2356_v44 = vrot.slane %v2355_v10, 4  ;;  %v2386_v43 = vshll.u32 %v313_v35, 16  ;;  %v2380_v59 = vrot.slane %v2378_v6, 5  ;;  %v2392_v12 = vshll.u32 %v314_v31, 16 }
  0xc9   : > { %8925 = vmatmul.mubr.bf16.gmra.mxu1 %v10209_v23  ;;  %v2351_v50 = vsel %vm9680_vm2, %v2346_v2, %v2350_v27  ;;  %v2364_v45 = vrot.slane %v2362_v0, 4  ;;  %v2375_v46 = vor.u32 %v2374_v7, %v2370_v39  ;;  %v2385_v16 = vrot.slane %v2383_v40, 4 }
  0xca   : > { %v2361_v1 = vsel %vm9680_vm2, %v2356_v44, %v2360_v51  ;;  %v2388_v18 = vrot.slane %v2386_v43, 5  ;;  %v2394_v27 = vrot.slane %v2392_v12, 5  ;;  %v2396_v30 = vshrl.u32 %v314_v31, 16  ;;  %v317_v43 = vld [vmem:[%s9651_s9 + $0x1a0] sm:$0x1] }
  0xcb   : > { %v10223_v57 = vcombine.low %v2351_v50, %v2361_v1  ;;  %v2365_v25 = vor.u32 %v2364_v45, %v2360_v51  ;;  %v2376_v0 = vrot.slane %v2375_v46, 4  ;;  %v2402_v35 = vshll.u32 %v315_v29, 16  ;;  %v318_v31 = vld [vmem:[%s9651_s9 + $0x1a4] sm:$0xf] }
  0xcc   : > { %v2389_v6 = vor.u32 %v2388_v18, %v2385_v16  ;;  %v10225_v10 = vcombine.low %v315_v29, %v316_v15  ;;  %v2398_v2 = vrot.slane %v2396_v30, 4  ;;  %v2412_v7 = vshll.u32 %v316_v15, 16 }
  0xcd   : > { %11432 = vst [vmem:[#allocation57_spill] sm:$0xff] %v10223_v57  ;;  %8928 = vmatprep.mubr.bf16.mxu1 %v10223_v57  ;;  %v2366_v44 = vrot.slane %v2365_v25, 4  ;;  %v2416_v40 = vshrl.u32 %v316_v15, 16  ;;  %v2381_v50 = vsel %vm9680_vm2, %v2376_v0, %v2380_v59  ;;  %v2404_v45 = vrot.slane %v2402_v35, 5  ;;  %v319_v57 = vld [vmem:[%s9651_s9 + $0x1a8] sm:$0xf] }
  0xce   : > { %8785 = vmatmul.mubr.bf16.gmra.mxu0 %v10201_v56  ;;  %11433 = vst [vmem:[#allocation58_spill] sm:$0xff] %v10225_v10  ;;  %v2390_v51 = vrot.slane %v2389_v6, 4  ;;  %v2406_v12 = vshrl.u32 %v315_v29, 16  ;;  %v2399_v46 = vor.u32 %v2398_v2, %v2394_v27  ;;  %v2414_v16 = vrot.slane %v2412_v7, 5  ;;  %v320_v7 = vld [vmem:[%s9651_s9 + $0x1ac] sm:$0xf] }
  0xcf   : > { %8788 = vmatprep.mubr.bf16.mxu0 %v10212_v58  ;;  %v2371_v1 = vsel %vm9680_vm2, %v2366_v44, %v2370_v39  ;;  %v2418_v18 = vrot.slane %v2416_v40, 4  ;;  %v2422_v23 = vshll.u32 %v317_v43, 16  ;;  %v10240_v0 = vcombine.low %v318_v31, %v319_v57 }
  0xd0   : > { %v10235_v25 = vcombine.low %v2371_v1, %v2381_v50  ;;  %v2395_v15 = vsel %vm9680_vm2, %v2390_v51, %v2394_v27  ;;  %v2408_v30 = vrot.slane %v2406_v12, 4  ;;  %v2400_v59 = vrot.slane %v2399_v46, 4  ;;  %v321_v51 = vld [vmem:[%s9651_s9 + $0x1b0] sm:$0xf] }
  0xd1   : > { %v2419_v29 = vor.u32 %v2418_v18, %v2414_v16  ;;  %11435 = vst [vmem:[#allocation60_spill] sm:$0xff] %v10240_v0  ;;  %v2427_v39 = vshrl.u32 %v318_v31, 16  ;;  %v2424_v35 = vrot.slane %v2422_v23, 5  ;;  %v2430_v44 = vshll.u32 %v318_v31, 16 }
  0xd2   : > { %11434 = vst [vmem:[#allocation59_spill] sm:$0xff] %v10235_v25  ;;  %8929 = vmatmul.mubr.bf16.gmra.mxu1 %v10235_v25  ;;  %v2409_v6 = vor.u32 %v2408_v30, %v2404_v45  ;;  %v2436_v2 = vshll.u32 %v319_v57, 16  ;;  %v2405_v27 = vsel %vm9680_vm2, %v2400_v59, %v2404_v45  ;;  %v2440_v50 = vshrl.u32 %v319_v57, 16  ;;  %v322_v45 = vld [vmem:[%s9651_s9 + $0x1b4] sm:$0x1] }
  0xd3   : > { %v2420_v40 = vrot.slane %v2419_v29, 4  ;;  %v2429_v43 = vrot.slane %v2427_v39, 4  ;;  %v10248_v12 = vcombine.low %v2395_v15, %v2405_v27  ;;  %v2432_v46 = vrot.slane %v2430_v44, 5  ;;  %v323_v39 = vld [vmem:[%s9651_s9 + $0x1b8] sm:$0xf] }
  0xd4   : > { %v2410_v1 = vrot.slane %v2409_v6, 4  ;;  %v2438_v18 = vrot.slane %v2436_v2, 5  ;;  %v2442_v31 = vrot.slane %v2440_v50, 4  ;;  %v2446_v30 = vshll.u32 %v320_v7, 16 }
  0xd5   : > { %11436 = vst [vmem:[#allocation61_spill] sm:$0xff] %v10248_v12  ;;  %v2425_v23 = vsel %vm9680_vm2, %v2420_v40, %v2424_v35  ;;  %v10252_v25 = vcombine.low %v320_v7, %v321_v51  ;;  %8932 = vmatprep.mubr.bf16.mxu1 %v10248_v12  ;;  %v2433_v59 = vor.u32 %v2432_v46, %v2429_v43  ;;  %v2456_v15 = vshll.u32 %v321_v51, 16 }
  0xd6   : > { %8789 = vmatmul.mubr.bf16.gmra.mxu0 %v10225_v10  ;;  %v2415_v57 = vsel %vm9680_vm2, %v2410_v1, %v2414_v16  ;;  %v2460_v29 = vshrl.u32 %v321_v51, 16  ;;  %v2443_v44 = vor.u32 %v2442_v31, %v2438_v18  ;;  %v2448_v2 = vrot.slane %v2446_v30, 5  ;;  %v324_v10 = vld [vmem:[%s9651_s9 + $0x1bc] sm:$0xf]  ;;  %v325_v31 = vld [vmem:[%s9651_s9 + $0x1c0] sm:$0xf] }
  0xd7   : > { %8792 = vmatprep.mubr.bf16.mxu0 %v10240_v0  ;;  %11437 = vst [vmem:[#allocation62_spill] sm:$0xff] %v10252_v25  ;;  %v10259_v6 = vcombine.low %v2415_v57, %v2425_v23  ;;  %v2450_v35 = vshrl.u32 %v320_v7, 16  ;;  %v2434_v27 = vrot.slane %v2433_v59, 4  ;;  %v2458_v40 = vrot.slane %v2456_v15, 5  ;;  %v326_v15 = vld [vmem:[%s9651_s9 + $0x1c4] sm:$0xf] }
  0xd8   : > { %v2462_v50 = vrot.slane %v2460_v29, 4  ;;  %v2466_v0 = vshll.u32 %v322_v45, 16  ;;  %v2444_v58 = vrot.slane %v2443_v44, 4  ;;  %v10263_v43 = vcombine.low %v323_v39, %v324_v10 }
  0xd9   : > { %11438 = vst [vmem:[#allocation63_spill] sm:$0xff] %v10259_v6  ;;  %v2452_v16 = vrot.slane %v2450_v35, 4  ;;  %v2471_v51 = vshrl.u32 %v323_v39, 16  ;;  %v2439_v1 = vsel %vm9680_vm2, %v2434_v27, %v2438_v18  ;;  %v2474_v23 = vshll.u32 %v323_v39, 16 }
  0xda   : > { %11439 = vst [vmem:[#allocation64_spill] sm:$0xff] %v10263_v43  ;;  %8933 = vmatmul.mubr.bf16.gmra.mxu1 %v10259_v6  ;;  %v2463_v7 = vor.u32 %v2462_v50, %v2458_v40  ;;  %v2468_v46 = vrot.slane %v2466_v0, 5  ;;  %v2449_v30 = vsel %vm9680_vm2, %v2444_v58, %v2448_v2  ;;  %v2480_v59 = vshll.u32 %v324_v10, 16 }
  0xdb   : > { %v2453_v45 = vor.u32 %v2452_v16, %v2448_v2  ;;  %v2473_v57 = vrot.slane %v2471_v51, 4  ;;  %v10273_v29 = vcombine.low %v2439_v1, %v2449_v30  ;;  %v2476_v35 = vrot.slane %v2474_v23, 5  ;;  %v327_v1 = vld [vmem:[%s9651_s9 + $0x1c8] sm:$0x1] }
  0xdc   : > { %v2464_v44 = vrot.slane %v2463_v7, 4  ;;  %v2484_v18 = vshrl.u32 %v324_v10, 16  ;;  %v2482_v0 = vrot.slane %v2480_v59, 5  ;;  %v2490_v39 = vshll.u32 %v325_v31, 16 }
  0xdd   : > { %11440 = vst [vmem:[#allocation65_spill] sm:$0xff] %v10273_v29  ;;  %v2454_v27 = vrot.slane %v2453_v45, 4  ;;  %v10275_v50 = vcombine.low %v325_v31, %v326_v15  ;;  %8936 = vmatprep.mubr.bf16.mxu1 %v10273_v29  ;;  %v2477_v16 = vor.u32 %v2476_v35, %v2473_v57  ;;  %v2500_v51 = vshll.u32 %v326_v15, 16  ;;  %v328_v45 = vld [vmem:[%s9651_s9 + $0x1cc] sm:$0xf] }
  0xde   : > { %8793 = vmatmul.mubr.bf16.gmra.mxu0 %v10252_v25  ;;  %v2469_v58 = vsel %vm9680_vm2, %v2464_v44, %v2468_v46  ;;  %v2486_v2 = vrot.slane %v2484_v18, 4  ;;  %v2492_v23 = vrot.slane %v2490_v39, 5  ;;  %v2504_v10 = vshrl.u32 %v326_v15, 16  ;;  %v329_v29 = vld [vmem:[%s9651_s9 + $0x1d0] sm:$0xf] }
  0xdf   : > { %8796 = vmatprep.mubr.bf16.mxu0 %v10263_v43  ;;  %11441 = vst [vmem:[#allocation66_spill] sm:$0xff] %v10275_v50  ;;  %v2459_v7 = vsel %vm9680_vm2, %v2454_v27, %v2458_v40  ;;  %v2494_v30 = vshrl.u32 %v325_v31, 16  ;;  %v2478_v6 = vrot.slane %v2477_v16, 4  ;;  %v2502_v25 = vrot.slane %v2500_v51, 5  ;;  %v330_v16 = vld [vmem:[%s9651_s9 + $0x1d4] sm:$0xf] }
  0xe0   : > { %v10284_v59 = vcombine.low %v2459_v7, %v2469_v58  ;;  %v2487_v43 = vor.u32 %v2486_v2, %v2482_v0  ;;  %v2506_v46 = vrot.slane %v2504_v10, 4  ;;  %v2510_v44 = vshll.u32 %v327_v1, 16 }
  0xe1   : > { %v2496_v57 = vrot.slane %v2494_v30, 4  ;;  %v10288_v35 = vcombine.low %v328_v45, %v329_v29  ;;  %v2483_v40 = vsel %vm9680_vm2, %v2478_v6, %v2482_v0  ;;  %v2515_v15 = vshrl.u32 %v328_v45, 16  ;;  %v331_v30 = vld [vmem:[%s9651_s9 + $0x1d8] sm:$0xf] }
  0xe2   : > { %11442 = vst [vmem:[#allocation67_spill] sm:$0xff] %v10284_v59  ;;  %8937 = vmatmul.mubr.bf16.gmra.mxu1 %v10284_v59  ;;  %v2488_v31 = vrot.slane %v2487_v43, 4  ;;  %v2518_v18 = vshll.u32 %v328_v45, 16  ;;  %v2507_v39 = vor.u32 %v2506_v46, %v2502_v25  ;;  %v2512_v58 = vrot.slane %v2510_v44, 5 }
  0xe3   : > { %11443 = vst [vmem:[#allocation68_spill] sm:$0xff] %v10288_v35  ;;  %v2497_v27 = vor.u32 %v2496_v57, %v2492_v23  ;;  %v2524_v2 = vshll.u32 %v329_v29, 16  ;;  %v2517_v1 = vrot.slane %v2515_v15, 4  ;;  %v2528_v10 = vshrl.u32 %v329_v29, 16  ;;  %v333_v15 = vld [vmem:[%s9651_s9 + $0x1e0] sm:$0xf] }
  0xe4   : > { %v2493_v51 = vsel %vm9680_vm2, %v2488_v31, %v2492_v23  ;;  %v2520_v7 = vrot.slane %v2518_v18, 5  ;;  %v2508_v0 = vrot.slane %v2507_v39, 4  ;;  %v2534_v44 = vshll.u32 %v330_v16, 16 }
  0xe5   : > { %v10298_v6 = vcombine.low %v2483_v40, %v2493_v51  ;;  %v2498_v43 = vrot.slane %v2497_v27, 4  ;;  %v2526_v45 = vrot.slane %v2524_v2, 5  ;;  %v2530_v46 = vrot.slane %v2528_v10, 4 }
  0xe6   : > { %8797 = vmatmul.mubr.bf16.gmra.mxu0 %v10275_v50  ;;  %v2521_v57 = vor.u32 %v2520_v7, %v2517_v1  ;;  %v10300_v59 = vcombine.low %v330_v16, %v331_v30  ;;  %v2513_v29 = vsel %vm9680_vm2, %v2508_v0, %v2512_v58  ;;  %v2544_v40 = vshll.u32 %v331_v30, 16 }
  0xe7   : > { %8800 = vmatprep.mubr.bf16.mxu0 %v10288_v35  ;;  %11444 = vst [vmem:[#allocation69_spill] sm:$0xff] %v10298_v6  ;;  %v332_v35 = vld [vmem:[%s9651_s9 + $0x1dc] sm:$0x1]  ;;  %8940 = vmatprep.mubr.bf16.mxu1 %v10298_v6  ;;  %v2503_v23 = vsel %vm9680_vm2, %v2498_v43, %v2502_v25  ;;  %v2548_v31 = vshrl.u32 %v331_v30, 16  ;;  %v2531_v39 = vor.u32 %v2530_v46, %v2526_v45  ;;  %v2536_v2 = vrot.slane %v2534_v44, 5 }
  0xe8   : > { %11445 = vst [vmem:[#allocation70_spill] sm:$0xff] %v10300_v59  ;;  %v10309_v18 = vcombine.low %v2503_v23, %v2513_v29  ;;  %v2522_v27 = vrot.slane %v2521_v57, 4  ;;  %v2546_v51 = vrot.slane %v2544_v40, 5  ;;  %v2538_v7 = vshrl.u32 %v330_v16, 16  ;;  %v334_v6 = vld [vmem:[%s9651_s9 + $0x1e4] sm:$0xf] }
  0xe9   : > { %v2550_v1 = vrot.slane %v2548_v31, 4  ;;  %v2554_v10 = vshll.u32 %v332_v35, 16  ;;  %v2532_v58 = vrot.slane %v2531_v39, 4  ;;  %v10316_v30 = vcombine.low %v333_v15, %v334_v6  ;;  %v335_v23 = vld [vmem:[%s9651_s9 + $0x1e8] sm:$0xf] }
  0xea   : > { %11446 = vst [vmem:[#allocation71_spill] sm:$0xff] %v10309_v18  ;;  %8941 = vmatmul.mubr.bf16.gmra.mxu1 %v10309_v18  ;;  %v2527_v25 = vsel %vm9680_vm2, %v2522_v27, %v2526_v45  ;;  %v2559_v43 = vshrl.u32 %v333_v15, 16  ;;  %v2540_v0 = vrot.slane %v2538_v7, 4  ;;  %v2562_v44 = vshll.u32 %v333_v15, 16  ;;  %v336_v31 = vld [vmem:[%s9651_s9 + $0x1ec] sm:$0xf] }
  0xeb   : > { %11447 = vst [vmem:[#allocation72_spill] sm:$0xff] %v10316_v30  ;;  %v2551_v46 = vor.u32 %v2550_v1, %v2546_v51  ;;  %v2556_v57 = vrot.slane %v2554_v10, 5  ;;  %v2537_v35 = vsel %vm9680_vm2, %v2532_v58, %v2536_v2  ;;  %v2568_v29 = vshll.u32 %v334_v6, 16 }
  0xec   : > { %v2561_v16 = vrot.slane %v2559_v43, 4  ;;  %v2572_v40 = vshrl.u32 %v334_v6, 16  ;;  %v10323_v45 = vcombine.low %v2527_v25, %v2537_v35  ;;  %v2541_v27 = vor.u32 %v2540_v0, %v2536_v2 }
  0xed   : > { %v2552_v39 = vrot.slane %v2551_v46, 4  ;;  %v2564_v18 = vrot.slane %v2562_v44, 5  ;;  %v2570_v7 = vrot.slane %v2568_v29, 5  ;;  %v2578_v10 = vshll.u32 %v335_v23, 16 }
  0xee   : > { %8801 = vmatmul.mubr.bf16.gmra.mxu0 %v10300_v59  ;;  %11448 = vst [vmem:[#allocation73_spill] sm:$0xff] %v10323_v45  ;;  %v2574_v1 = vrot.slane %v2572_v40, 4  ;;  %v10325_v15 = vcombine.low %v335_v23, %v336_v31  ;;  %v337_v59 = vld [vmem:[%s9651_s9 + $0x1f0] sm:$0x1]  ;;  %8944 = vmatprep.mubr.bf16.mxu1 %v10323_v45  ;;  %v2542_v58 = vrot.slane %v2541_v27, 4  ;;  %v2592_v0 = vshrl.u32 %v336_v31, 16 }
  0xef   : > { %8804 = vmatprep.mubr.bf16.mxu0 %v10316_v30  ;;  %v2557_v43 = vsel %vm9680_vm2, %v2552_v39, %v2556_v57  ;;  %v2565_v6 = vor.u32 %v2564_v18, %v2561_v16  ;;  %v2588_v30 = vshll.u32 %v336_v31, 16  ;;  %v2580_v2 = vrot.slane %v2578_v10, 5  ;;  %v338_v27 = vld [vmem:[%s9651_s9 + $0x1f4] sm:$0xf] }
  0xf0   : > { %11449 = vst [vmem:[#allocation74_spill] sm:$0xff] %v10325_v15  ;;  %v2575_v25 = vor.u32 %v2574_v1, %v2570_v7  ;;  %v2582_v46 = vshrl.u32 %v335_v23, 16  ;;  %v2547_v44 = vsel %vm9680_vm2, %v2542_v58, %v2546_v51  ;;  %v2598_v45 = vshll.u32 %v337_v59, 16  ;;  %v339_v1 = vld [vmem:[%s9651_s9 + $0x1f8] sm:$0xf] }
  0xf1   : > { %v2566_v35 = vrot.slane %v2565_v6, 4  ;;  %v2590_v40 = vrot.slane %v2588_v30, 5  ;;  %v10335_v50 = vcombine.low %v2547_v44, %v2557_v43  ;;  %v2594_v18 = vrot.slane %v2592_v0, 4  ;;  %v340_v0 = vld [vmem:[%s9651_s9 + $0x1fc] sm:$0xf] }
  0xf2   : > { %v2576_v57 = vrot.slane %v2575_v25, 4  ;;  %v2584_v39 = vrot.slane %v2582_v46, 4  ;;  %v2600_v51 = vrot.slane %v2598_v45, 5  ;;  %v10342_v58 = vcombine.low %v338_v27, %v339_v1 }
  0xf3   : > { %11450 = vst [vmem:[#allocation75_spill] sm:$0xff] %v10335_v50  ;;  %v2571_v23 = vsel %vm9680_vm2, %v2566_v35, %v2570_v7  ;;  %8945 = vmatmul.mubr.bf16.gmra.mxu1 %v10335_v50  ;;  %v2595_v43 = vor.u32 %v2594_v18, %v2590_v40  ;;  %v2603_v25 = vshrl.u32 %v338_v27, 16  ;;  %v2606_v45 = vshll.u32 %v338_v27, 16 }
  0xf4   : > { %11452 = vst [vmem:[#allocation77_spill] sm:$0xff] %v10342_v58  ;;  %v2581_v59 = vsel %vm9680_vm2, %v2576_v57, %v2580_v2  ;;  %v2585_v30 = vor.u32 %v2584_v39, %v2580_v2  ;;  %v2612_v35 = vshll.u32 %v339_v1, 16  ;;  %v2616_v2 = vshrl.u32 %v339_v1, 16 }
  0xf5   : > { %v10348_v46 = vcombine.low %v2571_v23, %v2581_v59  ;;  %v2605_v57 = vrot.slane %v2603_v25, 4  ;;  %v2608_v23 = vrot.slane %v2606_v45, 5  ;;  %v2622_v59 = vshll.u32 %v340_v0, 16 }
  0xf6   : > { %v8710_v29 = vpop.f32.mrf.mxu0  ;;  %8805 = vmatmul.mubr.bf16.gmra.mxu0 %v10325_v15  ;;  %v2618_v25 = vrot.slane %v2616_v2, 4 }
  0xf7   : > { %v8854_v16 = vpop.f32.mrf.mxu1  ;;  %11453 = vst [vmem:[#allocation78_spill] sm:$0xff] %v10348_v46  ;;  %8808 = vmatprep.mubr.bf16.mxu0 %v10342_v58  ;;  %8948 = vmatprep.mubr.bf16.mxu1 %v10348_v46  ;;  %v2609_v45 = vor.u32 %v2608_v23, %v2605_v57  ;;  %v343_v46 = vld [vmem:[%s9651_s9 + $0x208] sm:$0xf]  ;;  %v344_v58 = vld [vmem:[%s9651_s9 + $0x20c] sm:$0xf] }
  0xf8   : > { %v10340_v31 = vadd.f32 %v8854_v16, %v8710_v29  ;;  %v860_v10 = vpop.f32.mrf.mxu0  ;;  %v2586_v29 = vrot.slane %v2585_v30, 4  ;;  %v2596_v16 = vrot.slane %v2595_v43, 4 }
  0xf9   : > { %v3265_v6 = vpop.f32.mrf.mxu1  ;;  %v2610_v2 = vrot.slane %v2609_v45, 4 }
  0xfa   : > { %11451 = vst [vmem:[#allocation76_spill] sm:$0xff] %v10340_v31  ;;  %v10350_v44 = vadd.f32 %v3265_v6, %v860_v10  ;;  %v8711_v7 = vpop.f32.mrf.mxu0  ;;  %v2614_v10 = vrot.slane %v2612_v35, 5  ;;  %v341_v6 = vld [vmem:[%s9651_s9 + $0x200] sm:$0xf]  ;;  %v2591_v27 = vsel %vm9680_vm2, %v2586_v29, %v2590_v40  ;;  %v2601_v30 = vsel %vm9680_vm2, %v2596_v16, %v2600_v51 }
  0xfb   : > { %v8855_v31 = vpop.f32.mrf.mxu1  ;;  %v10361_v1 = vcombine.low %v340_v0, %v341_v6  ;;  %v2624_v35 = vrot.slane %v2622_v59, 5  ;;  %v2632_v40 = vshll.u32 %v341_v6, 16  ;;  %v2636_v29 = vshrl.u32 %v341_v6, 16 }
  0xfc   : > { %11454 = vst [vmem:[#allocation79_spill] sm:$0xff] %v10350_v44  ;;  %v10354_v18 = vadd.f32 %v8855_v31, %v8711_v7  ;;  %v863_v39 = vpop.f32.mrf.mxu0  ;;  %v342_v44 = vld [vmem:[%s9651_s9 + $0x204] sm:$0x1]  ;;  %v10364_v31 = vcombine.low %v2591_v27, %v2601_v30  ;;  %v2619_v50 = vor.u32 %v2618_v25, %v2614_v10  ;;  %v2626_v16 = vshrl.u32 %v340_v0, 16 }
  0xfd   : > { %v3268_v43 = vpop.f32.mrf.mxu1  ;;  %11456 = vst [vmem:[#allocation81_spill] sm:$0xff] %v10361_v1  ;;  %v2642_v12 = vshll.u32 %v342_v44, 16  ;;  %v10373_v30 = vcombine.low %v343_v46, %v344_v58  ;;  %v2638_v23 = vrot.slane %v2636_v29, 4  ;;  %v2615_v6 = vsel %vm9680_vm2, %v2610_v2, %v2614_v10 }
  0xfe   : > { %11455 = vst [vmem:[#allocation80_spill] sm:$0xff] %v10354_v18  ;;  %11457 = vst [vmem:[#allocation82_spill] sm:$0xff] %v10364_v31  ;;  %v10366_v7 = vadd.f32 %v3268_v43, %v863_v39  ;;  %v8714_v18 = vpop.f32.mrf.mxu0  ;;  %8809 = vmatmul.mubr.bf16.gmra.mxu0 %v10361_v1  ;;  %8949 = vmatmul.mubr.bf16.gmra.mxu1 %v10364_v31  ;;  %v2620_v57 = vrot.slane %v2619_v50, 4  ;;  %v2634_v39 = vrot.slane %v2632_v40, 5  ;;  %v2628_v59 = vrot.slane %v2626_v16, 4 }
  0xff   : > { %v8858_v51 = vpop.f32.mrf.mxu1  ;;  %11460 = vst [vmem:[#allocation85_spill] sm:$0xff] %v10373_v30  ;;  %v2644_v0 = vrot.slane %v2642_v12, 5  ;;  %8812 = vmatprep.mubr.bf16.mxu0 %v10373_v30  ;;  %v2647_v44 = vshrl.u32 %v343_v46, 16  ;;  %v2650_v29 = vshll.u32 %v343_v46, 16  ;;  %v345_v16 = vld [vmem:[%s9651_s9 + $0x210] sm:$0xf] }
 0x100   : > { %11458 = vst [vmem:[#allocation83_spill] sm:$0xff] %v10366_v7  ;;  %v10371_v15 = vadd.f32 %v8858_v51, %v8714_v18  ;;  %v876_v27 = vpop.f32.mrf.mxu0  ;;  %v2625_v45 = vsel %vm9680_vm2, %v2620_v57, %v2624_v35  ;;  %v2629_v50 = vor.u32 %v2628_v59, %v2624_v35  ;;  %v2639_v51 = vor.u32 %v2638_v23, %v2634_v39  ;;  %v346_v57 = vld [vmem:[%s9651_s9 + $0x214] sm:$0xf] }
 0x101   : > { %v3281_v43 = vpop.f32.mrf.mxu1  ;;  %v2649_v10 = vrot.slane %v2647_v44, 4  ;;  %v2656_v2 = vshll.u32 %v344_v58, 16  ;;  %v2652_v31 = vrot.slane %v2650_v29, 5  ;;  %v2660_v30 = vshrl.u32 %v344_v58, 16 }
 0x102   : > { %11459 = vst [vmem:[#allocation84_spill] sm:$0xff] %v10371_v15  ;;  %v10378_v25 = vadd.f32 %v3281_v43, %v876_v27  ;;  %v8715_v18 = vpop.f32.mrf.mxu0  ;;  %v10384_v15 = vcombine.low %v2615_v6, %v2625_v45  ;;  %v2630_v27 = vrot.slane %v2629_v50, 4  ;;  %v2640_v43 = vrot.slane %v2639_v51, 4  ;;  %v347_v51 = vld [vmem:[%s9651_s9 + $0x218] sm:$0x1] }
 0x103   : > { %v8859_v40 = vpop.f32.mrf.mxu1  ;;  %v2658_v46 = vrot.slane %v2656_v2, 5  ;;  %v2666_v23 = vshll.u32 %v345_v16, 16  ;;  %v10392_v6 = vcombine.low %v345_v16, %v346_v57  ;;  %v2662_v45 = vrot.slane %v2660_v30, 4 }
 0x104   : > { %11461 = vst [vmem:[#allocation86_spill] sm:$0xff] %v10378_v25  ;;  %11462 = vst [vmem:[#allocation87_spill] sm:$0xff] %v10384_v15  ;;  %v10386_v7 = vadd.f32 %v8859_v40, %v8715_v18  ;;  %v879_v12 = vpop.f32.mrf.mxu0  ;;  %8952 = vmatprep.mubr.bf16.mxu1 %v10384_v15  ;;  %v2635_v18 = vsel %vm9680_vm2, %v2630_v27, %v2634_v39  ;;  %v2645_v44 = vsel %vm9680_vm2, %v2640_v43, %v2644_v0  ;;  %v348_v43 = vld [vmem:[%s9651_s9 + $0x21c] sm:$0xf] }
 0x105   : > { %v3284_v25 = vpop.f32.mrf.mxu1  ;;  %11465 = vst [vmem:[#allocation90_spill] sm:$0xff] %v10392_v6  ;;  %v2653_v50 = vor.u32 %v2652_v31, %v2649_v10  ;;  %v10399_v40 = vcombine.low %v2635_v18, %v2645_v44  ;;  %v2676_v29 = vshll.u32 %v346_v57, 16  ;;  %v2670_v27 = vshrl.u32 %v345_v16, 16  ;;  %v349_v44 = vld [vmem:[%s9651_s9 + $0x220] sm:$0xf] }
 0x106   : > { %11463 = vst [vmem:[#allocation88_spill] sm:$0xff] %v10386_v7  ;;  %v10390_v35 = vadd.f32 %v3284_v25, %v879_v12  ;;  %v8718_v59 = vpop.f32.mrf.mxu0  ;;  %v2668_v25 = vrot.slane %v2666_v23, 5  ;;  %8813 = vmatmul.mubr.bf16.gmra.mxu0 %v10392_v6  ;;  %v2680_v12 = vshrl.u32 %v346_v57, 16  ;;  %v2663_v7 = vor.u32 %v2662_v45, %v2658_v46 }
 0x107   : > { %v8862_v58 = vpop.f32.mrf.mxu1  ;;  %11466 = vst [vmem:[#allocation91_spill] sm:$0xff] %v10399_v40  ;;  %8953 = vmatmul.mubr.bf16.gmra.mxu1 %v10399_v40  ;;  %v2678_v31 = vrot.slane %v2676_v29, 5  ;;  %v2686_v10 = vshll.u32 %v347_v51, 16  ;;  %v10411_v16 = vcombine.low %v348_v43, %v349_v44  ;;  %v2691_v51 = vshrl.u32 %v348_v43, 16 }
 0x108   : > { %11464 = vst [vmem:[#allocation89_spill] sm:$0xff] %v10390_v35  ;;  %v892_v2 = vpop.f32.mrf.mxu0  ;;  %v2654_v35 = vrot.slane %v2653_v50, 4  ;;  %v10402_v39 = vadd.f32 %v8862_v58, %v8718_v59  ;;  %v2682_v30 = vrot.slane %v2680_v12, 4  ;;  %v2664_v50 = vrot.slane %v2663_v7, 4 }
 0x109   : > { %v3297_v0 = vpop.f32.mrf.mxu1  ;;  %v2672_v59 = vrot.slane %v2670_v27, 4  ;;  %11469 = vst [vmem:[#allocation94_spill] sm:$0xff] %v10411_v16  ;;  %8816 = vmatprep.mubr.bf16.mxu0 %v10411_v16  ;;  %v2700_v7 = vshll.u32 %v349_v44, 16  ;;  %v351_v27 = vld [vmem:[%s9651_s9 + $0x228] sm:$0xf] }
 0x10a   : > { %11467 = vst [vmem:[#allocation92_spill] sm:$0xff] %v10402_v39  ;;  %v10406_v18 = vadd.f32 %v3297_v0, %v892_v2  ;;  %v8719_v23 = vpop.f32.mrf.mxu0  ;;  %v2659_v57 = vsel %vm9680_vm2, %v2654_v35, %v2658_v46  ;;  %v2683_v58 = vor.u32 %v2682_v30, %v2678_v31  ;;  %v2688_v39 = vrot.slane %v2686_v10, 5  ;;  %v350_v46 = vld [vmem:[%s9651_s9 + $0x224] sm:$0xf]  ;;  %v353_v16 = vld [vmem:[%s9651_s9 + $0x230] sm:$0xf] }
 0x10b   : > { %v8863_v45 = vpop.f32.mrf.mxu1  ;;  %v2669_v12 = vsel %vm9680_vm2, %v2664_v50, %v2668_v25  ;;  %v2673_v2 = vor.u32 %v2672_v59, %v2668_v25  ;;  %v2694_v35 = vshll.u32 %v348_v43, 16  ;;  %v2693_v10 = vrot.slane %v2691_v51, 4 }
 0x10c   : > { %11468 = vst [vmem:[#allocation93_spill] sm:$0xff] %v10406_v18  ;;  %v10413_v40 = vadd.f32 %v8863_v45, %v8719_v23  ;;  %v895_v29 = vpop.f32.mrf.mxu0  ;;  %v10420_v18 = vcombine.low %v2659_v57, %v2669_v12  ;;  %v2684_v6 = vrot.slane %v2683_v58, 4  ;;  %v2702_v15 = vrot.slane %v2700_v7, 5 }
 0x10d   : > { %v3300_v0 = vpop.f32.mrf.mxu1  ;;  %v2674_v45 = vrot.slane %v2673_v2, 4  ;;  %v2704_v50 = vshrl.u32 %v349_v44, 16  ;;  %v2710_v59 = vshll.u32 %v350_v46, 16  ;;  %v10427_v57 = vcombine.low %v350_v46, %v351_v27  ;;  %v352_v44 = vld [vmem:[%s9651_s9 + $0x22c] sm:$0x1] }
 0x10e   : > { %11470 = vst [vmem:[#allocation95_spill] sm:$0xff] %v10413_v40  ;;  %11471 = vst [vmem:[#allocation96_spill] sm:$0xff] %v10420_v18  ;;  %v10422_v30 = vadd.f32 %v3300_v0, %v895_v29  ;;  %v8722_v23 = vpop.f32.mrf.mxu0  ;;  %v2696_v40 = vrot.slane %v2694_v35, 5  ;;  %8956 = vmatprep.mubr.bf16.mxu1 %v10420_v18  ;;  %v2689_v43 = vsel %vm9680_vm2, %v2684_v6, %v2688_v39  ;;  %v2720_v58 = vshll.u32 %v351_v27, 16 }
 0x10f   : > { %v8866_v25 = vpop.f32.mrf.mxu1  ;;  %11473 = vst [vmem:[#allocation98_spill] sm:$0xff] %v10427_v57  ;;  %v2679_v51 = vsel %vm9680_vm2, %v2674_v45, %v2678_v31  ;;  %v2706_v12 = vrot.slane %v2704_v50, 4  ;;  %v2724_v0 = vshrl.u32 %v351_v27, 16  ;;  %8817 = vmatmul.mubr.bf16.gmra.mxu0 %v10427_v57  ;;  %v2714_v31 = vshrl.u32 %v350_v46, 16 }
 0x110   : > { %11472 = vst [vmem:[#allocation97_spill] sm:$0xff] %v10422_v30  ;;  %v908_v29 = vpop.f32.mrf.mxu0  ;;  %v2697_v2 = vor.u32 %v2696_v40, %v2693_v10  ;;  %v10432_v7 = vcombine.low %v2679_v51, %v2689_v43  ;;  %v2712_v30 = vrot.slane %v2710_v59, 5  ;;  %v2722_v6 = vrot.slane %v2720_v58, 5  ;;  %v354_v40 = vld [vmem:[%s9651_s9 + $0x234] sm:$0xf] }
 0x111   : > { %v3313_v35 = vpop.f32.mrf.mxu1  ;;  %v10435_v39 = vadd.f32 %v8866_v25, %v8722_v23  ;;  %v2707_v56 = vor.u32 %v2706_v12, %v2702_v15  ;;  %v2726_v34 = vrot.slane %v2724_v0, 4  ;;  %v2730_v27 = vshll.u32 %v352_v44, 16 }
 0x112   : > { %11474 = vst [vmem:[#allocation99_spill] sm:$0xff] %v10432_v7  ;;  %v8723_v18 = vpop.f32.mrf.mxu0  ;;  %v2698_v1 = vrot.slane %v2697_v2, 4  ;;  %8957 = vmatmul.mubr.bf16.gmra.mxu1 %v10432_v7  ;;  %v10440_v10 = vadd.f32 %v3313_v35, %v908_v29  ;;  %v10444_v59 = vcombine.low %v353_v16, %v354_v40  ;;  %v2716_v58 = vrot.slane %v2714_v31, 4 }
 0x113   : > { %11475 = vst [vmem:[#allocation100_spill] sm:$0xff] %v10435_v39  ;;  %v8867_v45 = vpop.f32.mrf.mxu1  ;;  %v2708_v25 = vrot.slane %v2707_v56, 4  ;;  %v2727_v51 = vor.u32 %v2726_v34, %v2722_v6  ;;  %v2732_v12 = vrot.slane %v2730_v27, 5  ;;  %v2735_v29 = vshrl.u32 %v353_v16, 16 }
 0x114   : > { %11476 = vst [vmem:[#allocation101_spill] sm:$0xff] %v10440_v10  ;;  %v10442_v50 = vadd.f32 %v8867_v45, %v8723_v18  ;;  %v911_v43 = vpop.f32.mrf.mxu0  ;;  %11478 = vst [vmem:[#allocation103_spill] sm:$0xff] %v10444_v59  ;;  %v2703_v23 = vsel %vm9680_vm2, %v2698_v1, %v2702_v15  ;;  %8820 = vmatprep.mubr.bf16.mxu0 %v10444_v59  ;;  %v2738_v0 = vshll.u32 %v353_v16, 16  ;;  %v355_v18 = vld [vmem:[%s9651_s9 + $0x238] sm:$0xf]  ;;  %v2744_v15 = vshll.u32 %v354_v40, 16 }
 0x115   : > { %v3316_v46 = vpop.f32.mrf.mxu1  ;;  %v2713_v35 = vsel %vm9680_vm2, %v2708_v25, %v2712_v30  ;;  %v2717_v45 = vor.u32 %v2716_v58, %v2712_v30  ;;  %v2737_v34 = vrot.slane %v2735_v29, 4  ;;  %v2748_v27 = vshrl.u32 %v354_v40, 16 }
 0x116   : > { %11477 = vst [vmem:[#allocation102_spill] sm:$0xff] %v10442_v50  ;;  %v10448_v2 = vadd.f32 %v3316_v46, %v911_v43  ;;  %v8726_v44 = vpop.f32.mrf.mxu0  ;;  %v2728_v50 = vrot.slane %v2727_v51, 4  ;;  %v10454_v1 = vcombine.low %v2703_v23, %v2713_v35  ;;  %v2740_v31 = vrot.slane %v2738_v0, 5  ;;  %v356_v43 = vld [vmem:[%s9651_s9 + $0x23c] sm:$0xf] }
 0x117   : > { %v8870_v56 = vpop.f32.mrf.mxu1  ;;  %v2746_v39 = vrot.slane %v2744_v15, 5  ;;  %v2754_v10 = vshll.u32 %v355_v18, 16  ;;  %v2750_v30 = vrot.slane %v2748_v27, 4  ;;  %v2758_v58 = vshrl.u32 %v355_v18, 16  ;;  %v357_v51 = vld [vmem:[%s9651_s9 + $0x240] sm:$0x1] }
 0x118   : > { %11479 = vst [vmem:[#allocation104_spill] sm:$0xff] %v10448_v2  ;;  %11480 = vst [vmem:[#allocation105_spill] sm:$0xff] %v10454_v1  ;;  %v924_v46 = vpop.f32.mrf.mxu0  ;;  %v2718_v2 = vrot.slane %v2717_v45, 4  ;;  %v2733_v16 = vsel %vm9680_vm2, %v2728_v50, %v2732_v12  ;;  %8960 = vmatprep.mubr.bf16.mxu1 %v10454_v1  ;;  %v2741_v25 = vor.u32 %v2740_v31, %v2737_v34  ;;  %v2764_v35 = vshll.u32 %v356_v43, 16 }
 0x119   : > { %v3329_v7 = vpop.f32.mrf.mxu1  ;;  %v10460_v23 = vcombine.low %v355_v18, %v356_v43  ;;  %v2756_v0 = vrot.slane %v2754_v10, 5  ;;  %v2768_v45 = vshrl.u32 %v356_v43, 16  ;;  %v2751_v1 = vor.u32 %v2750_v30, %v2746_v39  ;;  %v358_v10 = vld [vmem:[%s9651_s9 + $0x244] sm:$0xf] }
 0x11a   : > { %v8727_v29 = vpop.f32.mrf.mxu0  ;;  %v2723_v40 = vsel %vm9680_vm2, %v2718_v2, %v2722_v6  ;;  %v2742_v15 = vrot.slane %v2741_v25, 4  ;;  %v2760_v27 = vrot.slane %v2758_v58, 4  ;;  %v2766_v34 = vrot.slane %v2764_v35, 5  ;;  %v359_v58 = vld [vmem:[%s9651_s9 + $0x248] sm:$0xf] }
 0x11b   : > { %11481 = vst [vmem:[#allocation106_spill] sm:$0xff] %v10460_v23  ;;  %v8871_v50 = vpop.f32.mrf.mxu1  ;;  %v10465_v12 = vcombine.low %v2723_v40, %v2733_v16  ;;  %8821 = vmatmul.mubr.bf16.gmra.mxu0 %v10460_v23  ;;  %v2770_v31 = vrot.slane %v2768_v45, 4  ;;  %v10468_v59 = vadd.f32 %v8870_v56, %v8726_v44  ;;  %v2774_v6 = vshll.u32 %v357_v51, 16  ;;  %v360_v56 = vld [vmem:[%s9651_s9 + $0x24c] sm:$0xf] }
 0x11c   : > { %v927_v18 = vpop.f32.mrf.mxu0  ;;  %v2747_v43 = vsel %vm9680_vm2, %v2742_v15, %v2746_v39  ;;  %v2752_v16 = vrot.slane %v2751_v1, 4  ;;  %v2761_v25 = vor.u32 %v2760_v27, %v2756_v0  ;;  %v10474_v30 = vadd.f32 %v3329_v7, %v924_v46 }
 0x11d   : > { %11482 = vst [vmem:[#allocation107_spill] sm:$0xff] %v10465_v12  ;;  %11483 = vst [vmem:[#allocation108_spill] sm:$0xff] %v10468_v59  ;;  %v3332_v2 = vpop.f32.mrf.mxu1  ;;  %8961 = vmatmul.mubr.bf16.gmra.mxu1 %v10465_v12  ;;  %v2771_v23 = vor.u32 %v2770_v31, %v2766_v34  ;;  %v2776_v35 = vrot.slane %v2774_v6, 5  ;;  %v10477_v45 = vadd.f32 %v8871_v50, %v8727_v29  ;;  %v2779_v39 = vshrl.u32 %v358_v10, 16  ;;  %v361_v6 = vld [vmem:[%s9651_s9 + $0x250] sm:$0xf] }
 0x11e   : > { %11484 = vst [vmem:[#allocation109_spill] sm:$0xff] %v10474_v30  ;;  %v8730_v40 = vpop.f32.mrf.mxu0  ;;  %v10479_v44 = vadd.f32 %v3332_v2, %v927_v18  ;;  %v2757_v51 = vsel %vm9680_vm2, %v2752_v16, %v2756_v0  ;;  %v2762_v59 = vrot.slane %v2761_v25, 4  ;;  %v10484_v12 = vcombine.low %v358_v10, %v359_v58 }
 0x11f   : > { %11485 = vst [vmem:[#allocation110_spill] sm:$0xff] %v10477_v45  ;;  %v8874_v1 = vpop.f32.mrf.mxu1  ;;  %v10486_v46 = vcombine.low %v2747_v43, %v2757_v51  ;;  %v2772_v15 = vrot.slane %v2771_v23, 4  ;;  %v2782_v27 = vshll.u32 %v358_v10, 16  ;;  %v2788_v29 = vshll.u32 %v359_v58, 16  ;;  %v362_v51 = vld [vmem:[%s9651_s9 + $0x254] sm:$0x1] }
 0x120   : > { %11486 = vst [vmem:[#allocation111_spill] sm:$0xff] %v10479_v44  ;;  %11487 = vst [vmem:[#allocation112_spill] sm:$0xff] %v10484_v12  ;;  %v940_v7 = vpop.f32.mrf.mxu0  ;;  %v2767_v50 = vsel %vm9680_vm2, %v2762_v59, %v2766_v34  ;;  %8824 = vmatprep.mubr.bf16.mxu0 %v10484_v12  ;;  %v2781_v18 = vrot.slane %v2779_v39, 4  ;;  %v2792_v31 = vshrl.u32 %v359_v58, 16  ;;  %v2798_v0 = vshll.u32 %v360_v56, 16 }
 0x121   : > { %11488 = vst [vmem:[#allocation113_spill] sm:$0xff] %v10486_v46  ;;  %v3345_v2 = vpop.f32.mrf.mxu1  ;;  %8964 = vmatprep.mubr.bf16.mxu1 %v10486_v46  ;;  %v2777_v43 = vsel %vm9680_vm2, %v2772_v15, %v2776_v35  ;;  %v2784_v23 = vrot.slane %v2782_v27, 5  ;;  %v2790_v25 = vrot.slane %v2788_v29, 5  ;;  %v2802_v10 = vshrl.u32 %v360_v56, 16 }
 0x122   : > { %v8731_v16 = vpop.f32.mrf.mxu0  ;;  %v10496_v44 = vcombine.low %v2767_v50, %v2777_v43  ;;  %v2794_v59 = vrot.slane %v2792_v31, 4  ;;  %v2800_v34 = vrot.slane %v2798_v0, 5  ;;  %v10498_v39 = vcombine.low %v360_v56, %v361_v6  ;;  %v363_v56 = vld [vmem:[%s9651_s9 + $0x258] sm:$0xf] }
 0x123   : > { %v8875_v58 = vpop.f32.mrf.mxu1  ;;  %v2785_v30 = vor.u32 %v2784_v23, %v2781_v18  ;;  %v2804_v12 = vrot.slane %v2802_v10, 4  ;;  %v2808_v46 = vshll.u32 %v361_v6, 16  ;;  %v2812_v57 = vshrl.u32 %v361_v6, 16  ;;  %v364_v10 = vld [vmem:[%s9651_s9 + $0x25c] sm:$0xf] }
 0x124   : > { %11489 = vst [vmem:[#allocation114_spill] sm:$0xff] %v10496_v44  ;;  %11490 = vst [vmem:[#allocation115_spill] sm:$0xff] %v10498_v39  ;;  %v943_v45 = vpop.f32.mrf.mxu0  ;;  %v2795_v35 = vor.u32 %v2794_v59, %v2790_v25  ;;  %8825 = vmatmul.mubr.bf16.gmra.mxu0 %v10498_v39  ;;  %v10502_v15 = vadd.f32 %v8874_v1, %v8730_v40  ;;  %v2818_v27 = vshll.u32 %v362_v51, 16 }
 0x125   : > { %8965 = vmatmul.mubr.bf16.gmra.mxu1 %v10496_v44  ;;  %v10504_v29 = vadd.f32 %v3345_v2, %v940_v7  ;;  %v3348_v50 = vpop.f32.mrf.mxu1  ;;  %v2786_v0 = vrot.slane %v2785_v30, 4  ;;  %v2805_v18 = vor.u32 %v2804_v12, %v2800_v34  ;;  %v2810_v43 = vrot.slane %v2808_v46, 5  ;;  %v365_v12 = vld [vmem:[%s9651_s9 + $0x260] sm:$0xf] }
 0x126   : > { %11491 = vst [vmem:[#allocation116_spill] sm:$0xff] %v10502_v15  ;;  %v8734_v31 = vpop.f32.mrf.mxu0  ;;  %v2814_v23 = vrot.slane %v2812_v57, 4  ;;  %v2796_v6 = vrot.slane %v2795_v35, 4  ;;  %v2820_v62 = vrot.slane %v2818_v27, 5  ;;  %v10508_v44 = vadd.f32 %v8875_v58, %v8731_v16 }
 0x127   : > { %11492 = vst [vmem:[#allocation117_spill] sm:$0xff] %v10504_v29  ;;  %v10510_v59 = vadd.f32 %v3348_v50, %v943_v45  ;;  %v8878_v40 = vpop.f32.mrf.mxu1  ;;  %v2791_v7 = vsel %vm9680_vm2, %v2786_v0, %v2790_v25  ;;  %v2806_v2 = vrot.slane %v2805_v18, 4  ;;  %v10514_v15 = vcombine.low %v363_v56, %v364_v10  ;;  %v366_v0 = vld [vmem:[%s9651_s9 + $0x264] sm:$0xf] }
 0x128   : > { %11493 = vst [vmem:[#allocation118_spill] sm:$0xff] %v10508_v44  ;;  %v956_v1 = vpop.f32.mrf.mxu0  ;;  %v2815_v51 = vor.u32 %v2814_v23, %v2810_v43  ;;  %v2801_v57 = vsel %vm9680_vm2, %v2796_v6, %v2800_v34  ;;  %v2823_v30 = vshrl.u32 %v363_v56, 16  ;;  %v2826_v46 = vshll.u32 %v363_v56, 16 }
 0x129   : > { %11494 = vst [vmem:[#allocation119_spill] sm:$0xff] %v10510_v59  ;;  %11495 = vst [vmem:[#allocation120_spill] sm:$0xff] %v10514_v15  ;;  %v2832_v16 = vshll.u32 %v364_v10, 16  ;;  %v3361_v58 = vpop.f32.mrf.mxu1  ;;  %v10519_v35 = vcombine.low %v2791_v7, %v2801_v57  ;;  %v2811_v27 = vsel %vm9680_vm2, %v2806_v2, %v2810_v43  ;;  %8828 = vmatprep.mubr.bf16.mxu0 %v10514_v15  ;;  %v2836_v50 = vshrl.u32 %v364_v10, 16  ;;  %v367_v2 = vld [vmem:[%s9651_s9 + $0x268] sm:$0x1] }
 0x12a   : > { %v8735_v45 = vpop.f32.mrf.mxu0  ;;  %v2816_v25 = vrot.slane %v2815_v51, 4  ;;  %v2825_v18 = vrot.slane %v2823_v30, 4  ;;  %v2828_v23 = vrot.slane %v2826_v46, 5  ;;  %v2842_v34 = vshll.u32 %v365_v12, 16 }
 0x12b   : > { %11496 = vst [vmem:[#allocation121_spill] sm:$0xff] %v10519_v35  ;;  %v2834_v59 = vrot.slane %v2832_v16, 5  ;;  %v8879_v6 = vpop.f32.mrf.mxu1  ;;  %8968 = vmatprep.mubr.bf16.mxu1 %v10519_v35  ;;  %v2838_v57 = vrot.slane %v2836_v50, 4  ;;  %v2846_v44 = vshrl.u32 %v365_v12, 16  ;;  %v10528_v43 = vcombine.low %v365_v12, %v366_v0 }
 0x12c   : > { %v959_v56 = vpop.f32.mrf.mxu0  ;;  %v2821_v7 = vsel %vm9680_vm2, %v2816_v25, %v2820_v62  ;;  %v2829_v10 = vor.u32 %v2828_v23, %v2825_v18  ;;  %v2844_v30 = vrot.slane %v2842_v34, 5  ;;  %v2852_v46 = vshll.u32 %v366_v0, 16  ;;  %v368_v18 = vld [vmem:[%s9651_s9 + $0x26c] sm:$0xf] }
 0x12d   : > { %11497 = vst [vmem:[#allocation122_spill] sm:$0xff] %v10528_v43  ;;  %v10531_v51 = vcombine.low %v2811_v27, %v2821_v7  ;;  %v3364_v16 = vpop.f32.mrf.mxu1  ;;  %v2839_v15 = vor.u32 %v2838_v57, %v2834_v59  ;;  %v2848_v39 = vrot.slane %v2846_v44, 4  ;;  %8829 = vmatmul.mubr.bf16.gmra.mxu0 %v10528_v43  ;;  %v2856_v35 = vshrl.u32 %v366_v0, 16  ;;  %v369_v44 = vld [vmem:[%s9651_s9 + $0x270] sm:$0xf] }
 0x12e   : > { %v8738_v29 = vpop.f32.mrf.mxu0  ;;  %v10534_v62 = vadd.f32 %v8878_v40, %v8734_v31  ;;  %v2830_v12 = vrot.slane %v2829_v10, 4  ;;  %v2854_v27 = vrot.slane %v2852_v46, 5  ;;  %v2862_v25 = vshll.u32 %v367_v2, 16 }
 0x12f   : > { %11498 = vst [vmem:[#allocation123_spill] sm:$0xff] %v10531_v51  ;;  %8969 = vmatmul.mubr.bf16.gmra.mxu1 %v10531_v51  ;;  %v10537_v50 = vadd.f32 %v3361_v58, %v956_v1  ;;  %v2840_v34 = vrot.slane %v2839_v15, 4  ;;  %v2849_v7 = vor.u32 %v2848_v39, %v2844_v30  ;;  %v2858_v57 = vrot.slane %v2856_v35, 4  ;;  %v8882_v43 = vpop.f32.mrf.mxu1  ;;  %v370_v1 = vld [vmem:[%s9651_s9 + $0x274] sm:$0xf] }
 0x130   : > { %11499 = vst [vmem:[#allocation124_spill] sm:$0xff] %v10534_v62  ;;  %v972_v23 = vpop.f32.mrf.mxu0  ;;  %v10540_v19 = vadd.f32 %v8879_v6, %v8735_v45  ;;  %v2835_v31 = vsel %vm9680_vm2, %v2830_v12, %v2834_v59  ;;  %v2864_v40 = vrot.slane %v2862_v25, 5  ;;  %v10545_v0 = vadd.f32 %v3364_v16, %v959_v56  ;;  %v371_v16 = vld [vmem:[%s9651_s9 + $0x278] sm:$0xf]  ;;  %v372_v62 = vld [vmem:[%s9651_s9 + $0x27c] sm:$0x1] }
 0x131   : > { %11500 = vst [vmem:[#allocation125_spill] sm:$0xff] %v10537_v50  ;;  %v10547_v10 = vcombine.low %v368_v18, %v369_v44  ;;  %v2845_v15 = vsel %vm9680_vm2, %v2840_v34, %v2844_v30  ;;  %v2850_v39 = vrot.slane %v2849_v7, 4  ;;  %v2859_v35 = vor.u32 %v2858_v57, %v2854_v27  ;;  %v3377_v6 = vpop.f32.mrf.mxu1 }
 0x132   : > { %11501 = vst [vmem:[#allocation126_spill] sm:$0xff] %v10540_v19  ;;  %11502 = vst [vmem:[#allocation127_spill] sm:$0xff] %v10545_v0  ;;  %v8739_v58 = vpop.f32.mrf.mxu0  ;;  %v2867_v45 = vshrl.u32 %v368_v18, 16  ;;  %v10552_v2 = vcombine.low %v2835_v31, %v2845_v15  ;;  %v2870_v59 = vshll.u32 %v368_v18, 16  ;;  %v2876_v46 = vshll.u32 %v369_v44, 16 }
 0x133   : > { %11503 = vst [vmem:[#allocation128_spill] sm:$0xff] %v10547_v10  ;;  %8832 = vmatprep.mubr.bf16.mxu0 %v10547_v10  ;;  %v2880_v56 = vshrl.u32 %v369_v44, 16  ;;  %v2855_v25 = vsel %vm9680_vm2, %v2850_v39, %v2854_v27  ;;  %v2860_v0 = vrot.slane %v2859_v35, 4  ;;  %v2886_v30 = vshll.u32 %v370_v1, 16  ;;  %v8883_v34 = vpop.f32.mrf.mxu1 }
 0x134   : > { %11504 = vst [vmem:[#allocation129_spill] sm:$0xff] %v10552_v2  ;;  %v975_v12 = vpop.f32.mrf.mxu0  ;;  %v2869_v19 = vrot.slane %v2867_v45, 4  ;;  %8972 = vmatprep.mubr.bf16.mxu1 %v10552_v2  ;;  %v2872_v7 = vrot.slane %v2870_v59, 5  ;;  %v2878_v57 = vrot.slane %v2876_v46, 5  ;;  %v2890_v15 = vshrl.u32 %v370_v1, 16 }
 0x135   : > { %v2882_v31 = vrot.slane %v2880_v56, 4  ;;  %v2865_v18 = vsel %vm9680_vm2, %v2860_v0, %v2864_v40  ;;  %v2888_v44 = vrot.slane %v2886_v30, 5  ;;  %v10562_v51 = vcombine.low %v370_v1, %v371_v16  ;;  %v3380_v27 = vpop.f32.mrf.mxu1 }
 0x136   : > { %v8742_v50 = vpop.f32.mrf.mxu0  ;;  %v2896_v10 = vshll.u32 %v371_v16, 16  ;;  %v10564_v39 = vcombine.low %v2855_v25, %v2865_v18  ;;  %v2873_v35 = vor.u32 %v2872_v7, %v2869_v19  ;;  %v2892_v17 = vrot.slane %v2890_v15, 4 }
 0x137   : > { %v2883_v45 = vor.u32 %v2882_v31, %v2878_v57  ;;  %8833 = vmatmul.mubr.bf16.gmra.mxu0 %v10562_v51  ;;  %v2900_v46 = vshrl.u32 %v371_v16, 16  ;;  %v10567_v56 = vadd.f32 %v8882_v43, %v8738_v29  ;;  %v2906_v22 = vshll.u32 %v372_v62, 16  ;;  %v8886_v48 = vpop.f32.mrf.mxu1 }
 0x138   : > { %v988_v2 = vpop.f32.mrf.mxu0  ;;  %v2898_v59 = vrot.slane %v2896_v10, 5  ;;  %8973 = vmatmul.mubr.bf16.gmra.mxu1 %v10564_v39  ;;  %v2874_v40 = vrot.slane %v2873_v35, 4  ;;  %v2893_v1 = vor.u32 %v2892_v17, %v2888_v44  ;;  %v10570_v30 = vadd.f32 %v3377_v6, %v972_v23  ;;  %8996 = vmatprep.mubr.bf16.mxu0 %v9696_v54 }
 0x139   : > { %v2884_v0 = vrot.slane %v2883_v45, 4  ;;  %v2902_v25 = vrot.slane %v2900_v46, 4  ;;  %v10573_v7 = vadd.f32 %v8883_v34, %v8739_v58  ;;  %v10575_v31 = vadd.f32 %v3380_v27, %v975_v12  ;;  %v3393_v10 = vpop.f32.mrf.mxu1 }
 0x13a   : > { %v8743_v19 = vpop.f32.mrf.mxu0  ;;  %v2879_v29 = vsel %vm9680_vm2, %v2874_v40, %v2878_v57  ;;  %v2894_v62 = vrot.slane %v2893_v1, 4  ;;  %v10581_v16 = vadd.f32 %v8886_v48, %v8742_v50  ;;  %v2908_v6 = vrot.slane %v2906_v22, 5 }
 0x13b   : > { %v2889_v43 = vsel %vm9680_vm2, %v2884_v0, %v2888_v44  ;;  %v2903_v54 = vor.u32 %v2902_v25, %v2898_v59  ;;  %v10585_v15 = vadd.f32 %v3393_v10, %v988_v2  ;;  %v8887_v58 = vpop.f32.mrf.mxu1 }
 0x13c   : > { %v991_v17 = vpop.f32.mrf.mxu0  ;;  %v10583_v23 = vcombine.low %v2879_v29, %v2889_v43  ;;  %v10587_v12 = vadd.f32 %v8887_v58, %v8743_v19  ;;  %v2899_v57 = vsel %vm9680_vm2, %v2894_v62, %v2898_v59 }
 0x13d   : > { %v2904_v18 = vrot.slane %v2903_v54, 4  ;;  %v3396_v44 = vpop.f32.mrf.mxu1 }
 0x13e   : > { %v8746_v34 = vpop.f32.mrf.mxu0  ;;  %8976 = vmatprep.mubr.bf16.mxu1 %v10583_v23  ;;  %v10592_v48 = vadd.f32 %v3396_v44, %v991_v17 }
 0x13f   : > { %v2909_v27 = vsel %vm9680_vm2, %v2904_v18, %v2908_v6  ;;  %8997 = vmatmul.mubr.bf16.vlgmr.msra.gmra.mxu0 %v9707_v5  ;;  %v8890_v22 = vpop.f32.mrf.mxu1 }
 0x140   : > { %v1004_v50 = vpop.f32.mrf.mxu0  ;;  %v10597_v2 = vcombine.low %v2899_v57, %v2909_v27  ;;  %9000 = vmatprep.mubr.bf16.mxu0 %v9719_v26  ;;  %v10600_v35 = vadd.f32 %v8890_v22, %v8746_v34 }
 0x141   : > { %v3409_v46 = vpop.f32.mrf.mxu1 }
 0x142   : > { %v8747_v45 = vpop.f32.mrf.mxu0  ;;  %8977 = vmatmul.mubr.bf16.gmra.mxu1 %v10597_v2  ;;  %v10603_v59 = vadd.f32 %v3409_v46, %v1004_v50 }
 0x143   : > { %9140 = vmatprep.mubr.bf16.mxu1 %v9735_v13  ;;  %v8891_v0 = vpop.f32.mrf.mxu1 }
 0x144   : > { %v1007_v40 = vpop.f32.mrf.mxu0  ;;  %v10606_v1 = vadd.f32 %v8891_v0, %v8747_v45 }
 0x145   : > { %v3412_v19 = vpop.f32.mrf.mxu1 }
 0x146   : > { %v8750_v5 = vpop.f32.mrf.mxu0  ;;  %v10608_v25 = vadd.f32 %v3412_v19, %v1007_v40 }
 0x147   : > { %9001 = vmatmul.mubr.bf16.gmra.mxu0 %v9743_v52  ;;  %v8894_v26 = vpop.f32.mrf.mxu1 }
 0x148   : > { %v1020_v10 = vpop.f32.mrf.mxu0  ;;  %9004 = vmatprep.mubr.bf16.mxu0 %v9755_v4  ;;  %v10612_v29 = vadd.f32 %v8894_v26, %v8750_v5 }
 0x149   : > { %v3425_v62 = vpop.f32.mrf.mxu1 }
 0x14a   : > { %v8751_v43 = vpop.f32.mrf.mxu0  ;;  %9141 = vmatmul.mubr.bf16.vlgmr.msra.gmra.mxu1 %v9753_v61  ;;  %v10615_v13 = vadd.f32 %v3425_v62, %v1020_v10 }
 0x14b   : > { %9144 = vmatprep.mubr.bf16.mxu1 %v9772_v20  ;;  %v8895_v54 = vpop.f32.mrf.mxu1 }
 0x14c   : > { %v1023_v17 = vpop.f32.mrf.mxu0  ;;  %v10618_v6 = vadd.f32 %v8895_v54, %v8751_v43 }
 0x14d   : > { %v3428_v34 = vpop.f32.mrf.mxu1 }
 0x14e   : > { %v8754_v58 = vpop.f32.mrf.mxu0  ;;  %v10620_v52 = vadd.f32 %v3428_v34, %v1023_v17 }
 0x14f   : > { %9005 = vmatmul.mubr.bf16.gmra.mxu0 %v9776_v32  ;;  %v8898_v18 = vpop.f32.mrf.mxu1 }
 0x150   : > { %v1036_v57 = vpop.f32.mrf.mxu0  ;;  %9008 = vmatprep.mubr.bf16.mxu0 %v9792_v53  ;;  %v10625_v61 = vadd.f32 %v8898_v18, %v8754_v58 }
 0x151   : > { %v3441_v20 = vpop.f32.mrf.mxu1 }
 0x152   : > { %v8755_v4 = vpop.f32.mrf.mxu0  ;;  %9145 = vmatmul.mubr.bf16.gmra.mxu1 %v9789_v42  ;;  %11505 = vst [vmem:[#allocation130_spill] sm:$0xff] %v10625_v61  ;;  %v10628_v50 = vadd.f32 %v3441_v20, %v1036_v57 }
 0x153   : > { %9148 = vmatprep.mubr.bf16.mxu1 %v9803_v3  ;;  %v8899_v22 = vpop.f32.mrf.mxu1 }
 0x154   : > { %v1039_v44 = vpop.f32.mrf.mxu0  ;;  %v10630_v45 = vadd.f32 %v8899_v22, %v8755_v4 }
 0x155   : > { %v3444_v32 = vpop.f32.mrf.mxu1 }
 0x156   : > { %v8758_v27 = vpop.f32.mrf.mxu0  ;;  %11506 = vst [vmem:[#allocation131_spill] sm:$0xff] %v10630_v45  ;;  %v10633_v53 = vadd.f32 %v3444_v32, %v1039_v44  ;;  %v11693_v45 = vld [vmem:[#allocation128_spill] sm:$0xff] }
 0x157   : > { %9009 = vmatmul.mubr.bf16.gmra.mxu0 %v9806_v14  ;;  %v8902_v40 = vpop.f32.mrf.mxu1 }
 0x158   : > { %v1052_v46 = vpop.f32.mrf.mxu0  ;;  %11507 = vst [vmem:[#allocation132_spill] sm:$0xff] %v10633_v53  ;;  %9012 = vmatprep.mubr.bf16.mxu0 %v9817_v37  ;;  %v10637_v3 = vadd.f32 %v8902_v40, %v8758_v27 }
 0x159   : > { %v3457_v5 = vpop.f32.mrf.mxu1 }
 0x15a   : > { %v8759_v42 = vpop.f32.mrf.mxu0  ;;  %9149 = vmatmul.mubr.bf16.gmra.mxu1 %v9815_v28  ;;  %11508 = vst [vmem:[#allocation133_spill] sm:$0xff] %v10637_v3  ;;  %v10640_v19 = vadd.f32 %v3457_v5, %v1052_v46 }
 0x15b   : > { %9152 = vmatprep.mubr.bf16.mxu1 %v9828_v55  ;;  %v8903_v26 = vpop.f32.mrf.mxu1 }
 0x15c   : > { %v1055_v0 = vpop.f32.mrf.mxu0  ;;  %11509 = vst [vmem:[#allocation134_spill] sm:$0xff] %v10640_v19  ;;  %v10642_v14 = vadd.f32 %v8903_v26, %v8759_v42 }
 0x15d   : > { %v3460_v37 = vpop.f32.mrf.mxu1 }
 0x15e   : > { %v8762_v10 = vpop.f32.mrf.mxu0  ;;  %11510 = vst [vmem:[#allocation135_spill] sm:$0xff] %v10642_v14  ;;  %v10645_v62 = vadd.f32 %v3460_v37, %v1055_v0  ;;  %v11690_v14 = vld [vmem:[#allocation121_spill] sm:$0xff] }
 0x15f   : > { %9013 = vmatmul.mubr.bf16.gmra.mxu0 %v9830_v63 }
 0x160   : > { %v1068_v43 = vpop.f32.mrf.mxu0  ;;  %11511 = vst [vmem:[#allocation136_spill] sm:$0xff] %v10645_v62  ;;  %9016 = vmatprep.mubr.bf16.mxu0 %v9845_v24 }
 0x161   : > { %v8906_v17 = vpop.f32.mrf.mxu1 }
 0x162   : > { %v8763_v28 = vpop.f32.mrf.mxu0  ;;  %9153 = vmatmul.mubr.bf16.gmra.mxu1 %v9839_v9  ;;  %v10650_v54 = vadd.f32 %v8906_v17, %v8762_v10  ;;  %v11522_v17 = vld [vmem:[#allocation10_spill] sm:$0xff] }
 0x163   : > { %9156 = vmatprep.mubr.bf16.mxu1 %v9853_v41  ;;  %v3473_v58 = vpop.f32.mrf.mxu1 }
 0x164   : > { %v1071_v55 = vpop.f32.mrf.mxu0  ;;  %11512 = vst [vmem:[#allocation137_spill] sm:$0xff] %v10650_v54  ;;  %v10652_v57 = vadd.f32 %v3473_v58, %v1068_v43  ;;  %v11524_v58 = vld [vmem:[#allocation12_spill] sm:$0xff] }
 0x165   : > { %v8907_v4 = vpop.f32.mrf.mxu1 }
 0x166   : > { %v8766_v34 = vpop.f32.mrf.mxu0  ;;  %11513 = vst [vmem:[#allocation138_spill] sm:$0xff] %v10652_v57  ;;  %v10655_v18 = vadd.f32 %v8907_v4, %v8763_v28  ;;  %v11526_v4 = vld [vmem:[#allocation11_spill] sm:$0xff]  ;;  %v11688_v57 = vld [vmem:[#allocation100_spill] sm:$0xff] }
 0x167   : > { %9017 = vmatmul.mubr.bf16.gmra.mxu0 %v9856_v49  ;;  %v3476_v24 = vpop.f32.mrf.mxu1 }
 0x168   : > { %v1084_v63 = vpop.f32.mrf.mxu0  ;;  %11514 = vst [vmem:[#allocation139_spill] sm:$0xff] %v10655_v18  ;;  %9020 = vmatprep.mubr.bf16.mxu0 %v9871_v21  ;;  %v10658_v44 = vadd.f32 %v3476_v24, %v1071_v55  ;;  %v11527_v24 = vld [vmem:[#allocation13_spill] sm:$0xff] }
 0x169   : > { %v8910_v41 = vpop.f32.mrf.mxu1 }
 0x16a   : > { %v8767_v9 = vpop.f32.mrf.mxu0  ;;  %11515 = vst [vmem:[#allocation140_spill] sm:$0xff] %v10658_v44  ;;  %9157 = vmatmul.mubr.bf16.gmra.mxu1 %v9865_v8  ;;  %v10662_v27 = vadd.f32 %v8910_v41, %v8766_v34  ;;  %v11677_v44 = vld [vmem:[#allocation112_spill] sm:$0xff] }
 0x16b   : > { %9160 = vmatprep.mubr.bf16.mxu1 %v9881_v33  ;;  %v3489_v22 = vpop.f32.mrf.mxu1 }
 0x16c   : > { %v1087_v20 = vpop.f32.mrf.mxu0  ;;  %11516 = vst [vmem:[#allocation141_spill] sm:$0xff] %v10662_v27  ;;  %v10664_v32 = vadd.f32 %v3489_v22, %v1084_v63 }
 0x16d   : > { %v8911_v49 = vpop.f32.mrf.mxu1 }
 0x16e   : > { %v8770_v46 = vpop.f32.mrf.mxu0  ;;  %11517 = vst [vmem:[#allocation142_spill] sm:$0xff] %v10664_v32  ;;  %v10667_v21 = vadd.f32 %v8911_v49, %v8767_v9 }
 0x16f   : > { %9021 = vmatmul.mubr.bf16.gmra.mxu0 %v9887_v47  ;;  %v3492_v40 = vpop.f32.mrf.mxu1 }
 0x170   : > { %v1100_v42 = vpop.f32.mrf.mxu0  ;;  %11518 = vst [vmem:[#allocation143_spill] sm:$0xff] %v10667_v21  ;;  %9024 = vmatprep.mubr.bf16.mxu0 %v9899_v11  ;;  %v10670_v0 = vadd.f32 %v3492_v40, %v1087_v20 }
 0x171   : > { %v8914_v33 = vpop.f32.mrf.mxu1 }
 0x172   : > { %v8771_v8 = vpop.f32.mrf.mxu0  ;;  %11519 = vst [vmem:[#allocation144_spill] sm:$0xff] %v10670_v0  ;;  %9161 = vmatmul.mubr.bf16.gmra.mxu1 %v9895_v60  ;;  %v10674_v10 = vadd.f32 %v8914_v33, %v8770_v46  ;;  %v11532_v33 = vld [vmem:[#allocation16_spill] sm:$0xff] }
 0x173   : > { %9164 = vmatprep.mubr.bf16.mxu1 %v9909_v38  ;;  %v3505_v26 = vpop.f32.mrf.mxu1 }
 0x174   : > { %v1103_v5 = vpop.f32.mrf.mxu0  ;;  %11520 = vst [vmem:[#allocation145_spill] sm:$0xff] %v10674_v10  ;;  %v10676_v37 = vadd.f32 %v3505_v26, %v1100_v42  ;;  %v11530_v42 = vld [vmem:[#allocation14_spill] sm:$0xff]  ;;  %v11671_v10 = vld [vmem:[#allocation84_spill] sm:$0xff] }
 0x175   : > { %v8915_v47 = vpop.f32.mrf.mxu1 }
 0x176   : > { %v8774_v43 = vpop.f32.mrf.mxu0  ;;  %11521 = vst [vmem:[#allocation146_spill] sm:$0xff] %v10676_v37  ;;  %v10679_v11 = vadd.f32 %v8915_v47, %v8771_v8  ;;  %v11534_v47 = vld [vmem:[#allocation15_spill] sm:$0xff] }
 0x177   : > { %9025 = vmatmul.mubr.bf16.gmra.mxu0 %v11522_v17  ;;  %v3508_v55 = vpop.f32.mrf.mxu1  ;;  %v11535_v17 = vld [vmem:[#allocation17_spill] sm:$0xff] }
 0x178   : > { %v1116_v28 = vpop.f32.mrf.mxu0  ;;  %11523 = vst [vmem:[#allocation10_spill] sm:$0xff] %v10679_v11  ;;  %9028 = vmatprep.mubr.bf16.mxu0 %v11524_v58  ;;  %v10682_v34 = vadd.f32 %v3508_v55, %v1103_v5  ;;  %v11668_v11 = vld [vmem:[#allocation98_spill] sm:$0xff] }
 0x179   : > { %v8918_v38 = vpop.f32.mrf.mxu1 }
 0x17a   : > { %v8775_v60 = vpop.f32.mrf.mxu0  ;;  %11525 = vst [vmem:[#allocation12_spill] sm:$0xff] %v10682_v34  ;;  %9165 = vmatmul.mubr.bf16.gmra.mxu1 %v11526_v4  ;;  %v10686_v9 = vadd.f32 %v8918_v38, %v8774_v43 }
 0x17b   : > { %9168 = vmatprep.mubr.bf16.mxu1 %v11527_v24  ;;  %v3521_v41 = vpop.f32.mrf.mxu1  ;;  %v11537_v24 = vld [vmem:[#allocation18_spill] sm:$0xff] }
 0x17c   : > { %v1119_v63 = vpop.f32.mrf.mxu0  ;;  %11528 = vst [vmem:[#allocation11_spill] sm:$0xff] %v10686_v9  ;;  %v10688_v22 = vadd.f32 %v3521_v41, %v1116_v28 }
 0x17d   : > { %v8919_v46 = vpop.f32.mrf.mxu1 }
 0x17e   : > { %v8778_v20 = vpop.f32.mrf.mxu0  ;;  %11529 = vst [vmem:[#allocation13_spill] sm:$0xff] %v10688_v22  ;;  %v10691_v40 = vadd.f32 %v8919_v46, %v8775_v60  ;;  %v11539_v46 = vld [vmem:[#allocation20_spill] sm:$0xff] }
 0x17f   : > { %9029 = vmatmul.mubr.bf16.gmra.mxu0 %v11530_v42  ;;  %v3524_v8 = vpop.f32.mrf.mxu1 }
 0x180   : > { %v1132_v49 = vpop.f32.mrf.mxu0  ;;  %11531 = vst [vmem:[#allocation14_spill] sm:$0xff] %v10691_v40  ;;  %9032 = vmatprep.mubr.bf16.mxu0 %v11532_v33  ;;  %v10694_v26 = vadd.f32 %v3524_v8, %v1119_v63  ;;  %v11541_v8 = vld [vmem:[#allocation19_spill] sm:$0xff] }
 0x181   : > { %v8922_v55 = vpop.f32.mrf.mxu1 }
 0x182   : > { %v8779_v5 = vpop.f32.mrf.mxu0  ;;  %11533 = vst [vmem:[#allocation16_spill] sm:$0xff] %v10694_v26  ;;  %9169 = vmatmul.mubr.bf16.gmra.mxu1 %v11534_v47  ;;  %v10698_v58 = vadd.f32 %v8922_v55, %v8778_v20 }
 0x183   : > { %9172 = vmatprep.mubr.bf16.mxu1 %v11535_v17  ;;  %v3537_v4 = vpop.f32.mrf.mxu1  ;;  %v11542_v17 = vld [vmem:[#allocation21_spill] sm:$0xff] }
 0x184   : > { %v1135_v43 = vpop.f32.mrf.mxu0  ;;  %11536 = vst [vmem:[#allocation15_spill] sm:$0xff] %v10698_v58  ;;  %v10701_v60 = vadd.f32 %v3537_v4, %v1132_v49 }
 0x185   : > { %v8923_v41 = vpop.f32.mrf.mxu1 }
 0x186   : > { %v8782_v28 = vpop.f32.mrf.mxu0  ;;  %11538 = vst [vmem:[#allocation17_spill] sm:$0xff] %v10701_v60  ;;  %v10704_v42 = vadd.f32 %v8923_v41, %v8779_v5  ;;  %v11547_v41 = vld [vmem:[#allocation24_spill] sm:$0xff]  ;;  %v11549_v60 = vld [vmem:[#allocation23_spill] sm:$0xff] }
 0x187   : > { %9033 = vmatmul.mubr.bf16.gmra.mxu0 %v11537_v24  ;;  %v3540_v33 = vpop.f32.mrf.mxu1  ;;  %v11545_v24 = vld [vmem:[#allocation22_spill] sm:$0xff] }
 0x188   : > { %v1148_v38 = vpop.f32.mrf.mxu0  ;;  %9036 = vmatprep.mubr.bf16.mxu0 %v11539_v46  ;;  %11540 = vst [vmem:[#allocation18_spill] sm:$0xff] %v10704_v42  ;;  %v10708_v20 = vadd.f32 %v3540_v33, %v1135_v43 }
 0x189   : > { %v8926_v55 = vpop.f32.mrf.mxu1 }
 0x18a   : > { %v8783_v63 = vpop.f32.mrf.mxu0  ;;  %9173 = vmatmul.mubr.bf16.gmra.mxu1 %v11541_v8  ;;  %11543 = vst [vmem:[#allocation20_spill] sm:$0xff] %v10708_v20  ;;  %v10710_v26 = vadd.f32 %v8926_v55, %v8782_v28 }
 0x18b   : > { %9176 = vmatprep.mubr.bf16.mxu1 %v11542_v17  ;;  %v3553_v49 = vpop.f32.mrf.mxu1  ;;  %v11550_v17 = vld [vmem:[#allocation25_spill] sm:$0xff] }
 0x18c   : > { %v1151_v47 = vpop.f32.mrf.mxu0  ;;  %11544 = vst [vmem:[#allocation19_spill] sm:$0xff] %v10710_v26  ;;  %v10713_v46 = vadd.f32 %v3553_v49, %v1148_v38  ;;  %v11553_v49 = vld [vmem:[#allocation26_spill] sm:$0xff] }
 0x18d   : > { %v8927_v5 = vpop.f32.mrf.mxu1 }
 0x18e   : > { %v8786_v58 = vpop.f32.mrf.mxu0  ;;  %11546 = vst [vmem:[#allocation21_spill] sm:$0xff] %v10713_v46  ;;  %v10716_v42 = vadd.f32 %v8927_v5, %v8783_v63  ;;  %v11555_v63 = vld [vmem:[#allocation28_spill] sm:$0xff] }
 0x18f   : > { %9037 = vmatmul.mubr.bf16.gmra.mxu0 %v11545_v24  ;;  %v3556_v43 = vpop.f32.mrf.mxu1 }
 0x190   : > { %v1164_v4 = vpop.f32.mrf.mxu0  ;;  %9040 = vmatprep.mubr.bf16.mxu0 %v11547_v41  ;;  %11548 = vst [vmem:[#allocation22_spill] sm:$0xff] %v10716_v42  ;;  %v10720_v28 = vadd.f32 %v3556_v43, %v1151_v47  ;;  %v11556_v42 = vld [vmem:[#allocation27_spill] sm:$0xff]  ;;  %v11558_v43 = vld [vmem:[#allocation29_spill] sm:$0xff] }
 0x192   : > { %v8787_v8 = vpop.f32.mrf.mxu0  ;;  %9177 = vmatmul.mubr.bf16.gmra.mxu1 %v11549_v60  ;;  %11551 = vst [vmem:[#allocation24_spill] sm:$0xff] %v10720_v28  ;;  %v8930_v26 = vpop.f32.mrf.mxu1  ;;  %v11563_v28 = vld [vmem:[#allocation32_spill] sm:$0xff] }
 0x193   : > { %9180 = vmatprep.mubr.bf16.mxu1 %v11550_v17  ;;  %v10722_v20 = vadd.f32 %v8930_v26, %v8786_v58 }
 0x194   : > { %v1167_v33 = vpop.f32.mrf.mxu0  ;;  %v3569_v24 = vpop.f32.mrf.mxu1 }
 0x195   : > { %11552 = vst [vmem:[#allocation23_spill] sm:$0xff] %v10722_v20  ;;  %v10725_v41 = vadd.f32 %v3569_v24, %v1164_v4  ;;  %v11561_v24 = vld [vmem:[#allocation30_spill] sm:$0xff] }
 0x196   : > { %v8790_v55 = vpop.f32.mrf.mxu0  ;;  %v8931_v60 = vpop.f32.mrf.mxu1 }
 0x197   : > { %9041 = vmatmul.mubr.bf16.gmra.mxu0 %v11553_v49  ;;  %11554 = vst [vmem:[#allocation25_spill] sm:$0xff] %v10725_v41  ;;  %v10729_v46 = vadd.f32 %v8931_v60, %v8787_v8  ;;  %v11564_v60 = vld [vmem:[#allocation31_spill] sm:$0xff] }
 0x198   : > { %v1180_v38 = vpop.f32.mrf.mxu0  ;;  %9044 = vmatprep.mubr.bf16.mxu0 %v11555_v63  ;;  %v3572_v17 = vpop.f32.mrf.mxu1 }
 0x199   : > { %11557 = vst [vmem:[#allocation26_spill] sm:$0xff] %v10729_v46  ;;  %v10732_v26 = vadd.f32 %v3572_v17, %v1167_v33  ;;  %v11566_v17 = vld [vmem:[#allocation33_spill] sm:$0xff]  ;;  %v11571_v46 = vld [vmem:[#allocation36_spill] sm:$0xff] }
 0x19a   : > { %v8791_v5 = vpop.f32.mrf.mxu0  ;;  %9181 = vmatmul.mubr.bf16.gmra.mxu1 %v11556_v42  ;;  %v8934_v20 = vpop.f32.mrf.mxu1 }
 0x19b   : > { %9184 = vmatprep.mubr.bf16.mxu1 %v11558_v43  ;;  %11559 = vst [vmem:[#allocation28_spill] sm:$0xff] %v10732_v26  ;;  %v10734_v49 = vadd.f32 %v8934_v20, %v8790_v55 }
 0x19c   : > { %v1183_v47 = vpop.f32.mrf.mxu0  ;;  %v3585_v63 = vpop.f32.mrf.mxu1 }
 0x19d   : > { %11560 = vst [vmem:[#allocation27_spill] sm:$0xff] %v10734_v49  ;;  %v10737_v41 = vadd.f32 %v3585_v63, %v1180_v38  ;;  %v11569_v63 = vld [vmem:[#allocation34_spill] sm:$0xff] }
 0x19e   : > { %v8794_v58 = vpop.f32.mrf.mxu0  ;;  %v8935_v8 = vpop.f32.mrf.mxu1 }
 0x19f   : > { %9045 = vmatmul.mubr.bf16.gmra.mxu0 %v11561_v24  ;;  %11562 = vst [vmem:[#allocation29_spill] sm:$0xff] %v10737_v41  ;;  %v10741_v43 = vadd.f32 %v8935_v8, %v8791_v5 }
 0x1a0   : > { %v1196_v4 = vpop.f32.mrf.mxu0  ;;  %9048 = vmatprep.mubr.bf16.mxu0 %v11563_v28  ;;  %v3588_v26 = vpop.f32.mrf.mxu1 }
 0x1a1   : > { %11565 = vst [vmem:[#allocation30_spill] sm:$0xff] %v10741_v43  ;;  %v10744_v20 = vadd.f32 %v3588_v26, %v1183_v47  ;;  %v11574_v26 = vld [vmem:[#allocation37_spill] sm:$0xff]  ;;  %v11579_v43 = vld [vmem:[#allocation40_spill] sm:$0xff] }
 0x1a2   : > { %v8795_v42 = vpop.f32.mrf.mxu0  ;;  %9185 = vmatmul.mubr.bf16.gmra.mxu1 %v11564_v60  ;;  %v8938_v49 = vpop.f32.mrf.mxu1  ;;  %v11572_v60 = vld [vmem:[#allocation35_spill] sm:$0xff] }
 0x1a3   : > { %9188 = vmatprep.mubr.bf16.mxu1 %v11566_v17  ;;  %11567 = vst [vmem:[#allocation32_spill] sm:$0xff] %v10744_v20  ;;  %v10746_v24 = vadd.f32 %v8938_v49, %v8794_v58 }
 0x1a4   : > { %v1199_v33 = vpop.f32.mrf.mxu0  ;;  %v3601_v28 = vpop.f32.mrf.mxu1 }
 0x1a5   : > { %11568 = vst [vmem:[#allocation31_spill] sm:$0xff] %v10746_v24  ;;  %v10749_v41 = vadd.f32 %v3601_v28, %v1196_v4  ;;  %v11577_v28 = vld [vmem:[#allocation38_spill] sm:$0xff] }
 0x1a6   : > { %v8798_v55 = vpop.f32.mrf.mxu0  ;;  %v8939_v8 = vpop.f32.mrf.mxu1 }
 0x1a7   : > { %9049 = vmatmul.mubr.bf16.gmra.mxu0 %v11569_v63  ;;  %11570 = vst [vmem:[#allocation33_spill] sm:$0xff] %v10749_v41  ;;  %v10753_v17 = vadd.f32 %v8939_v8, %v8795_v42 }
 0x1a8   : > { %v1212_v38 = vpop.f32.mrf.mxu0  ;;  %9052 = vmatprep.mubr.bf16.mxu0 %v11571_v46  ;;  %v3604_v20 = vpop.f32.mrf.mxu1 }
 0x1a9   : > { %11573 = vst [vmem:[#allocation34_spill] sm:$0xff] %v10753_v17  ;;  %v10756_v58 = vadd.f32 %v3604_v20, %v1199_v33  ;;  %v11582_v20 = vld [vmem:[#allocation41_spill] sm:$0xff]  ;;  %v11584_v17 = vld [vmem:[#allocation42_spill] sm:$0xff] }
 0x1aa   : > { %v8799_v5 = vpop.f32.mrf.mxu0  ;;  %9189 = vmatmul.mubr.bf16.gmra.mxu1 %v11572_v60  ;;  %v8942_v24 = vpop.f32.mrf.mxu1  ;;  %v11580_v60 = vld [vmem:[#allocation39_spill] sm:$0xff] }
 0x1ab   : > { %9192 = vmatprep.mubr.bf16.mxu1 %v11574_v26  ;;  %11575 = vst [vmem:[#allocation36_spill] sm:$0xff] %v10756_v58  ;;  %v10758_v63 = vadd.f32 %v8942_v24, %v8798_v55 }
 0x1ac   : > { %v1215_v47 = vpop.f32.mrf.mxu0  ;;  %v3617_v46 = vpop.f32.mrf.mxu1 }
 0x1ad   : > { %11576 = vst [vmem:[#allocation35_spill] sm:$0xff] %v10758_v63  ;;  %v10761_v41 = vadd.f32 %v3617_v46, %v1212_v38 }
 0x1ae   : > { %v8802_v49 = vpop.f32.mrf.mxu0  ;;  %v8943_v8 = vpop.f32.mrf.mxu1 }
 0x1af   : > { %9053 = vmatmul.mubr.bf16.gmra.mxu0 %v11577_v28  ;;  %11578 = vst [vmem:[#allocation37_spill] sm:$0xff] %v10761_v41  ;;  %v10765_v26 = vadd.f32 %v8943_v8, %v8799_v5 }
 0x1b0   : > { %v1228_v4 = vpop.f32.mrf.mxu0  ;;  %9056 = vmatprep.mubr.bf16.mxu0 %v11579_v43  ;;  %v3620_v58 = vpop.f32.mrf.mxu1  ;;  %v11586_v43 = vld [vmem:[#allocation44_spill] sm:$0xff] }
 0x1b1   : > { %11581 = vst [vmem:[#allocation38_spill] sm:$0xff] %v10765_v26  ;;  %v10768_v55 = vadd.f32 %v3620_v58, %v1215_v47 }
 0x1b2   : > { %v8803_v42 = vpop.f32.mrf.mxu0  ;;  %9193 = vmatmul.mubr.bf16.gmra.mxu1 %v11580_v60  ;;  %v11587_v60 = vld [vmem:[#allocation43_spill] sm:$0xff] }
 0x1b3   : > { %9196 = vmatprep.mubr.bf16.mxu1 %v11582_v20  ;;  %11583 = vst [vmem:[#allocation40_spill] sm:$0xff] %v10768_v55  ;;  %v8946_v28 = vpop.f32.mrf.mxu1  ;;  %v11589_v20 = vld [vmem:[#allocation45_spill] sm:$0xff] }
 0x1b4   : > { %v1231_v33 = vpop.f32.mrf.mxu0  ;;  %v10771_v38 = vadd.f32 %v8946_v28, %v8802_v49  ;;  %v11592_v49 = vld [vmem:[#allocation46_spill] sm:$0xff] }
 0x1b5   : > { %v3633_v41 = vpop.f32.mrf.mxu1 }
 0x1b6   : > { %v8806_v24 = vpop.f32.mrf.mxu0  ;;  %11585 = vst [vmem:[#allocation39_spill] sm:$0xff] %v10771_v38  ;;  %v10775_v5 = vadd.f32 %v3633_v41, %v1228_v4  ;;  %v11594_v38 = vld [vmem:[#allocation48_spill] sm:$0xff] }
 0x1b7   : > { %9057 = vmatmul.mubr.bf16.gmra.mxu0 %v11584_v17  ;;  %v8947_v47 = vpop.f32.mrf.mxu1 }
 0x1b8   : > { %v1244_v63 = vpop.f32.mrf.mxu0  ;;  %9060 = vmatprep.mubr.bf16.mxu0 %v11586_v43  ;;  %11588 = vst [vmem:[#allocation41_spill] sm:$0xff] %v10775_v5  ;;  %v10778_v58 = vadd.f32 %v8947_v47, %v8803_v42  ;;  %v11597_v42 = vld [vmem:[#allocation49_spill] sm:$0xff] }
 0x1b9   : > { %v3636_v55 = vpop.f32.mrf.mxu1 }
 0x1ba   : > { %v8807_v46 = vpop.f32.mrf.mxu0  ;;  %9197 = vmatmul.mubr.bf16.gmra.mxu1 %v11587_v60  ;;  %11590 = vst [vmem:[#allocation42_spill] sm:$0xff] %v10778_v58  ;;  %v10780_v40 = vadd.f32 %v3636_v55, %v1231_v33  ;;  %v11595_v60 = vld [vmem:[#allocation47_spill] sm:$0xff] }
 0x1bb   : > { %9200 = vmatprep.mubr.bf16.mxu1 %v11589_v20 }
 0x1bc   : > { %v1247_v8 = vpop.f32.mrf.mxu0  ;;  %11591 = vst [vmem:[#allocation44_spill] sm:$0xff] %v10780_v40 }
 0x1be   : > { %v8810_v26 = vpop.f32.mrf.mxu0  ;;  %v8950_v17 = vpop.f32.mrf.mxu1 }
 0x1bf   : > { %9061 = vmatmul.mubr.bf16.gmra.mxu0 %v11592_v49  ;;  %v10783_v43 = vadd.f32 %v8950_v17, %v8806_v24  ;;  %v11600_v24 = vld [vmem:[#allocation50_spill] sm:$0xff] }
 0x1c0   : > { %v1260_v28 = vpop.f32.mrf.mxu0  ;;  %9064 = vmatprep.mubr.bf16.mxu0 %v11594_v38  ;;  %v3649_v41 = vpop.f32.mrf.mxu1  ;;  %v11601_v38 = vld [vmem:[#allocation52_spill] sm:$0xff] }
 0x1c1   : > { %11593 = vst [vmem:[#allocation43_spill] sm:$0xff] %v10783_v43  ;;  %v10787_v20 = vadd.f32 %v3649_v41, %v1244_v63  ;;  %v11603_v63 = vld [vmem:[#allocation51_spill] sm:$0xff] }
 0x1c2   : > { %v8811_v4 = vpop.f32.mrf.mxu0  ;;  %9201 = vmatmul.mubr.bf16.gmra.mxu1 %v11595_v60  ;;  %v8951_v47 = vpop.f32.mrf.mxu1 }
 0x1c3   : > { %11596 = vst [vmem:[#allocation45_spill] sm:$0xff] %v10787_v20  ;;  %9204 = vmatprep.mubr.bf16.mxu1 %v11597_v42  ;;  %v10790_v33 = vadd.f32 %v8951_v47, %v8807_v46  ;;  %v11604_v42 = vld [vmem:[#allocation53_spill] sm:$0xff] }
 0x1c4   : > { %v1263_v58 = vpop.f32.mrf.mxu0  ;;  %v3652_v55 = vpop.f32.mrf.mxu1  ;;  %v11611_v20 = vld [vmem:[#allocation57_spill] sm:$0xff] }
 0x1c5   : > { %11598 = vst [vmem:[#allocation46_spill] sm:$0xff] %v10790_v33  ;;  %v10792_v40 = vadd.f32 %v3652_v55, %v1247_v8  ;;  %v11608_v33 = vld [vmem:[#allocation54_spill] sm:$0xff] }
 0x1c6   : > { %v8814_v49 = vpop.f32.mrf.mxu0 }
 0x1c7   : > { %11599 = vst [vmem:[#allocation48_spill] sm:$0xff] %v10792_v40  ;;  %9065 = vmatmul.mubr.bf16.gmra.mxu0 %v11600_v24  ;;  %v8954_v17 = vpop.f32.mrf.mxu1 }
 0x1c8   : > { %9068 = vmatprep.mubr.bf16.mxu0 %v11601_v38  ;;  %v1276_v43 = vpop.f32.mrf.mxu0  ;;  %v10796_v5 = vadd.f32 %v8954_v17, %v8810_v26  ;;  %v11609_v38 = vld [vmem:[#allocation56_spill] sm:$0xff]  ;;  %v11610_v17 = vld [vmem:[#allocation55_spill] sm:$0xff] }
 0x1c9   : > { %v3665_v41 = vpop.f32.mrf.mxu1 }
 0x1ca   : > { %11602 = vst [vmem:[#allocation47_spill] sm:$0xff] %v10796_v5  ;;  %9205 = vmatmul.mubr.bf16.gmra.mxu1 %v11603_v63  ;;  %v8815_v60 = vpop.f32.mrf.mxu0  ;;  %v10800_v46 = vadd.f32 %v3665_v41, %v1260_v28 }
 0x1cb   : > { %9208 = vmatprep.mubr.bf16.mxu1 %v11604_v42  ;;  %v8955_v47 = vpop.f32.mrf.mxu1 }
 0x1cc   : > { %11605 = vst [vmem:[#allocation49_spill] sm:$0xff] %v10800_v46  ;;  %v1279_v8 = vpop.f32.mrf.mxu0  ;;  %v10802_v55 = vadd.f32 %v8955_v47, %v8811_v4 }
 0x1cd   : > { %v3668_v40 = vpop.f32.mrf.mxu1 }
 0x1ce   : > { %11606 = vst [vmem:[#allocation50_spill] sm:$0xff] %v10802_v55  ;;  %v10804_v24 = vadd.f32 %v3668_v40, %v1263_v58  ;;  %v11618_v55 = vld [vmem:[#allocation59_spill] sm:$0xff] }
 0x1cf   : > { %9069 = vmatmul.mubr.bf16.gmra.mxu0 %v11608_v33  ;;  %v8818_v26 = vpop.f32.mrf.mxu0  ;;  %v11615_v33 = vld [vmem:[#allocation58_spill] sm:$0xff] }
 0x1d0   : > { %11607 = vst [vmem:[#allocation52_spill] sm:$0xff] %v10804_v24  ;;  %9072 = vmatprep.mubr.bf16.mxu0 %v11609_v38  ;;  %v11616_v24 = vld [vmem:[#allocation60_spill] sm:$0xff] }
 0x1d1   : > { %v1292_v5 = vpop.f32.mrf.mxu0 }
 0x1d2   : > { %9209 = vmatmul.mubr.bf16.gmra.mxu1 %v11610_v17  ;;  %v8958_v63 = vpop.f32.mrf.mxu1 }
 0x1d3   : > { %9212 = vmatprep.mubr.bf16.mxu1 %v11611_v20  ;;  %v10810_v28 = vadd.f32 %v8958_v63, %v8814_v49  ;;  %v8819_v42 = vpop.f32.mrf.mxu0  ;;  %v11619_v49 = vld [vmem:[#allocation61_spill] sm:$0xff] }
 0x1d4   : > { %v3681_v41 = vpop.f32.mrf.mxu1 }
 0x1d5   : > { %11612 = vst [vmem:[#allocation51_spill] sm:$0xff] %v10810_v28  ;;  %v10812_v4 = vadd.f32 %v3681_v41, %v1276_v43  ;;  %v1295_v40 = vpop.f32.mrf.mxu0 }
 0x1d6   : > { %v8959_v47 = vpop.f32.mrf.mxu1 }
 0x1d7   : > { %11613 = vst [vmem:[#allocation53_spill] sm:$0xff] %v10812_v4  ;;  %v10814_v58 = vadd.f32 %v8959_v47, %v8815_v60  ;;  %9073 = vmatmul.mubr.bf16.gmra.mxu0 %v11615_v33  ;;  %v11622_v47 = vld [vmem:[#allocation62_spill] sm:$0xff] }
 0x1d8   : > { %v3684_v38 = vpop.f32.mrf.mxu1  ;;  %9076 = vmatprep.mubr.bf16.mxu0 %v11616_v24  ;;  %v11623_v24 = vld [vmem:[#allocation64_spill] sm:$0xff] }
 0x1d9   : > { %11614 = vst [vmem:[#allocation54_spill] sm:$0xff] %v10814_v58  ;;  %v10818_v17 = vadd.f32 %v3684_v38, %v1279_v8 }
 0x1da   : > { %9213 = vmatmul.mubr.bf16.gmra.mxu1 %v11618_v55  ;;  %v11625_v55 = vld [vmem:[#allocation63_spill] sm:$0xff] }
 0x1db   : > { %11617 = vst [vmem:[#allocation56_spill] sm:$0xff] %v10818_v17  ;;  %v8822_v20 = vpop.f32.mrf.mxu0  ;;  %9216 = vmatprep.mubr.bf16.mxu1 %v11619_v49  ;;  %v11627_v17 = vld [vmem:[#allocation65_spill] sm:$0xff] }
 0x1dd   : > { %v8962_v63 = vpop.f32.mrf.mxu1  ;;  %v1308_v28 = vpop.f32.mrf.mxu0 }
 0x1de   : > { %v10822_v43 = vadd.f32 %v8962_v63, %v8818_v26 }
 0x1df   : > { %v3697_v41 = vpop.f32.mrf.mxu1  ;;  %v8823_v4 = vpop.f32.mrf.mxu0  ;;  %9077 = vmatmul.mubr.bf16.gmra.mxu0 %v11622_v47 }
 0x1e0   : > { %11620 = vst [vmem:[#allocation55_spill] sm:$0xff] %v10822_v43  ;;  %v10824_v60 = vadd.f32 %v3697_v41, %v1292_v5  ;;  %9080 = vmatprep.mubr.bf16.mxu0 %v11623_v24 }
 0x1e1   : > { %v8963_v33 = vpop.f32.mrf.mxu1  ;;  %v1311_v58 = vpop.f32.mrf.mxu0 }
 0x1e2   : > { %11621 = vst [vmem:[#allocation57_spill] sm:$0xff] %v10824_v60  ;;  %v10828_v8 = vadd.f32 %v8963_v33, %v8819_v42  ;;  %9217 = vmatmul.mubr.bf16.gmra.mxu1 %v11625_v55  ;;  %v11630_v60 = vld [vmem:[#allocation66_spill] sm:$0xff]  ;;  %v11631_v33 = vld [vmem:[#allocation68_spill] sm:$0xff] }
 0x1e3   : > { %v3700_v38 = vpop.f32.mrf.mxu1  ;;  %9220 = vmatprep.mubr.bf16.mxu1 %v11627_v17 }
 0x1e4   : > { %11624 = vst [vmem:[#allocation58_spill] sm:$0xff] %v10828_v8  ;;  %v10831_v49 = vadd.f32 %v3700_v38, %v1295_v40  ;;  %v8826_v63 = vpop.f32.mrf.mxu0  ;;  %v11633_v40 = vld [vmem:[#allocation67_spill] sm:$0xff]  ;;  %v11638_v8 = vld [vmem:[#allocation72_spill] sm:$0xff] }
 0x1e5   : > { %v8966_v26 = vpop.f32.mrf.mxu1 }
 0x1e6   : > { %11626 = vst [vmem:[#allocation60_spill] sm:$0xff] %v10831_v49  ;;  %v10834_v43 = vadd.f32 %v8966_v26, %v8822_v20  ;;  %v1324_v41 = vpop.f32.mrf.mxu0  ;;  %v11635_v20 = vld [vmem:[#allocation69_spill] sm:$0xff] }
 0x1e7   : > { %v3713_v5 = vpop.f32.mrf.mxu1  ;;  %9081 = vmatmul.mubr.bf16.gmra.mxu0 %v11630_v60 }
 0x1e8   : > { %11628 = vst [vmem:[#allocation59_spill] sm:$0xff] %v10834_v43  ;;  %v10836_v47 = vadd.f32 %v3713_v5, %v1308_v28  ;;  %v8827_v42 = vpop.f32.mrf.mxu0  ;;  %9084 = vmatprep.mubr.bf16.mxu0 %v11631_v33  ;;  %v11637_v5 = vld [vmem:[#allocation70_spill] sm:$0xff]  ;;  %v11640_v33 = vld [vmem:[#allocation71_spill] sm:$0xff] }
 0x1e9   : > { %v8967_v24 = vpop.f32.mrf.mxu1 }
 0x1ea   : > { %11629 = vst [vmem:[#allocation61_spill] sm:$0xff] %v10836_v47  ;;  %v10840_v55 = vadd.f32 %v8967_v24, %v8823_v4  ;;  %9221 = vmatmul.mubr.bf16.gmra.mxu1 %v11633_v40  ;;  %v1327_v17 = vpop.f32.mrf.mxu0 }
 0x1eb   : > { %v3716_v38 = vpop.f32.mrf.mxu1  ;;  %9224 = vmatprep.mubr.bf16.mxu1 %v11635_v20 }
 0x1ec   : > { %11632 = vst [vmem:[#allocation62_spill] sm:$0xff] %v10840_v55  ;;  %v10843_v49 = vadd.f32 %v3716_v38, %v1311_v58  ;;  %v11642_v38 = vld [vmem:[#allocation73_spill] sm:$0xff] }
 0x1ed   : > { %v8830_v26 = vpop.f32.mrf.mxu0  ;;  %v11645_v55 = vld [vmem:[#allocation77_spill] sm:$0xff] }
 0x1ee   : > { %11634 = vst [vmem:[#allocation64_spill] sm:$0xff] %v10843_v49 }
 0x1ef   : > { %v8970_v43 = vpop.f32.mrf.mxu1  ;;  %9085 = vmatmul.mubr.bf16.gmra.mxu0 %v11637_v5  ;;  %v1340_v60 = vpop.f32.mrf.mxu0  ;;  %v11644_v5 = vld [vmem:[#allocation74_spill] sm:$0xff] }
 0x1f0   : > { %v10846_v28 = vadd.f32 %v8970_v43, %v8826_v63  ;;  %9088 = vmatprep.mubr.bf16.mxu0 %v11638_v8 }
 0x1f1   : > { %v3729_v47 = vpop.f32.mrf.mxu1  ;;  %v8831_v24 = vpop.f32.mrf.mxu0 }
 0x1f2   : > { %11636 = vst [vmem:[#allocation63_spill] sm:$0xff] %v10846_v28  ;;  %v10850_v4 = vadd.f32 %v3729_v47, %v1324_v41  ;;  %9225 = vmatmul.mubr.bf16.gmra.mxu1 %v11640_v33  ;;  %v11647_v47 = vld [vmem:[#allocation75_spill] sm:$0xff] }
 0x1f3   : > { %v8971_v40 = vpop.f32.mrf.mxu1  ;;  %9228 = vmatprep.mubr.bf16.mxu1 %v11642_v38  ;;  %v1343_v20 = vpop.f32.mrf.mxu0 }
 0x1f4   : > { %11639 = vst [vmem:[#allocation65_spill] sm:$0xff] %v10850_v4  ;;  %v10853_v58 = vadd.f32 %v8971_v40, %v8827_v42  ;;  %v11649_v40 = vld [vmem:[#allocation78_spill] sm:$0xff] }
 0x1f5   : > { %v3732_v49 = vpop.f32.mrf.mxu1 }
 0x1f6   : > { %11641 = vst [vmem:[#allocation66_spill] sm:$0xff] %v10853_v58  ;;  %v10856_v43 = vadd.f32 %v3732_v49, %v1327_v17 }
 0x1f7   : > { %v8834_v63 = vpop.f32.mrf.mxu0  ;;  %9089 = vmatmul.mubr.bf16.gmra.mxu0 %v11644_v5 }
 0x1f8   : > { %11643 = vst [vmem:[#allocation68_spill] sm:$0xff] %v10856_v43  ;;  %v8974_v28 = vpop.f32.mrf.mxu1  ;;  %9092 = vmatprep.mubr.bf16.mxu0 %v11645_v55  ;;  %v11652_v55 = vld [vmem:[#allocation81_spill] sm:$0xff] }
 0x1f9   : > { %v10860_v8 = vadd.f32 %v8974_v28, %v8830_v26  ;;  %v1356_v41 = vpop.f32.mrf.mxu0  ;;  %v11653_v26 = vld [vmem:[#allocation85_spill] sm:$0xff] }
 0x1fa   : > { %9229 = vmatmul.mubr.bf16.gmra.mxu1 %v11647_v47  ;;  %v3745_v33 = vpop.f32.mrf.mxu1 }
 0x1fb   : > { %11646 = vst [vmem:[#allocation67_spill] sm:$0xff] %v10860_v8  ;;  %v10863_v42 = vadd.f32 %v3745_v33, %v1340_v60  ;;  %9232 = vmatprep.mubr.bf16.mxu1 %v11649_v40  ;;  %v8835_v38 = vpop.f32.mrf.mxu0  ;;  %v11654_v8 = vld [vmem:[#allocation82_spill] sm:$0xff]  ;;  %v11656_v33 = vld [vmem:[#allocation87_spill] sm:$0xff] }
 0x1fc   : > { %v8975_v58 = vpop.f32.mrf.mxu1 }
 0x1fd   : > { %11648 = vst [vmem:[#allocation69_spill] sm:$0xff] %v10863_v42  ;;  %v10866_v49 = vadd.f32 %v8975_v58, %v8831_v24  ;;  %v1359_v17 = vpop.f32.mrf.mxu0  ;;  %v11660_v42 = vld [vmem:[#allocation94_spill] sm:$0xff] }
 0x1fe   : > { %v3748_v43 = vpop.f32.mrf.mxu1 }
 0x1ff   : > { %11650 = vst [vmem:[#allocation70_spill] sm:$0xff] %v10866_v49  ;;  %v10868_v5 = vadd.f32 %v3748_v43, %v1343_v20  ;;  %v8998_v4 = vpop.f32.mrf.mxu0  ;;  %9093 = vmatmul.mubr.bf16.gmra.mxu0 %v11652_v55  ;;  %v11659_v49 = vld [vmem:[#allocation90_spill] sm:$0xff] }
 0x200   : > { %9096 = vmatprep.mubr.bf16.mxu0 %v11653_v26 }
 0x201   : > { %11651 = vst [vmem:[#allocation72_spill] sm:$0xff] %v10868_v5  ;;  %v4271_v28 = vpop.f32.mrf.mxu0 }
 0x202   : > { %v8978_v47 = vpop.f32.mrf.mxu1  ;;  %9233 = vmatmul.mubr.bf16.gmra.mxu1 %v11654_v8 }
 0x203   : > { %v10873_v60 = vadd.f32 %v8978_v47, %v8834_v63  ;;  %9236 = vmatprep.mubr.bf16.mxu1 %v11656_v33  ;;  %v8999_v24 = vpop.f32.mrf.mxu0 }
 0x204   : > { %v3761_v58 = vpop.f32.mrf.mxu1 }
 0x205   : > { %11655 = vst [vmem:[#allocation71_spill] sm:$0xff] %v10873_v60  ;;  %v10876_v40 = vadd.f32 %v3761_v58, %v1356_v41  ;;  %v4274_v20 = vpop.f32.mrf.mxu0  ;;  %v11662_v60 = vld [vmem:[#allocation91_spill] sm:$0xff]  ;;  %v11663_v41 = vld [vmem:[#allocation76_spill] sm:$0xff] }
 0x206   : > { %v8979_v43 = vpop.f32.mrf.mxu1  ;;  %v4912_v33 = vadd.f32 %v8998_v4, %v11663_v41  ;;  %v11664_v58 = vld [vmem:[#allocation79_spill] sm:$0xff] }
 0x207   : > { %11657 = vst [vmem:[#allocation73_spill] sm:$0xff] %v10876_v40  ;;  %v10878_v5 = vadd.f32 %v8979_v43, %v8835_v38  ;;  %v9002_v55 = vpop.f32.mrf.mxu0  ;;  %9097 = vmatmul.mubr.bf16.gmra.mxu0 %v11659_v49  ;;  %v4910_v38 = vadd.f32 %v4271_v28, %v11664_v58  ;;  %v11665_v43 = vld [vmem:[#allocation80_spill] sm:$0xff]  ;;  %v11669_v41 = vld [vmem:[#allocation103_spill] sm:$0xff]  ;;  %v11670_v58 = vld [vmem:[#allocation86_spill] sm:$0xff] }
 0x208   : > { %v3764_v26 = vpop.f32.mrf.mxu1  ;;  %9100 = vmatprep.mubr.bf16.mxu0 %v11660_v42  ;;  %v11666_v40 = vld [vmem:[#allocation96_spill] sm:$0xff]  ;;  %v11667_v42 = vld [vmem:[#allocation83_spill] sm:$0xff]  ;;  %v4916_v37 = vadd.f32 %v9002_v55, %v11671_v10 }
 0x209   : > { %11658 = vst [vmem:[#allocation74_spill] sm:$0xff] %v10878_v5  ;;  %v10882_v8 = vadd.f32 %v3764_v26, %v1359_v17  ;;  %v4287_v63 = vpop.f32.mrf.mxu0  ;;  %v4913_v5 = vadd.f32 %v8999_v24, %v11665_v43  ;;  %v4911_v17 = vadd.f32 %v4274_v20, %v11667_v42  ;;  %v11672_v20 = vld [vmem:[#allocation99_spill] sm:$0xff]  ;;  %v11673_v42 = vld [vmem:[#allocation88_spill] sm:$0xff] }
 0x20a   : > { %v9142_v47 = vpop.f32.mrf.mxu1  ;;  %9237 = vmatmul.mubr.bf16.gmra.mxu1 %v11662_v60 }
 0x20b   : > { %11661 = vst [vmem:[#allocation77_spill] sm:$0xff] %v10882_v8  ;;  %9240 = vmatprep.mubr.bf16.mxu1 %v11666_v40  ;;  %v9003_v49 = vpop.f32.mrf.mxu0  ;;  %v5958_v9 = vadd.f32 %v9142_v47, %v4912_v33  ;;  %v4914_v40 = vadd.f32 %v4287_v63, %v11670_v58  ;;  %v11674_v33 = vld [vmem:[#allocation105_spill] sm:$0xff] }
 0x20c   : > { %v5317_v46 = vpop.f32.mrf.mxu1  ;;  %v4917_v47 = vadd.f32 %v9003_v49, %v11673_v42 }
 0x20d   : > { %v4290_v26 = vpop.f32.mrf.mxu0  ;;  %v5956_v60 = vadd.f32 %v5317_v46, %v4910_v38 }
 0x20e   : > { %v9143_v8 = vpop.f32.mrf.mxu1 }
 0x20f   : > { %v5959_v22 = vadd.f32 %v9143_v8, %v4913_v5  ;;  %v9006_v34 = vpop.f32.mrf.mxu0  ;;  %9101 = vmatmul.mubr.bf16.gmra.mxu0 %v11668_v11  ;;  %v7114_v46 = vmul.f32 %v5956_v60, %v5956_v60 }
 0x210   : > { %v5320_v4 = vpop.f32.mrf.mxu1  ;;  %9104 = vmatprep.mubr.bf16.mxu0 %v11669_v41 }
 0x211   : > { %v8029_v28 = vpack.c.bf16 %v5959_v22, %v5958_v9  ;;  %v5957_v24 = vadd.f32 %v5320_v4, %v4911_v17  ;;  %v4303_v43 = vpop.f32.mrf.mxu0  ;;  %v7116_v17 = vmul.f32 %v5958_v9, %v5958_v9  ;;  %v7117_v49 = vmul.f32 %v5959_v22, %v5959_v22 }
 0x212   : > { %v9146_v0 = vpop.f32.mrf.mxu1  ;;  %9241 = vmatmul.mubr.bf16.gmra.mxu1 %v11672_v20  ;;  %v11675_v20 = vld [vmem:[#allocation89_spill] sm:$0xff] }
 0x213   : > { %8341 = vst [vmem:[%s10900_s11 + $0x8] sm:$0xff] %v8029_v28   ;;  %v8024_v11 = vpack.c.bf16 %v5957_v24, %v5956_v60  ;;  %v6980_v5 = vadd.f32 %v5957_v24, %v5956_v60  ;;  %v7115_v8 = vmul.f32 %v5957_v24, %v5957_v24  ;;  %9244 = vmatprep.mubr.bf16.mxu1 %v11674_v33  ;;  %v9007_v63 = vpop.f32.mrf.mxu0  ;;  %v11676_v33 = vld [vmem:[#allocation106_spill] sm:$0xff] }
 0x214   : > { %v5333_v38 = vpop.f32.mrf.mxu1  ;;  %v4915_v42 = vadd.f32 %v4290_v26, %v11675_v20  ;;  %v5962_v28 = vadd.f32 %v9146_v0, %v4916_v37  ;;  %v10911_v37 = vld [vmem:[%s9651_s9 + $0x280] sm:$0xf] }
 0x215   : > { %8025 = vst [vmem:[%s10900_s11] sm:$0xff] %v8024_v11   ;;  %v6981_v10 = vadd.f32 %v6980_v5, %v5958_v9  ;;  %v7242_v55 = vadd.f32 %v7115_v8, %v7114_v46  ;;  %v5960_v4 = vadd.f32 %v5333_v38, %v4914_v40  ;;  %v4306_v41 = vpop.f32.mrf.mxu0  ;;  %v11679_v38 = vld [vmem:[#allocation93_spill] sm:$0xff] }
 0x216   : > { %v9147_v58 = vpop.f32.mrf.mxu1  ;;  %v4918_v0 = vadd.f32 %v4303_v43, %v11679_v38  ;;  %v11683_v43 = vld [vmem:[#allocation97_spill] sm:$0xff] }
 0x217   : > { %v6982_v21 = vadd.f32 %v6981_v10, %v5959_v22  ;;  %v7243_v27 = vadd.f32 %v7242_v55, %v7116_v17  ;;  %v5963_v60 = vadd.f32 %v9147_v58, %v4917_v47  ;;  %v9010_v24 = vpop.f32.mrf.mxu0  ;;  %9105 = vmatmul.mubr.bf16.gmra.mxu0 %v11676_v33  ;;  %v7118_v40 = vmul.f32 %v5960_v4, %v5960_v4  ;;  %v11678_v22 = vld [vmem:[#allocation107_spill] sm:$0xff]  ;;  %v11680_v17 = vld [vmem:[#allocation92_spill] sm:$0xff] }
 0x218   : > { %v5336_v32 = vpop.f32.mrf.mxu1  ;;  %9108 = vmatprep.mubr.bf16.mxu0 %v11677_v44  ;;  %v4920_v10 = vadd.f32 %v9006_v34, %v11680_v17  ;;  %v11681_v44 = vld [vmem:[#allocation95_spill] sm:$0xff]  ;;  %v4919_v33 = vadd.f32 %v4306_v41, %v11683_v43  ;;  %v10924_v17 = vld [vmem:[%s9651_s9 + $0x288] sm:$0xf] }
 0x219   : > { %v7244_v9 = vadd.f32 %v7243_v27, %v7117_v49  ;;  %v6983_v46 = vadd.f32 %v6982_v21, %v5960_v4  ;;  %v8039_v11 = vpack.c.bf16 %v5963_v60, %v5962_v28  ;;  %v4319_v5 = vpop.f32.mrf.mxu0  ;;  %v5961_v8 = vadd.f32 %v5336_v32, %v4915_v42  ;;  %v11682_v21 = vld [vmem:[#allocation113_spill] sm:$0xff]  ;;  %v10918_v42 = vld [vmem:[%s9651_s9 + $0x284] sm:$0xf] }
 0x21a   : > { %v9150_v26 = vpop.f32.mrf.mxu1  ;;  %9245 = vmatmul.mubr.bf16.gmra.mxu1 %v11678_v22  ;;  %v4921_v27 = vadd.f32 %v9007_v63, %v11681_v44  ;;  %v5176_v41 = vshll.u32 %v10918_v42, 16  ;;  %v7121_v43 = vmul.f32 %v5963_v60, %v5963_v60 }
 0x21b   : > { %v7245_v47 = vadd.f32 %v7244_v9, %v7118_v40  ;;  %8343 = vst [vmem:[%s10900_s11 + $0x18] sm:$0xff] %v8039_v11   ;;  %9248 = vmatprep.mubr.bf16.mxu1 %v11682_v21  ;;  %v9011_v55 = vpop.f32.mrf.mxu0  ;;  %v8034_v49 = vpack.c.bf16 %v5961_v8, %v5960_v4  ;;  %v6984_v32 = vadd.f32 %v6983_v46, %v5961_v8  ;;  %v5167_v9 = vshrl.u32 %v10911_v37, 16 }
 0x21c   : > { %v7119_v58 = vmul.f32 %v5961_v8, %v5961_v8  ;;  %v5349_v20 = vpop.f32.mrf.mxu1  ;;  %v7120_v40 = vmul.f32 %v5962_v28, %v5962_v28  ;;  %v5966_v44 = vadd.f32 %v9150_v26, %v4920_v10  ;;  %v11684_v8 = vld [vmem:[#allocation115_spill] sm:$0xff]  ;;  %v5170_v21 = vshll.u32 %v10911_v37, 16 }
 0x21d   : > { %v4322_v22 = vpop.f32.mrf.mxu0  ;;  %8342 = vst [vmem:[%s10900_s11 + $0x10] sm:$0xff] %v8034_v49   ;;  %v6985_v34 = vadd.f32 %v6984_v32, %v5962_v28  ;;  %v5964_v63 = vadd.f32 %v5349_v20, %v4918_v0  ;;  %v5180_v0 = vshrl.u32 %v10918_v42, 16  ;;  %v10941_v19 = vrot.slane %v5167_v9, 4 }
 0x21e   : > { %v7246_v11 = vadd.f32 %v7245_v47, %v7119_v58  ;;  %v9151_v38 = vpop.f32.mrf.mxu1  ;;  %v11685_v47 = vld [vmem:[#allocation120_spill] sm:$0xff]  ;;  %v5190_v58 = vshrl.u32 %v10924_v17, 16 }
 0x21f   : > { %v5967_v4 = vadd.f32 %v9151_v38, %v4921_v27  ;;  %v10926_v46 = vpop.f32.mrf.mxu0  ;;  %9109 = vmatmul.mubr.bf16.gmra.mxu0 %v11684_v8  ;;  %v6986_v18 = vadd.f32 %v6985_v34, %v5963_v60  ;;  %v5186_v27 = vshll.u32 %v10924_v17, 16  ;;  %v7122_v8 = vmul.f32 %v5964_v63, %v5964_v63  ;;  %v11686_v60 = vld [vmem:[#allocation114_spill] sm:$0xff] }
 0x220   : > { %v7247_v49 = vadd.f32 %v7246_v11, %v7120_v40  ;;  %v5352_v28 = vpop.f32.mrf.mxu1  ;;  %9112 = vmatprep.mubr.bf16.mxu0 %v11685_v47  ;;  %v11687_v40 = vld [vmem:[#allocation101_spill] sm:$0xff] }
 0x221   : > { %v8049_v32 = vpack.c.bf16 %v5967_v4, %v5966_v44  ;;  %v5965_v26 = vadd.f32 %v5352_v28, %v4919_v33  ;;  %v4335_v10 = vpop.f32.mrf.mxu0  ;;  %v6987_v38 = vadd.f32 %v6986_v18, %v5964_v63  ;;  %v4922_v34 = vadd.f32 %v4319_v5, %v11687_v40  ;;  %v11689_v28 = vld [vmem:[#allocation102_spill] sm:$0xff] }
 0x222   : > { %v7248_v20 = vadd.f32 %v7247_v49, %v7121_v43  ;;  %v9154_v54 = vpop.f32.mrf.mxu1  ;;  %9249 = vmatmul.mubr.bf16.gmra.mxu1 %v11686_v60  ;;  %v4924_v33 = vadd.f32 %v9010_v24, %v11688_v57  ;;  %v4925_v62 = vadd.f32 %v9011_v55, %v11689_v28  ;;  %v11691_v60 = vld [vmem:[#allocation104_spill] sm:$0xff]  ;;  %v10947_v40 = vrot.slane %v5180_v0, 4  ;;  %v10950_v57 = vld [vmem:[%s9651_s9 + $0x28c] sm:$0xf] }
 0x223   : > { %8345 = vst [vmem:[%s10900_s11 + $0x28] sm:$0xff] %v8049_v32   ;;  %v8044_v11 = vpack.c.bf16 %v5965_v26, %v5964_v63  ;;  %v7123_v47 = vmul.f32 %v5965_v26, %v5965_v26  ;;  %9252 = vmatprep.mubr.bf16.mxu1 %v11690_v14  ;;  %v9015_v3 = vpop.f32.mrf.mxu0  ;;  %v6988_v18 = vadd.f32 %v6987_v38, %v5965_v26  ;;  %v5172_v32 = vrot.slane %v5170_v21, 5 }
 0x224   : > { %v7249_v43 = vadd.f32 %v7248_v20, %v7122_v8  ;;  %v5365_v49 = vpop.f32.mrf.mxu1  ;;  %v4923_v53 = vadd.f32 %v4322_v22, %v11691_v60  ;;  %v10945_v63 = vrot.slane %v5176_v41, 5  ;;  %v7124_v24 = vmul.f32 %v5966_v44, %v5966_v44  ;;  %v11692_v8 = vld [vmem:[#allocation122_spill] sm:$0xff] }
 0x225   : > { %8344 = vst [vmem:[%s10900_s11 + $0x20] sm:$0xff] %v8044_v11   ;;  %v4338_v5 = vpop.f32.mrf.mxu0  ;;  %v6989_v55 = vadd.f32 %v6988_v18, %v5966_v44  ;;  %v5968_v28 = vadd.f32 %v5365_v49, %v4922_v34  ;;  %v5970_v26 = vadd.f32 %v9154_v54, %v4924_v33  ;;  %v10955_v22 = vrot.slane %v5186_v27, 5  ;;  %v11695_v49 = vld [vmem:[#allocation109_spill] sm:$0xff] }
 0x226   : > { %v7250_v14 = vadd.f32 %v7249_v43, %v7123_v47  ;;  %v9155_v20 = vpop.f32.mrf.mxu1  ;;  %v10957_v21 = vrot.slane %v5190_v58, 4  ;;  %v7125_v41 = vmul.f32 %v5967_v4, %v5967_v4  ;;  %v5196_v44 = vshll.u32 %v10950_v57, 16 }
 0x227   : > { %v5971_v38 = vadd.f32 %v9155_v20, %v4925_v62  ;;  %v10952_v9 = vpop.f32.mrf.mxu0  ;;  %9113 = vmatmul.mubr.bf16.gmra.mxu0 %v11692_v8  ;;  %v6990_v0 = vadd.f32 %v6989_v55, %v5967_v4  ;;  %v5173_v47 = vor.u32 %v5172_v32, %v10941_v19  ;;  %v5200_v33 = vshrl.u32 %v10950_v57, 16  ;;  %v11694_v4 = vld [vmem:[#allocation123_spill] sm:$0xff]  ;;  %v11697_v20 = vld [vmem:[#allocation110_spill] sm:$0xff]  ;;  %v11698_v32 = vld [vmem:[#allocation129_spill] sm:$0xff] }
 0x228   : > { %v7251_v11 = vadd.f32 %v7250_v14, %v7124_v24  ;;  %v5368_v60 = vpop.f32.mrf.mxu1  ;;  %9116 = vmatprep.mubr.bf16.mxu0 %v11693_v45  ;;  %v7126_v58 = vmul.f32 %v5968_v28, %v5968_v28  ;;  %v4926_v24 = vadd.f32 %v4335_v10, %v11695_v49  ;;  %v11696_v14 = vld [vmem:[#allocation108_spill] sm:$0xff]  ;;  %v4929_v19 = vadd.f32 %v9015_v3, %v11697_v20 }
 0x229   : > { %v8059_v34 = vpack.c.bf16 %v5971_v38, %v5970_v26  ;;  %v5969_v54 = vadd.f32 %v5368_v60, %v4923_v53  ;;  %v4351_v62 = vpop.f32.mrf.mxu0  ;;  %v6991_v43 = vadd.f32 %v6990_v0, %v5968_v28  ;;  %v4928_v53 = vadd.f32 %v10926_v46, %v11696_v14 }
 0x22a   : > { %v7252_v27 = vadd.f32 %v7251_v11, %v7125_v41  ;;  %v9158_v18 = vpop.f32.mrf.mxu1  ;;  %9253 = vmatmul.mubr.bf16.gmra.mxu1 %v11694_v4  ;;  %v7721_v60 = vcombine.low %v10911_v37, %v10918_v42  ;;  %v5183_v10 = vor.u32 %v10947_v40, %v10945_v63  ;;  %v5193_v3 = vor.u32 %v10957_v21, %v10955_v22 }
 0x22b   : > { %8347 = vst [vmem:[%s10900_s11 + $0x38] sm:$0xff] %v8059_v34   ;;  %v8054_v45 = vpack.c.bf16 %v5969_v54, %v5968_v28  ;;  %v7127_v55 = vmul.f32 %v5969_v54, %v5969_v54  ;;  %9256 = vmatprep.mubr.bf16.mxu1 %v11698_v32  ;;  %v9019_v8 = vpop.f32.mrf.mxu0  ;;  %v6992_v0 = vadd.f32 %v6991_v43, %v5969_v54  ;;  %v377_v34 = vld [vmem:[%s9651_s9 + $0x290] sm:$0x1]  ;;  %v10979_v46 = vrot.slane %v5196_v44, 5  ;;  %s8020_s9 = sshll.u32 %s9587_s19, 13 }
 0x22c   : > { %v7253_v41 = vadd.f32 %v7252_v27, %v7126_v58  ;;  %v5381_v11 = vpop.f32.mrf.mxu1  ;;  %v11699_v28 = vld [vmem:[#allocation111_spill] sm:$0xff]  ;;  %v5202_v14 = vrot.slane %v5200_v33, 4  ;;  %v7128_v27 = vmul.f32 %v5970_v26, %v5970_v26  ;;  %v5974_v37 = vadd.f32 %v9158_v18, %v4928_v53  ;;  %s11170_s22 = scalar_lea.hbm %s11286_s2, %s8020_s9 }
 0x22d   : > { %8346 = vst [vmem:[%s10900_s11 + $0x30] sm:$0xff] %v8054_v45   ;;  %v4927_v4 = vadd.f32 %v4338_v5, %v11699_v28  ;;  %v4354_v49 = vpop.f32.mrf.mxu0  ;;  %v6993_v54 = vadd.f32 %v6992_v0, %v5970_v26  ;;  %v5972_v58 = vadd.f32 %v5381_v11, %v4926_v24  ;;  %v5174_v40 = vrot.slane %v5173_v47, 4 }
 0x22e   : > { %v7254_v43 = vadd.f32 %v7253_v41, %v7127_v55  ;;  %v9159_v20 = vpop.f32.mrf.mxu1  ;;  %v5206_v5 = vshll.u32 %v377_v34, 16  ;;  %v7129_v45 = vmul.f32 %v5971_v38, %v5971_v38  ;;  %v5184_v33 = vrot.slane %v5183_v10, 4  ;;  %v11702_v34 = vld [vmem:[#allocation118_spill] sm:$0xff] }
 0x22f   : > { %v5975_v42 = vadd.f32 %v9159_v20, %v4929_v19  ;;  %v10981_v32 = vpop.f32.mrf.mxu0  ;;  %9117 = vmatmul.mubr.bf16.gmra.mxu0 %v10562_v51  ;;  %v6994_v28 = vadd.f32 %v6993_v54, %v5971_v38  ;;  %v7722_v18 = vcombine.low %v10924_v17, %v10950_v57  ;;  %v5203_v24 = vor.u32 %v5202_v14, %v10979_v46  ;;  %v11700_v38 = vld [vmem:[#allocation117_spill] sm:$0xff] }
 0x230   : > { %v7255_v21 = vadd.f32 %v7254_v43, %v7128_v27  ;;  %v5384_v44 = vpop.f32.mrf.mxu1  ;;  %9120 = vmatprep.mubr.bf16.mxu0 %v7721_v60  ;;  %v7130_v51 = vmul.f32 %v5972_v58, %v5972_v58  ;;  %v4930_v41 = vadd.f32 %v4351_v62, %v11700_v38  ;;  %v11701_v60 = vld [vmem:[#allocation116_spill] sm:$0xff]  ;;  %v11703_v62 = vld [vmem:[#allocation119_spill] sm:$0xff]  ;;  %v5194_v43 = vrot.slane %v5193_v3, 4 }
 0x231   : > { %v8069_v61 = vpack.c.bf16 %v5975_v42, %v5974_v37  ;;  %v5973_v26 = vadd.f32 %v5384_v44, %v4927_v4  ;;  %v4367_v55 = vpop.f32.mrf.mxu0  ;;  %v6995_v19 = vadd.f32 %v6994_v28, %v5972_v58  ;;  %v4932_v10 = vadd.f32 %v10952_v9, %v11701_v60  ;;  %v11705_v60 = vld [vmem:[#allocation124_spill] sm:$0xff] }
 0x232   : > { %v7256_v53 = vadd.f32 %v7255_v21, %v7129_v45  ;;  %v9162_v47 = vpop.f32.mrf.mxu1  ;;  %9257 = vmatmul.mubr.bf16.gmra.mxu1 %v10564_v39  ;;  %v4933_v4 = vadd.f32 %v9019_v8, %v11702_v34  ;;  %v5179_v39 = vsel %vm9680_vm2, %v5174_v40, %v10945_v63  ;;  %v4931_v54 = vadd.f32 %v4354_v49, %v11703_v62 }
 0x233   : > { %8349 = vst [vmem:[%s10900_s11 + $0x48] sm:$0xff] %v8069_v61   ;;  %v8064_v0 = vpack.c.bf16 %v5973_v26, %v5972_v58  ;;  %v7131_v11 = vmul.f32 %v5973_v26, %v5973_v26  ;;  %9260 = vmatprep.mubr.bf16.mxu1 %v10583_v23  ;;  %v9023_v17 = vpop.f32.mrf.mxu0  ;;  %v6996_v14 = vadd.f32 %v6995_v19, %v5973_v26  ;;  %v5204_v8 = vrot.slane %v5203_v24, 4 }
 0x234   : > { %v7257_v57 = vadd.f32 %v7256_v53, %v7130_v51  ;;  %v5397_v27 = vpop.f32.mrf.mxu1  ;;  %v5189_v61 = vsel %vm9680_vm2, %v5184_v33, %v10955_v22  ;;  %v5208_v58 = vrot.slane %v5206_v5, 5  ;;  %v7132_v23 = vmul.f32 %v5974_v37, %v5974_v37 }
 0x235   : > { %8348 = vst [vmem:[%s10900_s11 + $0x40] sm:$0xff] %v8064_v0   ;;  %v4370_v9 = vpop.f32.mrf.mxu0  ;;  %v6997_v20 = vadd.f32 %v6996_v14, %v5974_v37  ;;  %v5976_v28 = vadd.f32 %v5397_v27, %v4930_v41  ;;  %v5978_v44 = vadd.f32 %v9162_v47, %v4932_v10  ;;  %v7747_v53 = vcombine.low %v5179_v39, %v5189_v61  ;;  %v11707_v27 = vld [vmem:[#allocation127_spill] sm:$0xff] }
 0x236   : > { %v7258_v45 = vadd.f32 %v7257_v57, %v7131_v11  ;;  %v9163_v21 = vpop.f32.mrf.mxu1  ;;  %v7133_v40 = vmul.f32 %v5975_v42, %v5975_v42  ;;  %v5199_v3 = vsel %vm9680_vm2, %v5194_v43, %v10979_v46  ;;  %v5209_v37 = vsel %vm9680_vm2, %v5204_v8, %v5208_v58  ;;  %v11706_v46 = vld [vmem:[#allocation126_spill] sm:$0xff] }
 0x237   : > { %v5979_v26 = vadd.f32 %v9163_v21, %v4933_v4  ;;  %v9026_v63 = vpop.f32.mrf.mxu0  ;;  %9121 = vmatmul.mubr.bf16.gmra.mxu0 %v7722_v18  ;;  %v6998_v22 = vadd.f32 %v6997_v20, %v5975_v42  ;;  %v7134_v38 = vmul.f32 %v5976_v28, %v5976_v28  ;;  %v11704_v42 = vld [vmem:[#allocation125_spill] sm:$0xff]  ;;  %v4936_v10 = vadd.f32 %v10981_v32, %v11705_v60 }
 0x238   : > { %v7259_v33 = vadd.f32 %v7258_v45, %v7132_v23  ;;  %v5400_v19 = vpop.f32.mrf.mxu1  ;;  %v4934_v41 = vadd.f32 %v4367_v55, %v11704_v42  ;;  %v4937_v34 = vadd.f32 %v9023_v17, %v11706_v46  ;;  %v4935_v39 = vadd.f32 %v4370_v9, %v11707_v27 }
 0x239   : > { %v8079_v49 = vpack.c.bf16 %v5979_v26, %v5978_v44  ;;  %v5977_v51 = vadd.f32 %v5400_v19, %v4931_v54  ;;  %v4383_v5 = vpop.f32.mrf.mxu0  ;;  %v6999_v47 = vadd.f32 %v6998_v22, %v5976_v28  ;;  %v7748_v61 = vcombine.low %v5199_v3, %v5209_v37 }
 0x23a   : > { %v7260_v24 = vadd.f32 %v7259_v33, %v7133_v40  ;;  %v9166_v18 = vpop.f32.mrf.mxu1  ;;  %9261 = vmatmul.mubr.bf16.gmra.mxu1 %v10597_v2  ;;  %v7136_v62 = vmul.f32 %v5978_v44, %v5978_v44  ;;  %v7137_v17 = vmul.f32 %v5979_v26, %v5979_v26  ;;  %v4940_v3 = vadd.f32 %v9026_v63, %v10567_v56 }
 0x23b   : > { %8351 = vst [vmem:[%s10900_s11 + $0x58] sm:$0xff] %v8079_v49   ;;  %v8074_v0 = vpack.c.bf16 %v5977_v51, %v5976_v28  ;;  %v7135_v11 = vmul.f32 %v5977_v51, %v5977_v51  ;;  %9264 = vmatprep.mubr.bf16.mxu1 %v7747_v53  ;;  %v9027_v36 = vpop.f32.mrf.mxu0  ;;  %v7000_v57 = vadd.f32 %v6999_v47, %v5977_v51 }
 0x23c   : > { %v7261_v4 = vadd.f32 %v7260_v24, %v7134_v38  ;;  %v5413_v14 = vpop.f32.mrf.mxu1  ;;  %v5982_v58 = vadd.f32 %v9166_v18, %v4936_v10 }
 0x23d   : > { %8350 = vst [vmem:[%s10900_s11 + $0x50] sm:$0xff] %v8074_v0   ;;  %v4386_v2 = vpop.f32.mrf.mxu0  ;;  %v7001_v55 = vadd.f32 %v7000_v57, %v5978_v44  ;;  %v5980_v43 = vadd.f32 %v5413_v14, %v4934_v41  ;;  %v4938_v44 = vadd.f32 %v4383_v5, %v10570_v30 }
 0x23e   : > { %v7262_v54 = vadd.f32 %v7261_v4, %v7135_v11  ;;  %v9167_v8 = vpop.f32.mrf.mxu1  ;;  %v4939_v18 = vadd.f32 %v4386_v2, %v10575_v31  ;;  %v7140_v41 = vmul.f32 %v5982_v58, %v5982_v58 }
 0x23f   : > { %v5983_v32 = vadd.f32 %v9167_v8, %v4937_v34  ;;  %v9030_v23 = vpop.f32.mrf.mxu0  ;;  %v7002_v20 = vadd.f32 %v7001_v55, %v5979_v26  ;;  %v7138_v33 = vmul.f32 %v5980_v43, %v5980_v43  ;;  %v4941_v26 = vadd.f32 %v9027_v36, %v10573_v7 }
 0x240   : > { %v7263_v45 = vadd.f32 %v7262_v54, %v7136_v62  ;;  %v5416_v28 = vpop.f32.mrf.mxu1  ;;  %v4944_v55 = vadd.f32 %v9030_v23, %v10581_v16 }
 0x241   : > { %v8089_v21 = vpack.c.bf16 %v5983_v32, %v5982_v58  ;;  %v5981_v53 = vadd.f32 %v5416_v28, %v4935_v39  ;;  %v4399_v40 = vpop.f32.mrf.mxu0  ;;  %v7003_v22 = vadd.f32 %v7002_v20, %v5980_v43  ;;  %v7141_v56 = vmul.f32 %v5983_v32, %v5983_v32 }
 0x242   : > { %v7264_v9 = vadd.f32 %v7263_v45, %v7137_v17  ;;  %v9170_v19 = vpop.f32.mrf.mxu1  ;;  %9265 = vmatmul.mubr.bf16.gmra.mxu1 %v7748_v61  ;;  %v4942_v61 = vadd.f32 %v4399_v40, %v10585_v15 }
 0x243   : > { %8353 = vst [vmem:[%s10900_s11 + $0x68] sm:$0xff] %v8089_v21   ;;  %v8084_v49 = vpack.c.bf16 %v5981_v53, %v5980_v43  ;;  %v7139_v51 = vmul.f32 %v5981_v53, %v5981_v53  ;;  %v9031_v37 = vpop.f32.mrf.mxu0  ;;  %v7004_v47 = vadd.f32 %v7003_v22, %v5981_v53  ;;  %v5986_v5 = vadd.f32 %v9170_v19, %v4940_v3 }
 0x244   : > { %v7265_v24 = vadd.f32 %v7264_v9, %v7138_v33  ;;  %v5429_v38 = vpop.f32.mrf.mxu1  ;;  %v4945_v54 = vadd.f32 %v9031_v37, %v10587_v12 }
 0x245   : > { %8352 = vst [vmem:[%s10900_s11 + $0x60] sm:$0xff] %v8084_v49   ;;  %v4402_v42 = vpop.f32.mrf.mxu0  ;;  %v7005_v0 = vadd.f32 %v7004_v47, %v5982_v58  ;;  %v5984_v60 = vadd.f32 %v5429_v38, %v4938_v44  ;;  %v7144_v45 = vmul.f32 %v5986_v5, %v5986_v5 }
 0x246   : > { %v7266_v11 = vadd.f32 %v7265_v24, %v7139_v51  ;;  %v9171_v30 = vpop.f32.mrf.mxu1  ;;  %v4943_v17 = vadd.f32 %v4402_v42, %v10592_v48 }
 0x247   : > { %v5987_v10 = vadd.f32 %v9171_v30, %v4941_v26  ;;  %v9034_v46 = vpop.f32.mrf.mxu0  ;;  %v7006_v63 = vadd.f32 %v7005_v0, %v5983_v32  ;;  %v7142_v27 = vmul.f32 %v5984_v60, %v5984_v60 }
 0x248   : > { %v7267_v7 = vadd.f32 %v7266_v11, %v7140_v41  ;;  %v5432_v34 = vpop.f32.mrf.mxu1  ;;  %v4948_v38 = vadd.f32 %v9034_v46, %v10600_v35 }
 0x249   : > { %v8099_v36 = vpack.c.bf16 %v5987_v10, %v5986_v5  ;;  %v5985_v4 = vadd.f32 %v5432_v34, %v4939_v18  ;;  %v4415_v57 = vpop.f32.mrf.mxu0  ;;  %v7007_v31 = vadd.f32 %v7006_v63, %v5984_v60  ;;  %v7145_v16 = vmul.f32 %v5987_v10, %v5987_v10 }
 0x24a   : > { %v7268_v14 = vadd.f32 %v7267_v7, %v7141_v56  ;;  %v9174_v39 = vpop.f32.mrf.mxu1  ;;  %v4946_v37 = vadd.f32 %v4415_v57, %v10603_v59 }
 0x24b   : > { %8355 = vst [vmem:[%s10900_s11 + $0x78] sm:$0xff] %v8099_v36   ;;  %v8094_v2 = vpack.c.bf16 %v5985_v4, %v5984_v60  ;;  %v7143_v62 = vmul.f32 %v5985_v4, %v5985_v4  ;;  %v9035_v43 = vpop.f32.mrf.mxu0  ;;  %v7008_v58 = vadd.f32 %v7007_v31, %v5985_v4  ;;  %v5990_v40 = vadd.f32 %v9174_v39, %v4944_v55 }
 0x24c   : > { %v7269_v8 = vadd.f32 %v7268_v14, %v7142_v27  ;;  %v5445_v32 = vpop.f32.mrf.mxu1  ;;  %v4949_v18 = vadd.f32 %v9035_v43, %v10606_v1 }
 0x24d   : > { %8354 = vst [vmem:[%s10900_s11 + $0x70] sm:$0xff] %v8094_v2   ;;  %v4418_v20 = vpop.f32.mrf.mxu0  ;;  %v7009_v28 = vadd.f32 %v7008_v58, %v5986_v5  ;;  %v5988_v53 = vadd.f32 %v5445_v32, %v4942_v61  ;;  %v7148_v5 = vmul.f32 %v5990_v40, %v5990_v40 }
 0x24e   : > { %v7270_v21 = vadd.f32 %v7269_v8, %v7143_v62  ;;  %v9175_v15 = vpop.f32.mrf.mxu1  ;;  %v4947_v60 = vadd.f32 %v4418_v20, %v10608_v25 }
 0x24f   : > { %v5991_v9 = vadd.f32 %v9175_v15, %v4945_v54  ;;  %v9038_v22 = vpop.f32.mrf.mxu0  ;;  %v7010_v23 = vadd.f32 %v7009_v28, %v5987_v10  ;;  %v7146_v3 = vmul.f32 %v5988_v53, %v5988_v53 }
 0x250   : > { %v7271_v12 = vadd.f32 %v7270_v21, %v7144_v45  ;;  %v5448_v33 = vpop.f32.mrf.mxu1  ;;  %v4952_v54 = vadd.f32 %v9038_v22, %v10612_v29 }
 0x251   : > { %v8109_v19 = vpack.c.bf16 %v5991_v9, %v5990_v40  ;;  %v5989_v44 = vadd.f32 %v5448_v33, %v4943_v17  ;;  %v4431_v49 = vpop.f32.mrf.mxu0  ;;  %v7011_v48 = vadd.f32 %v7010_v23, %v5988_v53  ;;  %v7149_v35 = vmul.f32 %v5991_v9, %v5991_v9 }
 0x252   : > { %v7272_v51 = vadd.f32 %v7271_v12, %v7145_v16  ;;  %v9178_v26 = vpop.f32.mrf.mxu1  ;;  %v4950_v2 = vadd.f32 %v4431_v49, %v10615_v13 }
 0x253   : > { %8357 = vst [vmem:[%s10900_s11 + $0x88] sm:$0xff] %v8109_v19   ;;  %v8104_v24 = vpack.c.bf16 %v5989_v44, %v5988_v53  ;;  %v7147_v47 = vmul.f32 %v5989_v44, %v5989_v44  ;;  %v9039_v42 = vpop.f32.mrf.mxu0  ;;  %v7012_v0 = vadd.f32 %v7011_v48, %v5989_v44  ;;  %v5994_v7 = vadd.f32 %v9178_v26, %v4948_v38 }
 0x254   : > { %v7273_v41 = vadd.f32 %v7272_v51, %v7146_v3  ;;  %v5461_v11 = vpop.f32.mrf.mxu1  ;;  %v4953_v43 = vadd.f32 %v9039_v42, %v10618_v6 }
 0x255   : > { %8356 = vst [vmem:[%s10900_s11 + $0x80] sm:$0xff] %v8104_v24   ;;  %v4434_v30 = vpop.f32.mrf.mxu0  ;;  %v7013_v10 = vadd.f32 %v7012_v0, %v5990_v40  ;;  %v5992_v63 = vadd.f32 %v5461_v11, %v4946_v37  ;;  %v7152_v28 = vmul.f32 %v5994_v7, %v5994_v7  ;;  %v11708_v37 = vld [vmem:[#allocation130_spill] sm:$0xff]  ;;  %v11710_v11 = vld [vmem:[#allocation132_spill] sm:$0xff] }
 0x256   : > { %v7274_v56 = vadd.f32 %v7273_v41, %v7147_v47  ;;  %v9179_v59 = vpop.f32.mrf.mxu1  ;;  %v4951_v20 = vadd.f32 %v4434_v30, %v10620_v52  ;;  %v11709_v47 = vld [vmem:[#allocation131_spill] sm:$0xff] }
 0x257   : > { %v5995_v34 = vadd.f32 %v9179_v59, %v4949_v18  ;;  %v9042_v36 = vpop.f32.mrf.mxu0  ;;  %v7014_v46 = vadd.f32 %v7013_v10, %v5991_v9  ;;  %v7150_v39 = vmul.f32 %v5992_v63, %v5992_v63 }
 0x258   : > { %v7275_v1 = vadd.f32 %v7274_v56, %v7148_v5  ;;  %v5464_v4 = vpop.f32.mrf.mxu1  ;;  %v4956_v24 = vadd.f32 %v9042_v36, %v11708_v37  ;;  %v11715_v37 = vld [vmem:[#allocation138_spill] sm:$0xff] }
 0x259   : > { %v8119_v57 = vpack.c.bf16 %v5995_v34, %v5994_v7  ;;  %v5993_v14 = vadd.f32 %v5464_v4, %v4947_v60  ;;  %v4447_v31 = vpop.f32.mrf.mxu0  ;;  %v7015_v25 = vadd.f32 %v7014_v46, %v5992_v63  ;;  %v7153_v29 = vmul.f32 %v5995_v34, %v5995_v34 }
 0x25a   : > { %v7276_v27 = vadd.f32 %v7275_v1, %v7149_v35  ;;  %v9182_v61 = vpop.f32.mrf.mxu1  ;;  %v4954_v48 = vadd.f32 %v4447_v31, %v10628_v50 }
 0x25b   : > { %8359 = vst [vmem:[%s10900_s11 + $0x98] sm:$0xff] %v8119_v57   ;;  %v8114_v62 = vpack.c.bf16 %v5993_v14, %v5992_v63  ;;  %v7151_v55 = vmul.f32 %v5993_v14, %v5993_v14  ;;  %v9043_v8 = vpop.f32.mrf.mxu0  ;;  %v7016_v32 = vadd.f32 %v7015_v25, %v5993_v14  ;;  %v5998_v40 = vadd.f32 %v9182_v61, %v4952_v54  ;;  %v11711_v61 = vld [vmem:[#allocation134_spill] sm:$0xff]  ;;  %v11712_v54 = vld [vmem:[#allocation133_spill] sm:$0xff] }
 0x25c   : > { %v7277_v58 = vadd.f32 %v7276_v27, %v7150_v39  ;;  %v5477_v17 = vpop.f32.mrf.mxu1  ;;  %v4957_v38 = vadd.f32 %v9043_v8, %v11709_v47  ;;  %v11713_v8 = vld [vmem:[#allocation135_spill] sm:$0xff] }
 0x25d   : > { %8358 = vst [vmem:[%s10900_s11 + $0x90] sm:$0xff] %v8114_v62   ;;  %v4450_v45 = vpop.f32.mrf.mxu0  ;;  %v7017_v21 = vadd.f32 %v7016_v32, %v5994_v7  ;;  %v5996_v15 = vadd.f32 %v5477_v17, %v4950_v2  ;;  %v7156_v5 = vmul.f32 %v5998_v40, %v5998_v40 }
 0x25e   : > { %v7278_v53 = vadd.f32 %v7277_v58, %v7151_v55  ;;  %v9183_v13 = vpop.f32.mrf.mxu1  ;;  %v4955_v60 = vadd.f32 %v4450_v45, %v11710_v11 }
 0x25f   : > { %v5999_v9 = vadd.f32 %v9183_v13, %v4953_v43  ;;  %v9046_v16 = vpop.f32.mrf.mxu0  ;;  %v7018_v22 = vadd.f32 %v7017_v21, %v5995_v34  ;;  %v7154_v49 = vmul.f32 %v5996_v15, %v5996_v15 }
 0x260   : > { %v7279_v6 = vadd.f32 %v7278_v53, %v7152_v28  ;;  %v5480_v23 = vpop.f32.mrf.mxu1  ;;  %v4960_v43 = vadd.f32 %v9046_v16, %v11712_v54  ;;  %v11714_v28 = vld [vmem:[#allocation136_spill] sm:$0xff]  ;;  %v11719_v54 = vld [vmem:[#allocation142_spill] sm:$0xff] }
 0x261   : > { %v8129_v12 = vpack.c.bf16 %v5999_v9, %v5998_v40  ;;  %v5997_v33 = vadd.f32 %v5480_v23, %v4951_v20  ;;  %v4463_v19 = vpop.f32.mrf.mxu0  ;;  %v7019_v52 = vadd.f32 %v7018_v22, %v5996_v15  ;;  %v7157_v36 = vmul.f32 %v5999_v9, %v5999_v9 }
 0x262   : > { %v7280_v44 = vadd.f32 %v7279_v6, %v7153_v29  ;;  %v9186_v51 = vpop.f32.mrf.mxu1  ;;  %v4958_v2 = vadd.f32 %v4463_v19, %v11711_v61 }
 0x263   : > { %8361 = vst [vmem:[%s10900_s11 + $0xa8] sm:$0xff] %v8129_v12   ;;  %v8124_v3 = vpack.c.bf16 %v5997_v33, %v5996_v15  ;;  %v7155_v26 = vmul.f32 %v5997_v33, %v5997_v33  ;;  %v9047_v18 = vpop.f32.mrf.mxu0  ;;  %v7020_v41 = vadd.f32 %v7019_v52, %v5997_v33  ;;  %v6002_v59 = vadd.f32 %v9186_v51, %v4956_v24 }
 0x264   : > { %v7281_v42 = vadd.f32 %v7280_v44, %v7154_v49  ;;  %v5493_v0 = vpop.f32.mrf.mxu1  ;;  %v4961_v58 = vadd.f32 %v9047_v18, %v11713_v8  ;;  %v11716_v18 = vld [vmem:[#allocation137_spill] sm:$0xff] }
 0x265   : > { %8360 = vst [vmem:[%s10900_s11 + $0xa0] sm:$0xff] %v8124_v3   ;;  %v4466_v30 = vpop.f32.mrf.mxu0  ;;  %v7021_v10 = vadd.f32 %v7020_v41, %v5998_v40  ;;  %v6000_v63 = vadd.f32 %v5493_v0, %v4954_v48  ;;  %v7160_v15 = vmul.f32 %v6002_v59, %v6002_v59  ;;  %v11717_v41 = vld [vmem:[#allocation139_spill] sm:$0xff] }
 0x266   : > { %v7282_v56 = vadd.f32 %v7281_v42, %v7155_v26  ;;  %v9187_v50 = vpop.f32.mrf.mxu1  ;;  %v4959_v21 = vadd.f32 %v4466_v30, %v11714_v28 }
 0x267   : > { %v6003_v7 = vadd.f32 %v9187_v50, %v4957_v38  ;;  %v9050_v34 = vpop.f32.mrf.mxu0  ;;  %v7022_v35 = vadd.f32 %v7021_v10, %v5999_v9  ;;  %v7158_v25 = vmul.f32 %v6000_v63, %v6000_v63  ;;  %v11718_v10 = vld [vmem:[#allocation140_spill] sm:$0xff] }
 0x268   : > { %v7283_v46 = vadd.f32 %v7282_v56, %v7156_v5  ;;  %v5496_v1 = vpop.f32.mrf.mxu1  ;;  %v4964_v42 = vadd.f32 %v9050_v34, %v11716_v18  ;;  %v11723_v18 = vld [vmem:[#allocation146_spill] sm:$0xff] }
 0x269   : > { %v8139_v4 = vpack.c.bf16 %v6003_v7, %v6002_v59  ;;  %v6001_v57 = vadd.f32 %v5496_v1, %v4955_v60  ;;  %v4479_v14 = vpop.f32.mrf.mxu0  ;;  %v7023_v27 = vadd.f32 %v7022_v35, %v6000_v63  ;;  %v7161_v16 = vmul.f32 %v6003_v7, %v6003_v7 }
 0x26a   : > { %v7284_v31 = vadd.f32 %v7283_v46, %v7157_v36  ;;  %v9190_v39 = vpop.f32.mrf.mxu1  ;;  %v4962_v24 = vadd.f32 %v4479_v14, %v11715_v37 }
 0x26b   : > { %8363 = vst [vmem:[%s10900_s11 + $0xb8] sm:$0xff] %v8139_v4   ;;  %v8134_v62 = vpack.c.bf16 %v6001_v57, %v6000_v63  ;;  %v7159_v55 = vmul.f32 %v6001_v57, %v6001_v57  ;;  %v9051_v32 = vpop.f32.mrf.mxu0  ;;  %v7024_v20 = vadd.f32 %v7023_v27, %v6001_v57  ;;  %v6006_v22 = vadd.f32 %v9190_v39, %v4960_v43 }
 0x26c   : > { %v7285_v17 = vadd.f32 %v7284_v31, %v7158_v25  ;;  %v5509_v45 = vpop.f32.mrf.mxu1  ;;  %v4965_v0 = vadd.f32 %v9051_v32, %v11717_v41  ;;  %v11720_v32 = vld [vmem:[#allocation141_spill] sm:$0xff] }
 0x26d   : > { %8362 = vst [vmem:[%s10900_s11 + $0xb0] sm:$0xff] %v8134_v62   ;;  %v4482_v53 = vpop.f32.mrf.mxu0  ;;  %v7025_v13 = vadd.f32 %v7024_v20, %v6002_v59  ;;  %v6004_v9 = vadd.f32 %v5509_v45, %v4958_v2  ;;  %v7164_v50 = vmul.f32 %v6006_v22, %v6006_v22  ;;  %v11721_v20 = vld [vmem:[#allocation143_spill] sm:$0xff] }
 0x26e   : > { %v7286_v40 = vadd.f32 %v7285_v17, %v7159_v55  ;;  %v9191_v29 = vpop.f32.mrf.mxu1  ;;  %v4963_v56 = vadd.f32 %v4482_v53, %v11718_v10 }
 0x26f   : > { %v6007_v6 = vadd.f32 %v9191_v29, %v4961_v58  ;;  %v9054_v23 = vpop.f32.mrf.mxu0  ;;  %v7026_v12 = vadd.f32 %v7025_v13, %v6003_v7  ;;  %v7162_v3 = vmul.f32 %v6004_v9, %v6004_v9  ;;  %v11722_v13 = vld [vmem:[#allocation144_spill] sm:$0xff] }
 0x270   : > { %v7287_v33 = vadd.f32 %v7286_v40, %v7160_v15  ;;  %v5512_v19 = vpop.f32.mrf.mxu1  ;;  %v4968_v17 = vadd.f32 %v9054_v23, %v11720_v32  ;;  %v11727_v32 = vld [vmem:[#allocation13_spill] sm:$0xff] }
 0x271   : > { %v8149_v44 = vpack.c.bf16 %v6007_v6, %v6006_v22  ;;  %v6005_v52 = vadd.f32 %v5512_v19, %v4959_v21  ;;  %v4495_v49 = vpop.f32.mrf.mxu0  ;;  %v7027_v48 = vadd.f32 %v7026_v12, %v6004_v9  ;;  %v7165_v34 = vmul.f32 %v6007_v6, %v6007_v6 }
 0x272   : > { %v7288_v51 = vadd.f32 %v7287_v33, %v7161_v16  ;;  %v9194_v26 = vpop.f32.mrf.mxu1  ;;  %v4966_v43 = vadd.f32 %v4495_v49, %v11719_v54 }
 0x273   : > { %8365 = vst [vmem:[%s10900_s11 + $0xc8] sm:$0xff] %v8149_v44   ;;  %v8144_v47 = vpack.c.bf16 %v6005_v52, %v6004_v9  ;;  %v7163_v38 = vmul.f32 %v6005_v52, %v6005_v52  ;;  %v9055_v11 = vpop.f32.mrf.mxu0  ;;  %v7028_v30 = vadd.f32 %v7027_v48, %v6005_v52  ;;  %v6010_v46 = vadd.f32 %v9194_v26, %v4964_v42 }
 0x274   : > { %v7289_v60 = vadd.f32 %v7288_v51, %v7162_v3  ;;  %v5525_v5 = vpop.f32.mrf.mxu1  ;;  %v4969_v45 = vadd.f32 %v9055_v11, %v11721_v20  ;;  %v11724_v11 = vld [vmem:[#allocation145_spill] sm:$0xff] }
 0x275   : > { %8364 = vst [vmem:[%s10900_s11 + $0xc0] sm:$0xff] %v8144_v47   ;;  %v4498_v63 = vpop.f32.mrf.mxu0  ;;  %v7029_v59 = vadd.f32 %v7028_v30, %v6006_v22  ;;  %v6008_v36 = vadd.f32 %v5525_v5, %v4962_v24  ;;  %v7168_v29 = vmul.f32 %v6010_v46, %v6010_v46  ;;  %v11725_v30 = vld [vmem:[#allocation10_spill] sm:$0xff] }
 0x276   : > { %v7290_v7 = vadd.f32 %v7289_v60, %v7163_v38  ;;  %v9195_v35 = vpop.f32.mrf.mxu1  ;;  %v4967_v40 = vadd.f32 %v4498_v63, %v11722_v13 }
 0x277   : > { %v6011_v1 = vadd.f32 %v9195_v35, %v4965_v0  ;;  %v9058_v4 = vpop.f32.mrf.mxu0  ;;  %v7030_v57 = vadd.f32 %v7029_v59, %v6007_v6  ;;  %v7166_v62 = vmul.f32 %v6008_v36, %v6008_v36  ;;  %v11726_v59 = vld [vmem:[#allocation12_spill] sm:$0xff] }
 0x278   : > { %v7291_v14 = vadd.f32 %v7290_v7, %v7164_v50  ;;  %v5528_v31 = vpop.f32.mrf.mxu1  ;;  %v4972_v60 = vadd.f32 %v9058_v4, %v11724_v11  ;;  %v11731_v11 = vld [vmem:[#allocation17_spill] sm:$0xff] }
 0x279   : > { %v8159_v27 = vpack.c.bf16 %v6011_v1, %v6010_v46  ;;  %v6009_v25 = vadd.f32 %v5528_v31, %v4963_v56  ;;  %v4511_v39 = vpop.f32.mrf.mxu0  ;;  %v7031_v2 = vadd.f32 %v7030_v57, %v6008_v36  ;;  %v7169_v23 = vmul.f32 %v6011_v1, %v6011_v1 }
 0x27a   : > { %v7292_v61 = vadd.f32 %v7291_v14, %v7165_v34  ;;  %v9198_v55 = vpop.f32.mrf.mxu1  ;;  %v4970_v42 = vadd.f32 %v4511_v39, %v11723_v18 }
 0x27b   : > { %8367 = vst [vmem:[%s10900_s11 + $0xd8] sm:$0xff] %v8159_v27   ;;  %v8154_v8 = vpack.c.bf16 %v6009_v25, %v6008_v36  ;;  %v7167_v58 = vmul.f32 %v6009_v25, %v6009_v25  ;;  %v9059_v28 = vpop.f32.mrf.mxu0  ;;  %v7032_v53 = vadd.f32 %v7031_v2, %v6009_v25  ;;  %v6014_v33 = vadd.f32 %v9198_v55, %v4968_v17 }
 0x27c   : > { %v7293_v21 = vadd.f32 %v7292_v61, %v7166_v62  ;;  %v5541_v15 = vpop.f32.mrf.mxu1  ;;  %v4973_v5 = vadd.f32 %v9059_v28, %v11725_v30  ;;  %v11728_v28 = vld [vmem:[#allocation11_spill] sm:$0xff] }
 0x27d   : > { %8366 = vst [vmem:[%s10900_s11 + $0xd0] sm:$0xff] %v8154_v8   ;;  %v4514_v9 = vpop.f32.mrf.mxu0  ;;  %v7033_v22 = vadd.f32 %v7032_v53, %v6010_v46  ;;  %v6012_v16 = vadd.f32 %v5541_v15, %v4966_v43  ;;  %v7172_v35 = vmul.f32 %v6014_v33, %v6014_v33  ;;  %v11729_v53 = vld [vmem:[#allocation14_spill] sm:$0xff] }
 0x27e   : > { %v7294_v6 = vadd.f32 %v7293_v21, %v7167_v58  ;;  %v9199_v12 = vpop.f32.mrf.mxu1  ;;  %v4971_v7 = vadd.f32 %v4514_v9, %v11726_v59 }
 0x27f   : > { %v6015_v19 = vadd.f32 %v9199_v12, %v4969_v45  ;;  %v9062_v44 = vpop.f32.mrf.mxu0  ;;  %v7034_v52 = vadd.f32 %v7033_v22, %v6011_v1  ;;  %v7170_v47 = vmul.f32 %v6012_v16, %v6012_v16  ;;  %v11730_v22 = vld [vmem:[#allocation16_spill] sm:$0xff] }
 0x280   : > { %v7295_v49 = vadd.f32 %v7294_v6, %v7168_v29  ;;  %v5544_v51 = vpop.f32.mrf.mxu1  ;;  %v4976_v21 = vadd.f32 %v9062_v44, %v11728_v28  ;;  %v11735_v28 = vld [vmem:[#allocation21_spill] sm:$0xff] }
 0x281   : > { %v8169_v48 = vpack.c.bf16 %v6015_v19, %v6014_v33  ;;  %v6013_v3 = vadd.f32 %v5544_v51, %v4967_v40  ;;  %v4527_v26 = vpop.f32.mrf.mxu0  ;;  %v7035_v24 = vadd.f32 %v7034_v52, %v6012_v16  ;;  %v7173_v4 = vmul.f32 %v6015_v19, %v6015_v19 }
 0x282   : > { %v7296_v37 = vadd.f32 %v7295_v49, %v7169_v23  ;;  %v9202_v38 = vpop.f32.mrf.mxu1  ;;  %v4974_v17 = vadd.f32 %v4527_v26, %v11727_v32 }
 0x283   : > { %8369 = vst [vmem:[%s10900_s11 + $0xe8] sm:$0xff] %v8169_v48   ;;  %v8164_v41 = vpack.c.bf16 %v6013_v3, %v6012_v16  ;;  %v7171_v0 = vmul.f32 %v6013_v3, %v6013_v3  ;;  %v9063_v10 = vpop.f32.mrf.mxu0  ;;  %v7036_v63 = vadd.f32 %v7035_v24, %v6013_v3  ;;  %v6018_v14 = vadd.f32 %v9202_v38, %v4972_v60 }
 0x284   : > { %v7297_v56 = vadd.f32 %v7296_v37, %v7170_v47  ;;  %v5557_v50 = vpop.f32.mrf.mxu1  ;;  %v4977_v15 = vadd.f32 %v9063_v10, %v11729_v53  ;;  %v11732_v10 = vld [vmem:[#allocation15_spill] sm:$0xff] }
 0x285   : > { %8368 = vst [vmem:[%s10900_s11 + $0xe0] sm:$0xff] %v8164_v41   ;;  %v4530_v36 = vpop.f32.mrf.mxu0  ;;  %v7037_v46 = vadd.f32 %v7036_v63, %v6014_v33  ;;  %v6016_v34 = vadd.f32 %v5557_v50, %v4970_v42  ;;  %v7176_v12 = vmul.f32 %v6018_v14, %v6018_v14  ;;  %v11733_v63 = vld [vmem:[#allocation18_spill] sm:$0xff] }
 0x286   : > { %v7298_v1 = vadd.f32 %v7297_v56, %v7171_v0  ;;  %v9203_v57 = vpop.f32.mrf.mxu1  ;;  %v4975_v6 = vadd.f32 %v4530_v36, %v11730_v22 }
 0x287   : > { %v6019_v31 = vadd.f32 %v9203_v57, %v4973_v5  ;;  %v9066_v27 = vpop.f32.mrf.mxu0  ;;  %v7038_v25 = vadd.f32 %v7037_v46, %v6015_v19  ;;  %v7174_v8 = vmul.f32 %v6016_v34, %v6016_v34  ;;  %v11734_v46 = vld [vmem:[#allocation20_spill] sm:$0xff] }
 0x288   : > { %v7299_v39 = vadd.f32 %v7298_v1, %v7172_v35  ;;  %v5560_v61 = vpop.f32.mrf.mxu1  ;;  %v4980_v56 = vadd.f32 %v9066_v27, %v11732_v10  ;;  %v11739_v10 = vld [vmem:[#allocation25_spill] sm:$0xff] }
 0x289   : > { %v8179_v2 = vpack.c.bf16 %v6019_v31, %v6018_v14  ;;  %v6017_v62 = vadd.f32 %v5560_v61, %v4971_v7  ;;  %v4543_v55 = vpop.f32.mrf.mxu0  ;;  %v7039_v43 = vadd.f32 %v7038_v25, %v6016_v34  ;;  %v7177_v44 = vmul.f32 %v6019_v31, %v6019_v31 }
 0x28a   : > { %v7300_v54 = vadd.f32 %v7299_v39, %v7173_v4  ;;  %v9206_v58 = vpop.f32.mrf.mxu1  ;;  %v4978_v60 = vadd.f32 %v4543_v55, %v11731_v11 }
 0x28b   : > { %8371 = vst [vmem:[%s10900_s11 + $0xf8] sm:$0xff] %v8179_v2   ;;  %v8174_v20 = vpack.c.bf16 %v6017_v62, %v6016_v34  ;;  %v7175_v45 = vmul.f32 %v6017_v62, %v6017_v62  ;;  %v9067_v13 = vpop.f32.mrf.mxu0  ;;  %v7040_v9 = vadd.f32 %v7039_v43, %v6017_v62  ;;  %v6022_v49 = vadd.f32 %v9206_v58, %v4976_v21 }
 0x28c   : > { %v7301_v40 = vadd.f32 %v7300_v54, %v7174_v8  ;;  %v5573_v29 = vpop.f32.mrf.mxu1  ;;  %v4981_v50 = vadd.f32 %v9067_v13, %v11733_v63  ;;  %v11736_v13 = vld [vmem:[#allocation19_spill] sm:$0xff] }
 0x28d   : > { %8370 = vst [vmem:[%s10900_s11 + $0xf0] sm:$0xff] %v8174_v20   ;;  %v4546_v16 = vpop.f32.mrf.mxu0  ;;  %v7041_v33 = vadd.f32 %v7040_v9, %v6018_v14  ;;  %v6020_v23 = vadd.f32 %v5573_v29, %v4974_v17  ;;  %v7180_v57 = vmul.f32 %v6022_v49, %v6022_v49  ;;  %v11737_v9 = vld [vmem:[#allocation22_spill] sm:$0xff] }
 0x28e   : > { %v7302_v19 = vadd.f32 %v7301_v40, %v7175_v45  ;;  %v9207_v52 = vpop.f32.mrf.mxu1  ;;  %v4979_v1 = vadd.f32 %v4546_v16, %v11734_v46 }
 0x28f   : > { %v6023_v51 = vadd.f32 %v9207_v52, %v4977_v15  ;;  %v9070_v48 = vpop.f32.mrf.mxu0  ;;  %v7042_v3 = vadd.f32 %v7041_v33, %v6019_v31  ;;  %v7178_v41 = vmul.f32 %v6020_v23, %v6020_v23  ;;  %v11738_v33 = vld [vmem:[#allocation24_spill] sm:$0xff] }
 0x290   : > { %v7303_v26 = vadd.f32 %v7302_v19, %v7176_v12  ;;  %v5576_v37 = vpop.f32.mrf.mxu1  ;;  %v4984_v40 = vadd.f32 %v9070_v48, %v11736_v13  ;;  %v11743_v13 = vld [vmem:[#allocation29_spill] sm:$0xff] }
 0x291   : > { %v8189_v24 = vpack.c.bf16 %v6023_v51, %v6022_v49  ;;  %v6021_v47 = vadd.f32 %v5576_v37, %v4975_v6  ;;  %v4559_v38 = vpop.f32.mrf.mxu0  ;;  %v7043_v42 = vadd.f32 %v7042_v3, %v6020_v23  ;;  %v7181_v27 = vmul.f32 %v6023_v51, %v6023_v51 }
 0x292   : > { %v7304_v18 = vadd.f32 %v7303_v26, %v7177_v44  ;;  %v9210_v0 = vpop.f32.mrf.mxu1  ;;  %v4982_v21 = vadd.f32 %v4559_v38, %v11735_v28 }
 0x293   : > { %8373 = vst [vmem:[%s10900_s11 + $0x108] sm:$0xff] %v8189_v24   ;;  %v8184_v30 = vpack.c.bf16 %v6021_v47, %v6020_v23  ;;  %v7179_v5 = vmul.f32 %v6021_v47, %v6021_v47  ;;  %v9071_v59 = vpop.f32.mrf.mxu0  ;;  %v7044_v36 = vadd.f32 %v7043_v42, %v6021_v47  ;;  %v6026_v39 = vadd.f32 %v9210_v0, %v4980_v56 }
 0x294   : > { %v7305_v7 = vadd.f32 %v7304_v18, %v7178_v41  ;;  %v5589_v35 = vpop.f32.mrf.mxu1  ;;  %v4985_v29 = vadd.f32 %v9071_v59, %v11737_v9  ;;  %v11740_v59 = vld [vmem:[#allocation23_spill] sm:$0xff] }
 0x295   : > { %8372 = vst [vmem:[%s10900_s11 + $0x100] sm:$0xff] %v8184_v30   ;;  %v4562_v34 = vpop.f32.mrf.mxu0  ;;  %v7045_v14 = vadd.f32 %v7044_v36, %v6022_v49  ;;  %v6024_v4 = vadd.f32 %v5589_v35, %v4978_v60  ;;  %v7184_v52 = vmul.f32 %v6026_v39, %v6026_v39  ;;  %v11741_v36 = vld [vmem:[#allocation26_spill] sm:$0xff] }
 0x296   : > { %v7306_v31 = vadd.f32 %v7305_v7, %v7179_v5  ;;  %v9211_v25 = vpop.f32.mrf.mxu1  ;;  %v4983_v19 = vadd.f32 %v4562_v34, %v11738_v33 }
 0x297   : > { %v6027_v61 = vadd.f32 %v9211_v25, %v4981_v50  ;;  %v9074_v2 = vpop.f32.mrf.mxu0  ;;  %v7046_v55 = vadd.f32 %v7045_v14, %v6023_v51  ;;  %v7182_v17 = vmul.f32 %v6024_v4, %v6024_v4  ;;  %v11742_v14 = vld [vmem:[#allocation28_spill] sm:$0xff] }
 0x298   : > { %v7307_v62 = vadd.f32 %v7306_v31, %v7180_v57  ;;  %v5592_v54 = vpop.f32.mrf.mxu1  ;;  %v4988_v7 = vadd.f32 %v9074_v2, %v11740_v59  ;;  %v11747_v59 = vld [vmem:[#allocation33_spill] sm:$0xff] }
 0x299   : > { %v8199_v43 = vpack.c.bf16 %v6027_v61, %v6026_v39  ;;  %v6025_v8 = vadd.f32 %v5592_v54, %v4979_v1  ;;  %v4575_v58 = vpop.f32.mrf.mxu0  ;;  %v7047_v32 = vadd.f32 %v7046_v55, %v6024_v4  ;;  %v7185_v48 = vmul.f32 %v6027_v61, %v6027_v61 }
 0x29a   : > { %v7308_v20 = vadd.f32 %v7307_v62, %v7181_v27  ;;  %v9214_v45 = vpop.f32.mrf.mxu1  ;;  %v4986_v56 = vadd.f32 %v4575_v58, %v11739_v10 }
 0x29b   : > { %8375 = vst [vmem:[%s10900_s11 + $0x118] sm:$0xff] %v8199_v43   ;;  %v8194_v53 = vpack.c.bf16 %v6025_v8, %v6024_v4  ;;  %v7183_v15 = vmul.f32 %v6025_v8, %v6025_v8  ;;  %v9075_v22 = vpop.f32.mrf.mxu0  ;;  %v7048_v16 = vadd.f32 %v7047_v32, %v6025_v8  ;;  %v6030_v26 = vadd.f32 %v9214_v45, %v4984_v40 }
 0x29c   : > { %v7309_v6 = vadd.f32 %v7308_v20, %v7182_v17  ;;  %v5605_v12 = vpop.f32.mrf.mxu1  ;;  %v4989_v35 = vadd.f32 %v9075_v22, %v11741_v36  ;;  %v11744_v22 = vld [vmem:[#allocation27_spill] sm:$0xff] }
 0x29d   : > { %8374 = vst [vmem:[%s10900_s11 + $0x110] sm:$0xff] %v8194_v53   ;;  %v4578_v23 = vpop.f32.mrf.mxu0  ;;  %v7049_v49 = vadd.f32 %v7048_v16, %v6026_v39  ;;  %v6028_v44 = vadd.f32 %v5605_v12, %v4982_v21  ;;  %v7188_v25 = vmul.f32 %v6030_v26, %v6030_v26  ;;  %v11745_v16 = vld [vmem:[#allocation30_spill] sm:$0xff] }
 0x29e   : > { %v7310_v51 = vadd.f32 %v7309_v6, %v7183_v15  ;;  %v9215_v3 = vpop.f32.mrf.mxu1  ;;  %v4987_v31 = vadd.f32 %v4578_v23, %v11742_v14 }
 0x29f   : > { %v6031_v37 = vadd.f32 %v9215_v3, %v4985_v29  ;;  %v9078_v24 = vpop.f32.mrf.mxu0  ;;  %v7050_v38 = vadd.f32 %v7049_v49, %v6027_v61  ;;  %v7186_v60 = vmul.f32 %v6028_v44, %v6028_v44  ;;  %v11746_v49 = vld [vmem:[#allocation32_spill] sm:$0xff] }
 0x2a0   : > { %v7311_v47 = vadd.f32 %v7310_v51, %v7184_v52  ;;  %v5608_v18 = vpop.f32.mrf.mxu1  ;;  %v4992_v6 = vadd.f32 %v9078_v24, %v11744_v22  ;;  %v11751_v22 = vld [vmem:[#allocation37_spill] sm:$0xff] }
 0x2a1   : > { %v8209_v42 = vpack.c.bf16 %v6031_v37, %v6030_v26  ;;  %v6029_v41 = vadd.f32 %v5608_v18, %v4983_v19  ;;  %v4591_v0 = vpop.f32.mrf.mxu0  ;;  %v7051_v11 = vadd.f32 %v7050_v38, %v6028_v44  ;;  %v7189_v2 = vmul.f32 %v6031_v37, %v6031_v37 }
 0x2a2   : > { %v7312_v30 = vadd.f32 %v7311_v47, %v7185_v48  ;;  %v9218_v5 = vpop.f32.mrf.mxu1  ;;  %v4990_v40 = vadd.f32 %v4591_v0, %v11743_v13 }
 0x2a3   : > { %8377 = vst [vmem:[%s10900_s11 + $0x128] sm:$0xff] %v8209_v42   ;;  %v8204_v63 = vpack.c.bf16 %v6029_v41, %v6028_v44  ;;  %v7187_v50 = vmul.f32 %v6029_v41, %v6029_v41  ;;  %v9079_v46 = vpop.f32.mrf.mxu0  ;;  %v7052_v34 = vadd.f32 %v7051_v11, %v6029_v41  ;;  %v6034_v55 = vadd.f32 %v9218_v5, %v4988_v7 }
 0x2a4   : > { %v7313_v1 = vadd.f32 %v7312_v30, %v7186_v60  ;;  %v5621_v57 = vpop.f32.mrf.mxu1  ;;  %v4993_v12 = vadd.f32 %v9079_v46, %v11745_v16  ;;  %v11748_v46 = vld [vmem:[#allocation31_spill] sm:$0xff] }
 0x2a5   : > { %8376 = vst [vmem:[%s10900_s11 + $0x120] sm:$0xff] %v8204_v63   ;;  %v4594_v4 = vpop.f32.mrf.mxu0  ;;  %v7053_v39 = vadd.f32 %v7052_v34, %v6030_v26  ;;  %v6032_v27 = vadd.f32 %v5621_v57, %v4986_v56  ;;  %v7192_v3 = vmul.f32 %v6034_v55, %v6034_v55  ;;  %v11749_v34 = vld [vmem:[#allocation34_spill] sm:$0xff] }
 0x2a6   : > { %v7314_v61 = vadd.f32 %v7313_v1, %v7187_v50  ;;  %v9219_v62 = vpop.f32.mrf.mxu1  ;;  %v4991_v51 = vadd.f32 %v4594_v4, %v11746_v49 }
 0x2a7   : > { %v6035_v54 = vadd.f32 %v9219_v62, %v4989_v35  ;;  %v9082_v43 = vpop.f32.mrf.mxu0  ;;  %v7054_v58 = vadd.f32 %v7053_v39, %v6031_v37  ;;  %v7190_v21 = vmul.f32 %v6032_v27, %v6032_v27  ;;  %v11750_v39 = vld [vmem:[#allocation36_spill] sm:$0xff] }
 0x2a8   : > { %v7315_v8 = vadd.f32 %v7314_v61, %v7188_v25  ;;  %v5624_v32 = vpop.f32.mrf.mxu1  ;;  %v4996_v1 = vadd.f32 %v9082_v43, %v11748_v46  ;;  %v11755_v46 = vld [vmem:[#allocation41_spill] sm:$0xff] }
 0x2a9   : > { %v8219_v17 = vpack.c.bf16 %v6035_v54, %v6034_v55  ;;  %v6033_v20 = vadd.f32 %v5624_v32, %v4987_v31  ;;  %v4607_v45 = vpop.f32.mrf.mxu0  ;;  %v7055_v28 = vadd.f32 %v7054_v58, %v6032_v27  ;;  %v7193_v24 = vmul.f32 %v6035_v54, %v6035_v54 }
 0x2aa   : > { %v7316_v53 = vadd.f32 %v7315_v8, %v7189_v2  ;;  %v9222_v15 = vpop.f32.mrf.mxu1  ;;  %v4994_v7 = vadd.f32 %v4607_v45, %v11747_v59 }
 0x2ab   : > { %8379 = vst [vmem:[%s10900_s11 + $0x138] sm:$0xff] %v8219_v17   ;;  %v8214_v9 = vpack.c.bf16 %v6033_v20, %v6032_v27  ;;  %v7191_v29 = vmul.f32 %v6033_v20, %v6033_v20  ;;  %v9083_v33 = vpop.f32.mrf.mxu0  ;;  %v7056_v23 = vadd.f32 %v7055_v28, %v6033_v20  ;;  %v6038_v38 = vadd.f32 %v9222_v15, %v4992_v6 }
 0x2ac   : > { %v7317_v19 = vadd.f32 %v7316_v53, %v7190_v21  ;;  %v5637_v52 = vpop.f32.mrf.mxu1  ;;  %v4997_v57 = vadd.f32 %v9083_v33, %v11749_v34  ;;  %v11752_v33 = vld [vmem:[#allocation35_spill] sm:$0xff] }
 0x2ad   : > { %8378 = vst [vmem:[%s10900_s11 + $0x130] sm:$0xff] %v8214_v9   ;;  %v4610_v44 = vpop.f32.mrf.mxu0  ;;  %v7057_v26 = vadd.f32 %v7056_v23, %v6034_v55  ;;  %v6036_v48 = vadd.f32 %v5637_v52, %v4990_v40  ;;  %v7196_v62 = vmul.f32 %v6038_v38, %v6038_v38  ;;  %v11753_v23 = vld [vmem:[#allocation38_spill] sm:$0xff] }
 0x2ae   : > { %v7318_v37 = vadd.f32 %v7317_v19, %v7191_v29  ;;  %v9223_v47 = vpop.f32.mrf.mxu1  ;;  %v4995_v61 = vadd.f32 %v4610_v44, %v11750_v39 }
 0x2af   : > { %v6039_v18 = vadd.f32 %v9223_v47, %v4993_v12  ;;  %v9086_v42 = vpop.f32.mrf.mxu0  ;;  %v7058_v0 = vadd.f32 %v7057_v26, %v6035_v54  ;;  %v7194_v56 = vmul.f32 %v6036_v48, %v6036_v48  ;;  %v11754_v26 = vld [vmem:[#allocation40_spill] sm:$0xff] }
 0x2b0   : > { %v7319_v41 = vadd.f32 %v7318_v37, %v7192_v3  ;;  %v5640_v11 = vpop.f32.mrf.mxu1  ;;  %v5000_v19 = vadd.f32 %v9086_v42, %v11752_v33  ;;  %v11759_v33 = vld [vmem:[#allocation45_spill] sm:$0xff] }
 0x2b1   : > { %v8229_v60 = vpack.c.bf16 %v6039_v18, %v6038_v38  ;;  %v6037_v30 = vadd.f32 %v5640_v11, %v4991_v51  ;;  %v4623_v5 = vpop.f32.mrf.mxu0  ;;  %v7059_v10 = vadd.f32 %v7058_v0, %v6036_v48  ;;  %v7197_v43 = vmul.f32 %v6039_v18, %v6039_v18 }
 0x2b2   : > { %v7320_v63 = vadd.f32 %v7319_v41, %v7193_v24  ;;  %v9226_v50 = vpop.f32.mrf.mxu1  ;;  %v4998_v6 = vadd.f32 %v4623_v5, %v11751_v22 }
 0x2b3   : > { %8381 = vst [vmem:[%s10900_s11 + $0x148] sm:$0xff] %v8229_v60   ;;  %v8224_v36 = vpack.c.bf16 %v6037_v30, %v6036_v48  ;;  %v7195_v35 = vmul.f32 %v6037_v30, %v6037_v30  ;;  %v9087_v14 = vpop.f32.mrf.mxu0  ;;  %v7060_v4 = vadd.f32 %v7059_v10, %v6037_v30  ;;  %v6042_v58 = vadd.f32 %v9226_v50, %v4996_v1 }
 0x2b4   : > { %v7321_v31 = vadd.f32 %v7320_v63, %v7194_v56  ;;  %v5653_v25 = vpop.f32.mrf.mxu1  ;;  %v5001_v52 = vadd.f32 %v9087_v14, %v11753_v23  ;;  %v11756_v14 = vld [vmem:[#allocation39_spill] sm:$0xff] }
 0x2b5   : > { %8380 = vst [vmem:[%s10900_s11 + $0x140] sm:$0xff] %v8224_v36   ;;  %v4626_v27 = vpop.f32.mrf.mxu0  ;;  %v7061_v55 = vadd.f32 %v7060_v4, %v6038_v38  ;;  %v6040_v2 = vadd.f32 %v5653_v25, %v4994_v7  ;;  %v7200_v47 = vmul.f32 %v6042_v58, %v6042_v58  ;;  %v11757_v4 = vld [vmem:[#allocation42_spill] sm:$0xff] }
 0x2b6   : > { %v7322_v54 = vadd.f32 %v7321_v31, %v7195_v35  ;;  %v9227_v8 = vpop.f32.mrf.mxu1  ;;  %v4999_v37 = vadd.f32 %v4626_v27, %v11754_v26 }
 0x2b7   : > { %v6043_v32 = vadd.f32 %v9227_v8, %v4997_v57  ;;  %v9090_v17 = vpop.f32.mrf.mxu0  ;;  %v7062_v45 = vadd.f32 %v7061_v55, %v6039_v18  ;;  %v7198_v40 = vmul.f32 %v6040_v2, %v6040_v2  ;;  %v11758_v55 = vld [vmem:[#allocation44_spill] sm:$0xff] }
 0x2b8   : > { %v7323_v20 = vadd.f32 %v7322_v54, %v7196_v62  ;;  %v5656_v28 = vpop.f32.mrf.mxu1  ;;  %v5004_v31 = vadd.f32 %v9090_v17, %v11756_v14  ;;  %v11763_v14 = vld [vmem:[#allocation49_spill] sm:$0xff] }
 0x2b9   : > { %v8239_v21 = vpack.c.bf16 %v6043_v32, %v6042_v58  ;;  %v6041_v53 = vadd.f32 %v5656_v28, %v4995_v61  ;;  %v4639_v15 = vpop.f32.mrf.mxu0  ;;  %v7063_v13 = vadd.f32 %v7062_v45, %v6040_v2  ;;  %v7201_v42 = vmul.f32 %v6043_v32, %v6043_v32 }
 0x2ba   : > { %v7324_v9 = vadd.f32 %v7323_v20, %v7197_v43  ;;  %v9230_v29 = vpop.f32.mrf.mxu1  ;;  %v5002_v1 = vadd.f32 %v4639_v15, %v11755_v46 }
 0x2bb   : > { %8383 = vst [vmem:[%s10900_s11 + $0x158] sm:$0xff] %v8239_v21   ;;  %v8234_v16 = vpack.c.bf16 %v6041_v53, %v6040_v2  ;;  %v7199_v12 = vmul.f32 %v6041_v53, %v6041_v53  ;;  %v9091_v49 = vpop.f32.mrf.mxu0  ;;  %v7064_v44 = vadd.f32 %v7063_v13, %v6041_v53  ;;  %v6046_v0 = vadd.f32 %v9230_v29, %v5000_v19 }
 0x2bc   : > { %v7325_v51 = vadd.f32 %v7324_v9, %v7198_v40  ;;  %v5669_v3 = vpop.f32.mrf.mxu1  ;;  %v5005_v25 = vadd.f32 %v9091_v49, %v11757_v4  ;;  %v11760_v49 = vld [vmem:[#allocation43_spill] sm:$0xff] }
 0x2bd   : > { %8382 = vst [vmem:[%s10900_s11 + $0x150] sm:$0xff] %v8234_v16   ;;  %v4642_v48 = vpop.f32.mrf.mxu0  ;;  %v7065_v38 = vadd.f32 %v7064_v44, %v6042_v58  ;;  %v6044_v24 = vadd.f32 %v5669_v3, %v4998_v6  ;;  %v7204_v8 = vmul.f32 %v6046_v0, %v6046_v0  ;;  %v11761_v44 = vld [vmem:[#allocation46_spill] sm:$0xff] }
 0x2be   : > { %v7326_v18 = vadd.f32 %v7325_v51, %v7199_v12  ;;  %v9231_v41 = vpop.f32.mrf.mxu1  ;;  %v5003_v54 = vadd.f32 %v4642_v48, %v11758_v55 }
 0x2bf   : > { %v6047_v11 = vadd.f32 %v9231_v41, %v5001_v52  ;;  %v9094_v60 = vpop.f32.mrf.mxu0  ;;  %v7066_v5 = vadd.f32 %v7065_v38, %v6043_v32  ;;  %v7202_v7 = vmul.f32 %v6044_v24, %v6044_v24  ;;  %v11762_v38 = vld [vmem:[#allocation48_spill] sm:$0xff] }
 0x2c0   : > { %v7327_v30 = vadd.f32 %v7326_v18, %v7200_v47  ;;  %v5672_v10 = vpop.f32.mrf.mxu1  ;;  %v5008_v51 = vadd.f32 %v9094_v60, %v11760_v49  ;;  %v11767_v49 = vld [vmem:[#allocation53_spill] sm:$0xff] }
 0x2c1   : > { %v8249_v56 = vpack.c.bf16 %v6047_v11, %v6046_v0  ;;  %v6045_v63 = vadd.f32 %v5672_v10, %v4999_v37  ;;  %v4655_v50 = vpop.f32.mrf.mxu0  ;;  %v7067_v59 = vadd.f32 %v7066_v5, %v6044_v24  ;;  %v7205_v17 = vmul.f32 %v6047_v11, %v6047_v11 }
 0x2c2   : > { %v7328_v36 = vadd.f32 %v7327_v30, %v7201_v42  ;;  %v9234_v35 = vpop.f32.mrf.mxu1  ;;  %v5006_v19 = vadd.f32 %v4655_v50, %v11759_v33 }
 0x2c3   : > { %8385 = vst [vmem:[%s10900_s11 + $0x168] sm:$0xff] %v8249_v56   ;;  %v8244_v34 = vpack.c.bf16 %v6045_v63, %v6044_v24  ;;  %v7203_v57 = vmul.f32 %v6045_v63, %v6045_v63  ;;  %v9095_v39 = vpop.f32.mrf.mxu0  ;;  %v7068_v27 = vadd.f32 %v7067_v59, %v6045_v63  ;;  %v6050_v45 = vadd.f32 %v9234_v35, %v5004_v31 }
 0x2c4   : > { %v7329_v61 = vadd.f32 %v7328_v36, %v7202_v7  ;;  %v5685_v62 = vpop.f32.mrf.mxu1  ;;  %v5009_v3 = vadd.f32 %v9095_v39, %v11761_v44  ;;  %v11764_v39 = vld [vmem:[#allocation47_spill] sm:$0xff] }
 0x2c5   : > { %8384 = vst [vmem:[%s10900_s11 + $0x160] sm:$0xff] %v8244_v34   ;;  %v4658_v2 = vpop.f32.mrf.mxu0  ;;  %v7069_v58 = vadd.f32 %v7068_v27, %v6046_v0  ;;  %v6048_v43 = vadd.f32 %v5685_v62, %v5002_v1  ;;  %v7208_v41 = vmul.f32 %v6050_v45, %v6050_v45  ;;  %v11765_v27 = vld [vmem:[#allocation50_spill] sm:$0xff] }
 0x2c6   : > { %v7330_v32 = vadd.f32 %v7329_v61, %v7203_v57  ;;  %v9235_v20 = vpop.f32.mrf.mxu1  ;;  %v5007_v18 = vadd.f32 %v4658_v2, %v11762_v38 }
 0x2c7   : > { %v6051_v28 = vadd.f32 %v9235_v20, %v5005_v25  ;;  %v9098_v21 = vpop.f32.mrf.mxu0  ;;  %v7070_v15 = vadd.f32 %v7069_v58, %v6047_v11  ;;  %v7206_v6 = vmul.f32 %v6048_v43, %v6048_v43  ;;  %v11766_v58 = vld [vmem:[#allocation52_spill] sm:$0xff] }
 0x2c8   : > { %v7331_v53 = vadd.f32 %v7330_v32, %v7204_v8  ;;  %v5688_v13 = vpop.f32.mrf.mxu1  ;;  %v5012_v61 = vadd.f32 %v9098_v21, %v11764_v39  ;;  %v11771_v39 = vld [vmem:[#allocation57_spill] sm:$0xff] }
 0x2c9   : > { %v8259_v40 = vpack.c.bf16 %v6051_v28, %v6050_v45  ;;  %v6049_v9 = vadd.f32 %v5688_v13, %v5003_v54  ;;  %v4671_v29 = vpop.f32.mrf.mxu0  ;;  %v7071_v22 = vadd.f32 %v7070_v15, %v6048_v43  ;;  %v7209_v60 = vmul.f32 %v6051_v28, %v6051_v28 }
 0x2ca   : > { %v7332_v16 = vadd.f32 %v7331_v53, %v7205_v17  ;;  %v9238_v12 = vpop.f32.mrf.mxu1  ;;  %v5010_v31 = vadd.f32 %v4671_v29, %v11763_v14 }
 0x2cb   : > { %8387 = vst [vmem:[%s10900_s11 + $0x178] sm:$0xff] %v8259_v40   ;;  %v8254_v23 = vpack.c.bf16 %v6049_v9, %v6048_v43  ;;  %v7207_v52 = vmul.f32 %v6049_v9, %v6049_v9  ;;  %v9099_v26 = vpop.f32.mrf.mxu0  ;;  %v7072_v48 = vadd.f32 %v7071_v22, %v6049_v9  ;;  %v6054_v5 = vadd.f32 %v9238_v12, %v5008_v51 }
 0x2cc   : > { %v7333_v37 = vadd.f32 %v7332_v16, %v7206_v6  ;;  %v5701_v47 = vpop.f32.mrf.mxu1  ;;  %v5013_v62 = vadd.f32 %v9099_v26, %v11765_v27  ;;  %v11768_v26 = vld [vmem:[#allocation51_spill] sm:$0xff] }
 0x2cd   : > { %8386 = vst [vmem:[%s10900_s11 + $0x170] sm:$0xff] %v8254_v23   ;;  %v4674_v24 = vpop.f32.mrf.mxu0  ;;  %v7073_v0 = vadd.f32 %v7072_v48, %v6050_v45  ;;  %v6052_v42 = vadd.f32 %v5701_v47, %v5006_v19  ;;  %v7212_v20 = vmul.f32 %v6054_v5, %v6054_v5  ;;  %v11769_v48 = vld [vmem:[#allocation54_spill] sm:$0xff] }
 0x2ce   : > { %v7334_v11 = vadd.f32 %v7333_v37, %v7207_v52  ;;  %v9239_v30 = vpop.f32.mrf.mxu1  ;;  %v5011_v32 = vadd.f32 %v4674_v24, %v11766_v58 }
 0x2cf   : > { %v6055_v10 = vadd.f32 %v9239_v30, %v5009_v3  ;;  %v9102_v56 = vpop.f32.mrf.mxu0  ;;  %v7074_v50 = vadd.f32 %v7073_v0, %v6051_v28  ;;  %v7210_v1 = vmul.f32 %v6052_v42, %v6052_v42  ;;  %v11770_v0 = vld [vmem:[#allocation56_spill] sm:$0xff] }
 0x2d0   : > { %v7335_v63 = vadd.f32 %v7334_v11, %v7208_v41  ;;  %v5704_v59 = vpop.f32.mrf.mxu1  ;;  %v5016_v37 = vadd.f32 %v9102_v56, %v11768_v26  ;;  %v11775_v26 = vld [vmem:[#allocation61_spill] sm:$0xff] }
 0x2d1   : > { %v8269_v7 = vpack.c.bf16 %v6055_v10, %v6054_v5  ;;  %v6053_v36 = vadd.f32 %v5704_v59, %v5007_v18  ;;  %v4687_v35 = vpop.f32.mrf.mxu0  ;;  %v7075_v46 = vadd.f32 %v7074_v50, %v6052_v42  ;;  %v7213_v21 = vmul.f32 %v6055_v10, %v6055_v10 }
 0x2d2   : > { %v7336_v34 = vadd.f32 %v7335_v63, %v7209_v60  ;;  %v9242_v57 = vpop.f32.mrf.mxu1  ;;  %v5014_v51 = vadd.f32 %v4687_v35, %v11767_v49 }
 0x2d3   : > { %8389 = vst [vmem:[%s10900_s11 + $0x188] sm:$0xff] %v8269_v7   ;;  %v8264_v4 = vpack.c.bf16 %v6053_v36, %v6052_v42  ;;  %v7211_v25 = vmul.f32 %v6053_v36, %v6053_v36  ;;  %v9103_v55 = vpop.f32.mrf.mxu0  ;;  %v7076_v2 = vadd.f32 %v7075_v46, %v6053_v36  ;;  %v6058_v15 = vadd.f32 %v9242_v57, %v5012_v61 }
 0x2d4   : > { %v7337_v54 = vadd.f32 %v7336_v34, %v7210_v1  ;;  %v5717_v8 = vpop.f32.mrf.mxu1  ;;  %v5017_v47 = vadd.f32 %v9103_v55, %v11769_v48  ;;  %v11772_v55 = vld [vmem:[#allocation55_spill] sm:$0xff] }
 0x2d5   : > { %8388 = vst [vmem:[%s10900_s11 + $0x180] sm:$0xff] %v8264_v4   ;;  %v4690_v43 = vpop.f32.mrf.mxu0  ;;  %v7077_v45 = vadd.f32 %v7076_v2, %v6054_v5  ;;  %v6056_v17 = vadd.f32 %v5717_v8, %v5010_v31  ;;  %v7216_v30 = vmul.f32 %v6058_v15, %v6058_v15  ;;  %v11773_v2 = vld [vmem:[#allocation58_spill] sm:$0xff] }
 0x2d6   : > { %v7338_v28 = vadd.f32 %v7337_v54, %v7211_v25  ;;  %v9243_v53 = vpop.f32.mrf.mxu1  ;;  %v5015_v11 = vadd.f32 %v4690_v43, %v11770_v0 }
 0x2d7   : > { %v6059_v13 = vadd.f32 %v9243_v53, %v5013_v62  ;;  %v9106_v40 = vpop.f32.mrf.mxu0  ;;  %v7078_v29 = vadd.f32 %v7077_v45, %v6055_v10  ;;  %v7214_v19 = vmul.f32 %v6056_v17, %v6056_v17  ;;  %v11774_v45 = vld [vmem:[#allocation60_spill] sm:$0xff] }
 0x2d8   : > { %v7339_v9 = vadd.f32 %v7338_v28, %v7212_v20  ;;  %v5720_v22 = vpop.f32.mrf.mxu1  ;;  %v5020_v54 = vadd.f32 %v9106_v40, %v11772_v55  ;;  %v11779_v55 = vld [vmem:[#allocation65_spill] sm:$0xff] }
 0x2d9   : > { %v8279_v6 = vpack.c.bf16 %v6059_v13, %v6058_v15  ;;  %v6057_v16 = vadd.f32 %v5720_v22, %v5011_v32  ;;  %v4703_v12 = vpop.f32.mrf.mxu0  ;;  %v7079_v33 = vadd.f32 %v7078_v29, %v6056_v17  ;;  %v7217_v56 = vmul.f32 %v6059_v13, %v6059_v13 }
 0x2da   : > { %v7340_v23 = vadd.f32 %v7339_v9, %v7213_v21  ;;  %v9246_v52 = vpop.f32.mrf.mxu1  ;;  %v5018_v61 = vadd.f32 %v4703_v12, %v11771_v39 }
 0x2db   : > { %8391 = vst [vmem:[%s10900_s11 + $0x198] sm:$0xff] %v8279_v6   ;;  %v8274_v44 = vpack.c.bf16 %v6057_v16, %v6056_v17  ;;  %v7215_v3 = vmul.f32 %v6057_v16, %v6057_v16  ;;  %v9107_v38 = vpop.f32.mrf.mxu0  ;;  %v7080_v24 = vadd.f32 %v7079_v33, %v6057_v16  ;;  %v6062_v50 = vadd.f32 %v9246_v52, %v5016_v37 }
 0x2dc   : > { %v7341_v18 = vadd.f32 %v7340_v23, %v7214_v19  ;;  %v5733_v41 = vpop.f32.mrf.mxu1  ;;  %v5021_v8 = vadd.f32 %v9107_v38, %v11773_v2  ;;  %v11776_v38 = vld [vmem:[#allocation59_spill] sm:$0xff] }
 0x2dd   : > { %8390 = vst [vmem:[%s10900_s11 + $0x190] sm:$0xff] %v8274_v44   ;;  %v4706_v42 = vpop.f32.mrf.mxu0  ;;  %v7081_v5 = vadd.f32 %v7080_v24, %v6058_v15  ;;  %v6060_v60 = vadd.f32 %v5733_v41, %v5014_v51  ;;  %v7220_v53 = vmul.f32 %v6062_v50, %v6062_v50  ;;  %v11777_v24 = vld [vmem:[#allocation62_spill] sm:$0xff] }
 0x2de   : > { %v7342_v10 = vadd.f32 %v7341_v18, %v7215_v3  ;;  %v9247_v63 = vpop.f32.mrf.mxu1  ;;  %v5019_v28 = vadd.f32 %v4706_v42, %v11774_v45 }
 0x2df   : > { %v6063_v59 = vadd.f32 %v9247_v63, %v5017_v47  ;;  %v9110_v7 = vpop.f32.mrf.mxu0  ;;  %v7082_v35 = vadd.f32 %v7081_v5, %v6059_v13  ;;  %v7218_v31 = vmul.f32 %v6060_v60, %v6060_v60  ;;  %v11778_v5 = vld [vmem:[#allocation64_spill] sm:$0xff] }
 0x2e0   : > { %v7343_v36 = vadd.f32 %v7342_v10, %v7216_v30  ;;  %v5736_v46 = vpop.f32.mrf.mxu1  ;;  %v5024_v18 = vadd.f32 %v9110_v7, %v11776_v38 }
 0x2e1   : > { %v8289_v1 = vpack.c.bf16 %v6063_v59, %v6062_v50  ;;  %v6061_v34 = vadd.f32 %v5736_v46, %v5015_v11  ;;  %v4719_v57 = vpop.f32.mrf.mxu0  ;;  %v7083_v14 = vadd.f32 %v7082_v35, %v6060_v60  ;;  %v7221_v40 = vmul.f32 %v6063_v59, %v6063_v59 }
 0x2e2   : > { %v7344_v4 = vadd.f32 %v7343_v36, %v7217_v56  ;;  %v9250_v25 = vpop.f32.mrf.mxu1  ;;  %v5022_v37 = vadd.f32 %v4719_v57, %v11775_v26 }
 0x2e3   : > { %8393 = vst [vmem:[%s10900_s11 + $0x1a8] sm:$0xff] %v8289_v1   ;;  %v8284_v27 = vpack.c.bf16 %v6061_v34, %v6060_v60  ;;  %v7219_v62 = vmul.f32 %v6061_v34, %v6061_v34  ;;  %v9111_v58 = vpop.f32.mrf.mxu0  ;;  %v7084_v43 = vadd.f32 %v7083_v14, %v6061_v34  ;;  %v6066_v29 = vadd.f32 %v9250_v25, %v5020_v54 }
 0x2e4   : > { %v7345_v32 = vadd.f32 %v7344_v4, %v7218_v31  ;;  %v5749_v20 = vpop.f32.mrf.mxu1  ;;  %v5025_v41 = vadd.f32 %v9111_v58, %v11777_v24  ;;  %v11780_v58 = vld [vmem:[#allocation63_spill] sm:$0xff] }
 0x2e5   : > { %8392 = vst [vmem:[%s10900_s11 + $0x1a0] sm:$0xff] %v8284_v27   ;;  %v4722_v17 = vpop.f32.mrf.mxu0  ;;  %v7085_v15 = vadd.f32 %v7084_v43, %v6062_v50  ;;  %v6064_v21 = vadd.f32 %v5749_v20, %v5018_v61  ;;  %v7224_v63 = vmul.f32 %v6066_v29, %v6066_v29  ;;  %v11781_v43 = vld [vmem:[#allocation66_spill] sm:$0xff] }
 0x2e6   : > { %v7346_v13 = vadd.f32 %v7345_v32, %v7219_v62  ;;  %v9251_v9 = vpop.f32.mrf.mxu1  ;;  %v5023_v10 = vadd.f32 %v4722_v17, %v11778_v5 }
 0x2e7   : > { %v6067_v22 = vadd.f32 %v9251_v9, %v5021_v8  ;;  %v9114_v6 = vpop.f32.mrf.mxu0  ;;  %v7086_v12 = vadd.f32 %v7085_v15, %v6063_v59  ;;  %v7222_v51 = vmul.f32 %v6064_v21, %v6064_v21  ;;  %v11782_v15 = vld [vmem:[#allocation68_spill] sm:$0xff] }
 0x2e8   : > { %v7347_v16 = vadd.f32 %v7346_v13, %v7220_v53  ;;  %v5752_v33 = vpop.f32.mrf.mxu1  ;;  %v5028_v32 = vadd.f32 %v9114_v6, %v11780_v58 }
 0x2e9   : > { %v8299_v19 = vpack.c.bf16 %v6067_v22, %v6066_v29  ;;  %v6065_v23 = vadd.f32 %v5752_v33, %v5019_v28  ;;  %v4735_v52 = vpop.f32.mrf.mxu0  ;;  %v7087_v49 = vadd.f32 %v7086_v12, %v6064_v21  ;;  %v7225_v7 = vmul.f32 %v6067_v22, %v6067_v22 }
 0x2ea   : > { %v7348_v44 = vadd.f32 %v7347_v16, %v7221_v40  ;;  %v9254_v3 = vpop.f32.mrf.mxu1  ;;  %v5026_v54 = vadd.f32 %v4735_v52, %v11779_v55 }
 0x2eb   : > { %8395 = vst [vmem:[%s10900_s11 + $0x1b8] sm:$0xff] %v8299_v19   ;;  %v8294_v48 = vpack.c.bf16 %v6065_v23, %v6064_v21  ;;  %v7223_v47 = vmul.f32 %v6065_v23, %v6065_v23  ;;  %v9115_v0 = vpop.f32.mrf.mxu0  ;;  %v7088_v42 = vadd.f32 %v7087_v49, %v6065_v23  ;;  %v6070_v35 = vadd.f32 %v9254_v3, %v5024_v18 }
 0x2ec   : > { %v7349_v11 = vadd.f32 %v7348_v44, %v7222_v51  ;;  %v5765_v30 = vpop.f32.mrf.mxu1  ;;  %v5029_v20 = vadd.f32 %v9115_v0, %v11781_v43  ;;  %v11784_v0 = vld [vmem:[#allocation67_spill] sm:$0xff] }
 0x2ed   : > { %8394 = vst [vmem:[%s10900_s11 + $0x1b0] sm:$0xff] %v8294_v48   ;;  %v4738_v60 = vpop.f32.mrf.mxu0  ;;  %v7089_v50 = vadd.f32 %v7088_v42, %v6066_v29  ;;  %v6068_v56 = vadd.f32 %v5765_v30, %v5022_v37  ;;  %v7228_v9 = vmul.f32 %v6070_v35, %v6070_v35  ;;  %v11785_v42 = vld [vmem:[#allocation70_spill] sm:$0xff]  ;;  %v11788_v43 = vld [vmem:[#allocation71_spill] sm:$0xff] }
 0x2ee   : > { %v7350_v59 = vadd.f32 %v7349_v11, %v7223_v47  ;;  %v9255_v36 = vpop.f32.mrf.mxu1  ;;  %v5027_v13 = vadd.f32 %v4738_v60, %v11782_v15  ;;  %v11783_v47 = vld [vmem:[#allocation69_spill] sm:$0xff] }
 0x2ef   : > { %v6071_v46 = vadd.f32 %v9255_v36, %v5025_v41  ;;  %v9118_v1 = vpop.f32.mrf.mxu0  ;;  %v7090_v57 = vadd.f32 %v7089_v50, %v6067_v22  ;;  %v7226_v61 = vmul.f32 %v6068_v56, %v6068_v56 }
 0x2f0   : > { %v7351_v34 = vadd.f32 %v7350_v59, %v7224_v63  ;;  %v5768_v14 = vpop.f32.mrf.mxu1  ;;  %v5032_v11 = vadd.f32 %v9118_v1, %v11784_v0  ;;  %v11786_v63 = vld [vmem:[#allocation72_spill] sm:$0xff] }
 0x2f1   : > { %v8309_v31 = vpack.c.bf16 %v6071_v46, %v6070_v35  ;;  %v6069_v4 = vadd.f32 %v5768_v14, %v5023_v10  ;;  %v4751_v25 = vpop.f32.mrf.mxu0  ;;  %v7091_v39 = vadd.f32 %v7090_v57, %v6068_v56  ;;  %v7229_v6 = vmul.f32 %v6071_v46, %v6071_v46 }
 0x2f2   : > { %v7352_v27 = vadd.f32 %v7351_v34, %v7225_v7  ;;  %v9258_v62 = vpop.f32.mrf.mxu1  ;;  %v5030_v38 = vadd.f32 %v4751_v25, %v11783_v47 }
 0x2f3   : > { %8397 = vst [vmem:[%s10900_s11 + $0x1c8] sm:$0xff] %v8309_v31   ;;  %v8304_v2 = vpack.c.bf16 %v6069_v4, %v6068_v56  ;;  %v7227_v8 = vmul.f32 %v6069_v4, %v6069_v4  ;;  %v9119_v45 = vpop.f32.mrf.mxu0  ;;  %v7092_v17 = vadd.f32 %v7091_v39, %v6069_v4  ;;  %v6074_v12 = vadd.f32 %v9258_v62, %v5028_v32 }
 0x2f4   : > { %v7353_v28 = vadd.f32 %v7352_v27, %v7226_v61  ;;  %v5781_v53 = vpop.f32.mrf.mxu1  ;;  %v5033_v30 = vadd.f32 %v9119_v45, %v11785_v42  ;;  %v11789_v45 = vld [vmem:[#allocation74_spill] sm:$0xff] }
 0x2f5   : > { %8396 = vst [vmem:[%s10900_s11 + $0x1c0] sm:$0xff] %v8304_v2   ;;  %v4754_v21 = vpop.f32.mrf.mxu0  ;;  %v7093_v29 = vadd.f32 %v7092_v17, %v6070_v35  ;;  %v6072_v40 = vadd.f32 %v5781_v53, %v5026_v54  ;;  %v7232_v59 = vmul.f32 %v6074_v12, %v6074_v12  ;;  %v11787_v54 = vld [vmem:[#allocation73_spill] sm:$0xff] }
 0x2f6   : > { %v7354_v22 = vadd.f32 %v7353_v28, %v7227_v8  ;;  %v9259_v16 = vpop.f32.mrf.mxu1  ;;  %v5031_v50 = vadd.f32 %v4754_v21, %v11786_v63 }
 0x2f7   : > { %v6075_v33 = vadd.f32 %v9259_v16, %v5029_v20  ;;  %v9122_v19 = vpop.f32.mrf.mxu0  ;;  %v7094_v52 = vadd.f32 %v7093_v29, %v6071_v46  ;;  %v7230_v26 = vmul.f32 %v6072_v40, %v6072_v40 }
 0x2f8   : > { %v7355_v23 = vadd.f32 %v7354_v22, %v7228_v9  ;;  %v5784_v49 = vpop.f32.mrf.mxu1  ;;  %v5036_v20 = vadd.f32 %v9122_v19, %v11788_v43 }
 0x2f9   : > { %v8319_v51 = vpack.c.bf16 %v6075_v33, %v6074_v12  ;;  %v6073_v44 = vadd.f32 %v5784_v49, %v5027_v13  ;;  %v7095_v3 = vadd.f32 %v7094_v52, %v6072_v40  ;;  %v4767_v18 = vpop.f32.mrf.mxu0  ;;  %v7233_v14 = vmul.f32 %v6075_v33, %v6075_v33  ;;  %v11790_v13 = vld [vmem:[#allocation77_spill] sm:$0xff] }
 0x2fa   : > { %v7356_v37 = vadd.f32 %v7355_v23, %v7229_v6  ;;  %v9262_v48 = vpop.f32.mrf.mxu1  ;;  %v5034_v2 = vadd.f32 %v4767_v18, %v11787_v54 }
 0x2fb   : > { %8399 = vst [vmem:[%s10900_s11 + $0x1d8] sm:$0xff] %v8319_v51   ;;  %v8314_v24 = vpack.c.bf16 %v6073_v44, %v6072_v40  ;;  %v7231_v41 = vmul.f32 %v6073_v44, %v6073_v44  ;;  %v7096_v10 = vadd.f32 %v7095_v3, %v6073_v44  ;;  %v9123_v7 = vpop.f32.mrf.mxu0  ;;  %v6078_v34 = vadd.f32 %v9262_v48, %v5032_v11 }
 0x2fc   : > { %v7357_v5 = vadd.f32 %v7356_v37, %v7230_v26  ;;  %v5797_v60 = vpop.f32.mrf.mxu1  ;;  %v5037_v28 = vadd.f32 %v9123_v7, %v11789_v45 }
 0x2fd   : > { %8398 = vst [vmem:[%s10900_s11 + $0x1d0] sm:$0xff] %v8314_v24   ;;  %v7097_v56 = vadd.f32 %v7096_v10, %v6074_v12  ;;  %v6076_v35 = vadd.f32 %v5797_v60, %v5030_v38  ;;  %v4770_v8 = vpop.f32.mrf.mxu0  ;;  %v7236_v9 = vmul.f32 %v6078_v34, %v6078_v34 }
 0x2fe   : > { %v7358_v36 = vadd.f32 %v7357_v5, %v7231_v41  ;;  %v9263_v46 = vpop.f32.mrf.mxu1  ;;  %v5035_v21 = vadd.f32 %v4770_v8, %v11790_v13 }
 0x2ff   : > { %v6079_v57 = vadd.f32 %v9263_v46, %v5033_v30  ;;  %v7098_v1 = vadd.f32 %v7097_v56, %v6075_v33  ;;  %v7234_v27 = vmul.f32 %v6076_v35, %v6076_v35 }
 0x300   : > { %v7359_v31 = vadd.f32 %v7358_v36, %v7232_v59  ;;  %v5800_v4 = vpop.f32.mrf.mxu1 }
 0x301   : > { %v8329_v25 = vpack.c.bf16 %v6079_v57, %v6078_v34  ;;  %v6077_v39 = vadd.f32 %v5800_v4, %v5031_v50  ;;  %v7099_v61 = vadd.f32 %v7098_v1, %v6076_v35  ;;  %v7237_v6 = vmul.f32 %v6079_v57, %v6079_v57 }
 0x302   : > { %v7360_v62 = vadd.f32 %v7359_v31, %v7233_v14  ;;  %v9266_v55 = vpop.f32.mrf.mxu1 }
 0x303   : > { %8401 = vst [vmem:[%s10900_s11 + $0x1e8] sm:$0xff] %v8329_v25   ;;  %v8324_v58 = vpack.c.bf16 %v6077_v39, %v6076_v35  ;;  %v7235_v32 = vmul.f32 %v6077_v39, %v6077_v39  ;;  %v7100_v53 = vadd.f32 %v7099_v61, %v6077_v39  ;;  %v6082_v12 = vadd.f32 %v9266_v55, %v5036_v20 }
 0x304   : > { %v7361_v17 = vadd.f32 %v7360_v62, %v7234_v27  ;;  %v5813_v15 = vpop.f32.mrf.mxu1 }
 0x305   : > { %8400 = vst [vmem:[%s10900_s11 + $0x1e0] sm:$0xff] %v8324_v58   ;;  %v7101_v29 = vadd.f32 %v7100_v53, %v6078_v34  ;;  %v6080_v40 = vadd.f32 %v5813_v15, %v5034_v2  ;;  %v7240_v18 = vmul.f32 %v6082_v12, %v6082_v12 }
 0x306   : > { %v7362_v22 = vadd.f32 %v7361_v17, %v7235_v32  ;;  %v9267_v16 = vpop.f32.mrf.mxu1 }
 0x307   : > { %v6083_v33 = vadd.f32 %v9267_v16, %v5037_v28  ;;  %v7102_v23 = vadd.f32 %v7101_v29, %v6079_v57  ;;  %v7238_v3 = vmul.f32 %v6080_v40, %v6080_v40 }
 0x308   : > { %v7363_v19 = vadd.f32 %v7362_v22, %v7236_v9  ;;  %v5816_v52 = vpop.f32.mrf.mxu1 }
 0x309   : > { %v8339_v49 = vpack.c.bf16 %v6083_v33, %v6082_v12  ;;  %v6081_v51 = vadd.f32 %v5816_v52, %v5035_v21  ;;  %v7103_v44 = vadd.f32 %v7102_v23, %v6080_v40 }
 0x30a   : > { %v7364_v26 = vadd.f32 %v7363_v19, %v7237_v6 }
 0x30b   : > { %8403 = vst [vmem:[%s10900_s11 + $0x1f8] sm:$0xff] %v8339_v49   ;;  %v8334_v37 = vpack.c.bf16 %v6081_v51, %v6080_v40  ;;  %v7239_v48 = vmul.f32 %v6081_v51, %v6081_v51  ;;  %v7104_v38 = vadd.f32 %v7103_v44, %v6081_v51 }
 0x30c   : > { %v7365_v47 = vadd.f32 %v7364_v26, %v7238_v3 }
 0x30d   : > { %8402 = vst [vmem:[%s10900_s11 + $0x1f0] sm:$0xff] %v8334_v37   ;;  %v7105_v24 = vadd.f32 %v7104_v38, %v6082_v12 }
 0x30e   : > { %v7366_v41 = vadd.f32 %v7365_v47, %v7239_v48 }
 0x30f   : > { %9431 = shalt.err (!%p9428_p3)
}
 0x310   : > { %s9432_s5 = scalar_lea.hbm %s11170_s22, 8192  ;;  %s9436_s10 = scalar_lea.hbm %s11286_s2, 16384 }
 0x311   : > { %p9433_p4 = scmp.ne.s32.totalorder %s11170_s22, %s9432_s5  ;;  %p9437_p9 = scmp.lt.s32.totalorder %s11170_s22, %s11286_s2 }
 0x312   : > { %p9438_p10 = scmp.lt.s32.totalorder %s9436_s10, %s9432_s5 }
 0x313   : > { %p9434_p7 = pnand %p9433_p4, %p9606_p5 }
 0x314   : > { %p9439_p11 = por %p9438_p10, %p9437_p9 }
 0x315   : > { %p9435_p8 = pneg %p9434_p7 }
 0x317   : > { %p9440_p12 = pnand %p9439_p11, %p9435_p8 }
 0x319   : > { %9443 = shalt.err (!%p9440_p12)
}
 0x31a   : > { %s9537_s13 = smov 64   ;;  %s9538_s14 = smov 4   ;;  %v7241_v0 = vmul.f32 %v6083_v33, %v6083_v33  ;;  %v7106_v11 = vadd.f32 %v7105_v24, %v6083_v33  ;;  %v7367_v42 = vadd.f32 %v7366_v41, %v7240_v18 }
 0x31b   : > { %9269 = dma.vmem_to_hbm [thread:$0]  (%p9606_p5), %s11172_s12, 8192, %s11170_s22, %s7377_s23, %s9537_s13, %s9537_s13, %s9538_s14  }
 0x31c   : > { %v7107_v30 = vrot.slane %v7106_v11, 4  ;;  %v7368_v5 = vadd.f32 %v7367_v42, %v7241_v0  ;;  %s7381_s27 = sand.u32 1, %s9587_s19   ;;  %s7888_s28 = sshll.u32 %s9587_s19, 4 }
 0x31d   : > { %s200_s29 = scalar_lea.vmem [#allocation5], %s10886_s8  ;;  %s206_s12 = scalar_lea.vmem [#allocation7], %s10886_s8 }
 0x31e   : > { %v7369_v10 = vrot.slane %v7368_v5, 4  ;;  %v7108_v60 = vadd.f32 %v7107_v30, %v7106_v11  ;;  %s7414_s30 = sshll.u32 %s200_s29, 4  ;;  %s7427_s22 = sshll.u32 %s206_s12, 4  ;;  %s11210_s30 = int_to_ptr.vmem [resolvable:$true] %s7414_s30  ;;  %s11217_s22 = int_to_ptr.vmem [resolvable:$true] %s7427_s22 }
 0x31f   : > { %s11208_s6 = scalar_lea.hbm %s11287_s3, %s7888_s28  ;;  %s11215_s10 = scalar_lea.hbm %s11288_s4, %s7888_s28 }
 0x320   : > { %v7109_v63 = vrot.slane %v7108_v60, 2  ;;  %v7370_v50 = vadd.f32 %v7369_v10, %v7368_v5  ;;  %s11219_s11 = scalar_lea.sflag [#allocation6], %s7381_s27  ;;  %s9444_s9 = scalar_lea.vmem %s11210_s30, 16 }
 0x321   : > { %p9445_p13 = scmp.ne.s32.totalorder %s11210_s30, %s9444_s9  ;;  %s9539_s13 = smov [#allocation5]  }
 0x322   : > { %v7110_v59 = vadd.f32 %v7109_v63, %v7108_v60  ;;  %v7371_v56 = vrot.slane %v7370_v50, 2  ;;  %s9448_s14 = sshll.u32 %s9539_s13, 4  ;;  %s9449_s14 = int_to_ptr.vmem [resolvable:$false] %s9448_s14 }
 0x323   : > { %p9446_p0 = pnand %p9445_p13, %p9606_p5  ;;  %s9450_s23 = scalar_lea.vmem %s9449_s14, 32 }
 0x324   : > { %v7111_v36 = vrot.slane %v7110_v59, 1  ;;  %v7372_v35 = vadd.f32 %v7371_v56, %v7370_v50  ;;  %p9451_p2 = scmp.lt.s32.totalorder %s11210_s30, %s9449_s14  ;;  %p9452_p3 = scmp.lt.s32.totalorder %s9450_s23, %s9444_s9 }
 0x325   : > { %p9447_p1 = pneg %p9446_p0 }
 0x326   : > { %v7112_v46 = vadd.f32 %v7111_v36, %v7110_v59  ;;  %v7373_v7 = vrot.slane %v7372_v35, 1  ;;  %p9453_p4 = por %p9452_p3, %p9451_p2 }
 0x328   : > { %7113 = vst [vmem:[%s200_s29] sm:$0x1] %v7112_v46  ;;  %v7374_v34 = vadd.f32 %v7373_v7, %v7372_v35  ;;  %p9454_p7 = pnand %p9453_p4, %p9447_p1 }
 0x32a   : > { %9457 = shalt.err (!%p9454_p7)
}
 0x32b   : > { %s9458_s27 = scalar_lea.hbm %s11208_s6, 16  ;;  %s9462_s5 = scalar_lea.hbm %s11287_s3, 32 }
 0x32c   : > { %p9459_p8 = scmp.ne.s32.totalorder %s11208_s6, %s9458_s27  ;;  %p9463_p11 = scmp.lt.s32.totalorder %s11208_s6, %s11287_s3 }
 0x32d   : > { %p9464_p12 = scmp.lt.s32.totalorder %s9462_s5, %s9458_s27 }
 0x32e   : > { %p9460_p9 = pnand %p9459_p8, %p9606_p5 }
 0x32f   : > { %p9465_p13 = por %p9464_p12, %p9463_p11 }
 0x330   : > { %p9461_p10 = pneg %p9460_p9 }
 0x332   : > { %p9466_p0 = pnand %p9465_p13, %p9461_p10 }
 0x334   : > { %9469 = shalt.err (!%p9466_p0)
}
 0x335   : > { %9270 = dma.vmem_to_hbm [thread:$0]  (%p9606_p5), %s11210_s30, 16, %s11208_s6, %s11219_s11   ;;  %7375 = vst [vmem:[%s206_s12] sm:$0x1] %v7374_v34 }
 0x336   : > { %s9470_s9 = scalar_lea.vmem %s11217_s22, 16  ;;  %s9540_s13 = smov [#allocation7]  }
 0x337   : > { %p9471_p1 = scmp.ne.s32.totalorder %s11217_s22, %s9470_s9  ;;  %s9474_s14 = sshll.u32 %s9540_s13, 4  ;;  %s9475_s14 = int_to_ptr.vmem [resolvable:$false] %s9474_s14 }
 0x338   : > { %s9476_s23 = scalar_lea.vmem %s9475_s14, 32  ;;  %p9477_p4 = scmp.lt.s32.totalorder %s11217_s22, %s9475_s14 }
 0x339   : > { %p9472_p2 = pnand %p9471_p1, %p9606_p5  ;;  %p9478_p7 = scmp.lt.s32.totalorder %s9476_s23, %s9470_s9 }
 0x33b   : > { %p9473_p3 = pneg %p9472_p2  ;;  %p9479_p8 = por %p9478_p7, %p9477_p4 }
 0x33d   : > { %p9480_p9 = pnand %p9479_p8, %p9473_p3 }
 0x33f   : > { %9483 = shalt.err (!%p9480_p9)
}
 0x340   : > { %s9484_s8 = scalar_lea.hbm %s11215_s10, 16  ;;  %s9488_s6 = scalar_lea.hbm %s11288_s4, 32 }
 0x341   : > { %p9485_p10 = scmp.ne.s32.totalorder %s11215_s10, %s9484_s8  ;;  %p9489_p13 = scmp.lt.s32.totalorder %s11215_s10, %s11288_s4 }
 0x342   : > { %p9490_p0 = scmp.lt.s32.totalorder %s9488_s6, %s9484_s8 }
 0x343   : > { %p9486_p11 = pnand %p9485_p10, %p9606_p5 }
 0x344   : > { %p9491_p1 = por %p9490_p0, %p9489_p13 }
 0x345   : > { %p9487_p12 = pneg %p9486_p11 }
 0x347   : > { %p9492_p2 = pnand %p9491_p1, %p9487_p12 }
 0x349   : > { %9495 = shalt.err (!%p9492_p2)
}
 0x34a   : > { %9271 = dma.vmem_to_hbm [thread:$0]  (%p9606_p5), %s11217_s22, 16, %s11215_s10, %s11219_s11  }
 0x34b PF: > { %p9285_p3 = scmp.ge.s32.totalorder %s9534_s18, 2  ;;  %s7439_s29 = sand.u32 1, %s9522_s15  }
 0x34c   : > { %s7440_s5 = scalar_lea.sflag [#allocation4], %s7439_s29 }
 0x34d   : > { %p9276_p4 = pnand %p9285_p3, %p9610_p6 }
 0x34f   : > { %p9277_p7 = pneg %p9276_p4 }
 0x351   : > { %9513 = dma.done.wait (%p9277_p7), %s7440_s5, 8192  }
 0x352   : > { %9515 = vsyncadd (%p9277_p7), %s7440_s5, 4294959104  ;;  %s7448_s19 = sand.u32 1, %s7539_s20  }
 0x353   : > { %s7449_s25 = scalar_lea.sflag [#allocation6], %s7448_s19 }
 0x354   : > { %9517 = dma.done.wait (%p9277_p7), %s7449_s25, 32  }
 0x355   : > { %9519 = vsyncadd (%p9277_p7), %s7449_s25, 4294967264  ;;  %p18_p5 = scmp.ge.s32.totalorder %s9591_s21, 4   ;;  %s11791_s15 = smov %s9526_s16 }
 0x356   : > { %s11792_s16 = smov %s9530_s17  ;;  %s11793_s17 = smov %s9604_s24 }
 0x357   : > { %s11794_s18 = smov %s9591_s21  ;;  %20 = sbr.rel (!%p18_p5) target bundleno = 5 (0x5), region = 98 }
 0x35c   :  { %7461 = vsyncpa [#allocation4], 1 }
 0x35d   :  { %7463 = vsyncpa [#allocation4 + $0x1], 1 }
 0x35e   :  { %7464 = vsyncpa [#allocation6], 1 }
 0x35f   :  { %7466 = vsyncpa [#allocation6 + $0x1], 1 }

</bundles_post_ra>
